<compile_context>
chip_gen: v6e
topology: v6e:2x2x1
jax: 0.10.0
libtpu: 0.0.40
codegen_flags: <defaults>
</compile_context>

<pallas_src>
import numpy as np
import jax
import jax.numpy as jnp
from jax import lax
from jax.experimental import pallas as pl
from jax.experimental.pallas import tpu as pltpu

# ---- static config (mirrors the attributes set on the torch module) ----
B = 256                                 # Xplique perturbations per launch (MXU M dim)
IMG_C, IMG_H, IMG_W = 3, 16, 16         # images: (B, 3, 16, 16)  [NCHW]
D_IN = IMG_C * IMG_H * IMG_W            # 768 (multiple of 128 -> lane-aligned K)
HID = 32                                # synthetic head hidden width
NQ = 8                                  # number of queries (GroundingDINO: 900)
NCLS = 16                               # logits last dim (GroundingDINO: 256)
ORIG_W, ORIG_H = 64.0, 48.0             # self.w, self.h (original image size)
TARGET_BOX = (10.0, 8.0, 40.0, 30.0)    # self.target_box  (xyxy, pixel coords)
TARGET_LABEL = (1, 3, 5)                # self.target_label (class indices)
NT = len(TARGET_LABEL)                  # 3
D2 = NT * NQ + 4 * NQ                   # fused second-matmul width (56)


# --------------------------------------------------------------------------
# Single fused kernel: head matmuls + sigmoid / box-convert / IoU / reductions
# --------------------------------------------------------------------------
def _fused_kernel(x_ref, w1_ref, b1_ref, w2_ref, b2_ref, scale_ref, out_ref):
    # x_ref    : (B, D_IN)  f32 flattened NCHW image (cast to bf16 in-kernel)
    # w1_ref   : (HID, D_IN) bf16  (trans_b layout: lane dim = D_IN, dense)
    # b1_ref   : (1, HID)   f32
    # w2_ref   : (HID, D2)  f32  — [target-class logits (class-major) | boxes (coord-major)]
    # b2_ref   : (1, D2)    f32
    # scale_ref: (1, D2)    f32  — 1.0 in class lanes, W/H/W/H in box lanes
    # out_ref  : (B, 1)     f32  — scores
    xb = x_ref[...].astype(jnp.bfloat16)                 # VPU cast, MXU runs native bf16

    # First matmul, trans_b form: contract the last dim of both operands
    # (no materialized transpose, no lane-padded (768, 32) buffer).
    h = lax.dot_general(xb, w1_ref[...],
                        dimension_numbers=(((1,), (1,)), ((), ())),
                        preferred_element_type=jnp.float32) + b1_ref[...]
    h = jnp.maximum(h, 0.0)                              # (B, HID) f32

    z = jnp.dot(h, w2_ref[...],
                preferred_element_type=jnp.float32) + b2_ref[...]   # (B, D2)

    # One full-vreg sigmoid + one multiply by the precomputed scale vector,
    # then static lane slices of the result.
    s = jax.nn.sigmoid(z) * scale_ref[...]               # (B, D2)

    # --- class score: max over the NT target classes (post-sigmoid; monotone) ---
    m = s[:, 0:NQ]
    for c in range(1, NT):
        m = jnp.maximum(m, s[:, c * NQ:(c + 1) * NQ])
    cls_score = m                                        # (B, NQ)

    # --- boxes already sigmoid'ed and scaled to pixels; convert cxcywh -> xyxy ---
    off = NT * NQ
    cx = s[:, off + 0 * NQ: off + 1 * NQ]
    cy = s[:, off + 1 * NQ: off + 2 * NQ]
    bw = s[:, off + 2 * NQ: off + 3 * NQ]
    bh = s[:, off + 3 * NQ: off + 4 * NQ]
    x1 = cx - 0.5 * bw
    y1 = cy - 0.5 * bh
    x2 = cx + 0.5 * bw
    y2 = cy + 0.5 * bh

    tx1, ty1, tx2, ty2 = TARGET_BOX
    ix1 = jnp.maximum(x1, tx1)
    iy1 = jnp.maximum(y1, ty1)
    ix2 = jnp.minimum(x2, tx2)
    iy2 = jnp.minimum(y2, ty2)
    inter_area = jnp.maximum(ix2 - ix1, 0.0) * jnp.maximum(iy2 - iy1, 0.0)
    box_area = bw * bh                                   # == (x2-x1)*(y2-y1), no cancellation
    target_area = (tx2 - tx1) * (ty2 - ty1)
    union_area = box_area + target_area - inter_area     # TARGET_BOX area > 0, no eps needed
    iou = inter_area / union_area                        # (B, NQ)

    out_ref[...] = jnp.max(iou * cls_score, axis=-1, keepdims=True)  # (B, 1)


def grounding_dino_xplique_forward(images, fused_params):
    """images: (B, C, H, W) f32 NCHW -> scores (B, 1)."""
    w1t, b1, w2, b2, scale = fused_params
    x = images.reshape(B, D_IN)          # free metadata reshape of contiguous NCHW, stays f32
    vmem = pl.BlockSpec(memory_space=pltpu.MemorySpace.VMEM)
    return pl.pallas_call(
        _fused_kernel,
        out_shape=jax.ShapeDtypeStruct((B, 1), jnp.float32),
        in_specs=[vmem] * 6,
        out_specs=vmem,
    )(x, w1t, b1, w2, b2, scale)


forward_jit = jax.jit(grounding_dino_xplique_forward)


# --------------------------------------------------------------------------
# Parameter construction / one-time trace-level prep
# --------------------------------------------------------------------------
def make_raw_params(key):
    """Raw synthetic detection-head params (full NCLS logits head, NQx4 boxes)."""
    ks = jax.random.split(key, 6)
    w1 = (jax.random.normal(ks[0], (D_IN, HID), jnp.float32) * 0.05).astype(jnp.bfloat16)
    b1 = jax.random.normal(ks[1], (1, HID), jnp.float32) * 0.05
    wl = jax.random.normal(ks[2], (HID, NQ * NCLS), jnp.float32) * 0.2
    bl = jax.random.normal(ks[3], (1, NQ * NCLS), jnp.float32) * 0.1
    wb = jax.random.normal(ks[4], (HID, NQ * 4), jnp.float32) * 0.2
    bb = jax.random.normal(ks[5], (1, NQ * 4), jnp.float32) * 0.1
    return (w1, b1, wl, bl, wb, bb)


def prepare_fused_params(raw_params):
    """One-time prep:
      * w1 stored (HID, D_IN) for the trans_b matmul (lane-dense layout),
      * logits head sliced to the static target classes (class-major layout),
      * box head reordered coordinate-major,
      * both concatenated into a single second-stage weight/bias,
      * (1, D2) post-sigmoid scale vector (1 for classes, W/H/W/H for boxes)."""
    w1, b1, wl, bl, wb, bb = raw_params
    lbl = jnp.array(TARGET_LABEL, dtype=jnp.int32)

    w1_t = jnp.transpose(w1)                                  # (HID, D_IN) bf16

    wl_t = wl.reshape(HID, NQ, NCLS)[:, :, lbl]               # (HID, NQ, NT)
    wl_t = jnp.transpose(wl_t, (0, 2, 1)).reshape(HID, NT * NQ)
    bl_t = bl.reshape(1, NQ, NCLS)[:, :, lbl]                 # (1, NQ, NT)
    bl_t = jnp.transpose(bl_t, (0, 2, 1)).reshape(1, NT * NQ)

    wb_t = jnp.transpose(wb.reshape(HID, NQ, 4), (0, 2, 1)).reshape(HID, 4 * NQ)
    bb_t = jnp.transpose(bb.reshape(1, NQ, 4), (0, 2, 1)).reshape(1, 4 * NQ)

    w2 = jnp.concatenate([wl_t, wb_t], axis=1)                # (HID, D2) f32
    b2 = jnp.concatenate([bl_t, bb_t], axis=1)                # (1, D2)   f32

    scale = jnp.asarray(np.concatenate([
        np.ones(NT * NQ, np.float32),
        np.full(NQ, ORIG_W, np.float32),
        np.full(NQ, ORIG_H, np.float32),
        np.full(NQ, ORIG_W, np.float32),
        np.full(NQ, ORIG_H, np.float32),
    ]).reshape(1, D2))
    return (w1_t, b1, w2, b2, scale)


# --------------------------------------------------------------------------
# Pure-JAX reference (mirrors the torch forward) for a correctness check
# --------------------------------------------------------------------------
def reference_forward(images, raw_params):
    w1, b1, wl, bl, wb, bb = raw_params
    x = images.reshape(B, D_IN).astype(jnp.bfloat16)
    h = jnp.maximum(
        jnp.dot(x, w1, preferred_element_type=jnp.float32) + b1, 0.0)
    logits = (jnp.dot(h, wl, preferred_element_type=jnp.float32) + bl
              ).reshape(B, NQ, NCLS)
    boxes = jax.nn.sigmoid(
        jnp.dot(h, wb, preferred_element_type=jnp.float32) + bb
    ).reshape(B, NQ, 4)

    sig = jax.nn.sigmoid(logits)
    scale = jnp.array([ORIG_W, ORIG_H, ORIG_W, ORIG_H], jnp.float32)
    bx = boxes * scale
    cx, cy, bw, bh = bx[..., 0], bx[..., 1], bx[..., 2], bx[..., 3]
    x1, y1, x2, y2 = cx - bw / 2, cy - bh / 2, cx + bw / 2, cy + bh / 2
    tx1, ty1, tx2, ty2 = TARGET_BOX
    inter = (jnp.clip(jnp.minimum(x2, tx2) - jnp.maximum(x1, tx1), 0) *
             jnp.clip(jnp.minimum(y2, ty2) - jnp.maximum(y1, ty1), 0))
    union = (x2 - x1) * (y2 - y1) + (tx2 - tx1) * (ty2 - ty1) - inter
    iou = inter / union
    cls_score = jnp.max(sig[:, :, jnp.array(TARGET_LABEL)], axis=-1)
    return jnp.max(iou * cls_score, axis=-1, keepdims=True)


if __name__ == "__main__":
    key = jax.random.PRNGKey(0)
    k_img, k_par = jax.random.split(key)
    images = jax.random.normal(k_img, (B, IMG_C, IMG_H, IMG_W), jnp.float32)  # NCHW
    raw_params = make_raw_params(k_par)
    fused_params = prepare_fused_params(raw_params)   # one-time param prep

    scores = forward_jit(images, fused_params)
    scores = jax.block_until_ready(scores)

    ref = jax.block_until_ready(jax.jit(reference_forward)(images, raw_params))
    assert scores.shape == (B, 1), scores.shape
    np.testing.assert_allclose(np.asarray(scores), np.asarray(ref),
                               rtol=3e-4, atol=1e-5)
    print("KERNEL_OK")
</pallas_src>

<mosaic_0001>
module attributes {stable_mosaic.version = 11 : i64} {
  func.func @_fused_kernel(%arg0: memref<256x768xf32, #tpu.memory_space<vmem>>, %arg1: memref<32x768xbf16, #tpu.memory_space<vmem>>, %arg2: memref<1x32xf32, #tpu.memory_space<vmem>>, %arg3: memref<32x56xf32, #tpu.memory_space<vmem>>, %arg4: memref<1x56xf32, #tpu.memory_space<vmem>>, %arg5: memref<1x56xf32, #tpu.memory_space<vmem>>, %arg6: memref<256x1xf32, #tpu.memory_space<vmem>>) attributes {dimension_semantics = [], scalar_prefetch = 0 : i64, scratch_operands = 0 : i64, tpu.core_type = #tpu.core_type<tc>} {
    %c0 = arith.constant 0 : index
    %c0_0 = arith.constant 0 : index
    %0 = vector.load %arg0[%c0, %c0_0] : memref<256x768xf32, #tpu.memory_space<vmem>>, vector<256x768xf32>
    %1 = arith.truncf %0 : vector<256x768xf32> to vector<256x768xbf16>
    %c0_1 = arith.constant 0 : index
    %c0_2 = arith.constant 0 : index
    %2 = vector.load %arg1[%c0_1, %c0_2] : memref<32x768xbf16, #tpu.memory_space<vmem>>, vector<32x768xbf16>
    %cst = arith.constant dense<0.000000e+00> : vector<256x32xf32>
    %3 = tpu.matmul %1, %2, %cst {dimension_numbers = #tpu.dot_dimension_numbers<[1], [1], [0], [0], [0, 0, 1, 0], [], []>} : vector<256x768xbf16>, vector<32x768xbf16>, vector<256x32xf32> -> vector<256x32xf32>
    %c0_3 = arith.constant 0 : index
    %c0_4 = arith.constant 0 : index
    %4 = vector.load %arg2[%c0_3, %c0_4] : memref<1x32xf32, #tpu.memory_space<vmem>>, vector<1x32xf32>
    %5 = vector.broadcast %4 : vector<1x32xf32> to vector<256x32xf32>
    %6 = arith.addf %3, %5 : vector<256x32xf32>
    %cst_5 = arith.constant 0.000000e+00 : f32
    %7 = vector.broadcast %cst_5 : f32 to vector<256x32xf32>
    %8 = arith.maximumf %6, %7 : vector<256x32xf32>
    %c0_6 = arith.constant 0 : index
    %c0_7 = arith.constant 0 : index
    %9 = vector.load %arg3[%c0_6, %c0_7] : memref<32x56xf32, #tpu.memory_space<vmem>>, vector<32x56xf32>
    %cst_8 = arith.constant dense<0.000000e+00> : vector<256x56xf32>
    %10 = tpu.matmul %8, %9, %cst_8 {dimension_numbers = #tpu.dot_dimension_numbers<[1], [0], [0], [1], [0, 0, 1, 1], [], []>} : vector<256x32xf32>, vector<32x56xf32>, vector<256x56xf32> -> vector<256x56xf32>
    %c0_9 = arith.constant 0 : index
    %c0_10 = arith.constant 0 : index
    %11 = vector.load %arg4[%c0_9, %c0_10] : memref<1x56xf32, #tpu.memory_space<vmem>>, vector<1x56xf32>
    %12 = vector.broadcast %11 : vector<1x56xf32> to vector<256x56xf32>
    %13 = arith.addf %10, %12 : vector<256x56xf32>
    %14 = arith.negf %13 : vector<256x56xf32>
    %15 = math.exp %14 : vector<256x56xf32>
    %cst_11 = arith.constant 1.000000e+00 : f32
    %16 = vector.broadcast %cst_11 : f32 to vector<256x56xf32>
    %17 = arith.addf %16, %15 : vector<256x56xf32>
    %18 = arith.divf %16, %17 : vector<256x56xf32>
    %c0_12 = arith.constant 0 : index
    %c0_13 = arith.constant 0 : index
    %19 = vector.load %arg5[%c0_12, %c0_13] : memref<1x56xf32, #tpu.memory_space<vmem>>, vector<1x56xf32>
    %20 = vector.broadcast %19 : vector<1x56xf32> to vector<256x56xf32>
    %21 = arith.mulf %18, %20 : vector<256x56xf32>
    %22 = vector.extract_strided_slice %21 {offsets = [0, 0], sizes = [256, 8], strides = [1, 1]} : vector<256x56xf32> to vector<256x8xf32>
    %23 = vector.extract_strided_slice %21 {offsets = [0, 8], sizes = [256, 8], strides = [1, 1]} : vector<256x56xf32> to vector<256x8xf32>
    %24 = arith.maximumf %22, %23 : vector<256x8xf32>
    %25 = vector.extract_strided_slice %21 {offsets = [0, 16], sizes = [256, 8], strides = [1, 1]} : vector<256x56xf32> to vector<256x8xf32>
    %26 = arith.maximumf %24, %25 : vector<256x8xf32>
    %27 = vector.extract_strided_slice %21 {offsets = [0, 24], sizes = [256, 8], strides = [1, 1]} : vector<256x56xf32> to vector<256x8xf32>
    %28 = vector.extract_strided_slice %21 {offsets = [0, 32], sizes = [256, 8], strides = [1, 1]} : vector<256x56xf32> to vector<256x8xf32>
    %29 = vector.extract_strided_slice %21 {offsets = [0, 40], sizes = [256, 8], strides = [1, 1]} : vector<256x56xf32> to vector<256x8xf32>
    %30 = vector.extract_strided_slice %21 {offsets = [0, 48], sizes = [256, 8], strides = [1, 1]} : vector<256x56xf32> to vector<256x8xf32>
    %cst_14 = arith.constant 5.000000e-01 : f32
    %31 = vector.broadcast %cst_14 : f32 to vector<256x8xf32>
    %32 = arith.mulf %31, %29 : vector<256x8xf32>
    %33 = arith.subf %27, %32 : vector<256x8xf32>
    %cst_15 = arith.constant 5.000000e-01 : f32
    %34 = vector.broadcast %cst_15 : f32 to vector<256x8xf32>
    %35 = arith.mulf %34, %30 : vector<256x8xf32>
    %36 = arith.subf %28, %35 : vector<256x8xf32>
    %cst_16 = arith.constant 5.000000e-01 : f32
    %37 = vector.broadcast %cst_16 : f32 to vector<256x8xf32>
    %38 = arith.mulf %37, %29 : vector<256x8xf32>
    %39 = arith.addf %27, %38 : vector<256x8xf32>
    %cst_17 = arith.constant 5.000000e-01 : f32
    %40 = vector.broadcast %cst_17 : f32 to vector<256x8xf32>
    %41 = arith.mulf %40, %30 : vector<256x8xf32>
    %42 = arith.addf %28, %41 : vector<256x8xf32>
    %cst_18 = arith.constant 1.000000e+01 : f32
    %43 = vector.broadcast %cst_18 : f32 to vector<256x8xf32>
    %44 = arith.maximumf %33, %43 : vector<256x8xf32>
    %cst_19 = arith.constant 8.000000e+00 : f32
    %45 = vector.broadcast %cst_19 : f32 to vector<256x8xf32>
    %46 = arith.maximumf %36, %45 : vector<256x8xf32>
    %cst_20 = arith.constant 4.000000e+01 : f32
    %47 = vector.broadcast %cst_20 : f32 to vector<256x8xf32>
    %48 = arith.minimumf %39, %47 : vector<256x8xf32>
    %cst_21 = arith.constant 3.000000e+01 : f32
    %49 = vector.broadcast %cst_21 : f32 to vector<256x8xf32>
    %50 = arith.minimumf %42, %49 : vector<256x8xf32>
    %51 = arith.subf %48, %44 : vector<256x8xf32>
    %cst_22 = arith.constant 0.000000e+00 : f32
    %52 = vector.broadcast %cst_22 : f32 to vector<256x8xf32>
    %53 = arith.maximumf %51, %52 : vector<256x8xf32>
    %54 = arith.subf %50, %46 : vector<256x8xf32>
    %cst_23 = arith.constant 0.000000e+00 : f32
    %55 = vector.broadcast %cst_23 : f32 to vector<256x8xf32>
    %56 = arith.maximumf %54, %55 : vector<256x8xf32>
    %57 = arith.mulf %53, %56 : vector<256x8xf32>
    %58 = arith.mulf %29, %30 : vector<256x8xf32>
    %cst_24 = arith.constant 6.600000e+02 : f32
    %59 = vector.broadcast %cst_24 : f32 to vector<256x8xf32>
    %60 = arith.addf %58, %59 : vector<256x8xf32>
    %61 = arith.subf %60, %57 : vector<256x8xf32>
    %62 = arith.divf %57, %61 : vector<256x8xf32>
    %63 = arith.mulf %62, %26 : vector<256x8xf32>
    %cst_25 = arith.constant dense<0xFF800000> : vector<256xf32>
    %64 = vector.multi_reduction <maximumf>, %63, %cst_25 [1] : vector<256x8xf32> to vector<256xf32>
    %65 = vector.shape_cast %64 : vector<256xf32> to vector<256x1xf32>
    %c0_26 = arith.constant 0 : index
    %c0_27 = arith.constant 0 : index
    %66 = vector.load %arg6[%c0_26, %c0_27] : memref<256x1xf32, #tpu.memory_space<vmem>>, vector<256x1xf32>
    tpu.vector_store %arg6[%c0_26, %c0_27], %65 {strides = array<i32>} : memref<256x1xf32, #tpu.memory_space<vmem>>, vector<256x1xf32>,
    return
  }
}

</mosaic_0001>

<bundles_post_ra>
// kernel: grounding_dino_xplique_forward.1
= control target key start
LH: loop header
LB: loop body
LE: loop exit
PB: predicated region body
PF: predicated region fallthrough
CT: control target
= control target key end

     0   :  { %vm917_vm0 = vcmask 261120   ;;  %s3497_s15 = smov 112   ;;  %s3498_s16 = smov 120   ;;  %vm2974_vm1 = vcmask 261312   ;;  %vm3071_vm2 = vcmask 7168   ;;  %s5907_s1 = inlined_call_operand.vmem [shape: bf16[32,768], index: 1, kind: input, shape index: {}]   ;;  %s5908_s0 = inlined_call_operand.vmem [shape: f32[256,768], index: 0, kind: input, shape index: {}]   ;;  %s5909_s3 = inlined_call_operand.vmem [shape: f32[32,56], index: 3, kind: input, shape index: {}]   ;;  %s5910_s2 = inlined_call_operand.vmem [shape: f32[1,32], index: 2, kind: input, shape index: {}]   ;;  %s5911_s4 = inlined_call_operand.vmem [shape: f32[1,56], index: 4, kind: input, shape index: {}]   ;;  %s5912_s5 = inlined_call_operand.vmem [shape: f32[1,56], index: 5, kind: input, shape index: {}]   ;;  %s5913_s6 = inlined_call_operand.vmem [shape: f32[256,1], index: 6, kind: output, shape index: {}]  }
   0x1   :  { %v3287_v0 = vld [vmem:[%s5907_s1 + $0x34] ss:$24 sps:$4 sm:$0xff]   ;;  %v3289_v1 = vld [vmem:[%s5907_s1 + $0x30] ss:$24 sps:$4 sm:$0xff]   ;;  %v3290_v2 = vld [vmem:[%s5907_s1 + $0x4] ss:$24 sps:$4 sm:$0xff]  }
   0x2   :  { %403 = vmatprep.subr.bf16.mxu0 %v3287_v0  ;;  %3279 = vmatprep.subr.bf16.mxu1 %v3287_v0  ;;  %v25_v3 = vld [vmem:[%s5908_s0 + $0x8] sm:$0xff]  ;;  %v31_v4 = vld [vmem:[%s5908_s0 + $0x38] sm:$0xff]  ;;  %v24_v11 = vld [vmem:[%s5908_s0] sm:$0xff]  ;;  %s3500_s17 = smov 16  }
   0x3   :  { %404 = vmatpush1.bf16.xpose.msra.mxu0 %v3289_v1  ;;  %3281 = vmatpush1.bf16.xpose.msra.mxu1 %v3289_v1  ;;  %v169_v5 = vld [vmem:[%s5908_s0 + $0x488] sm:$0xff]  ;;  %v175_v6 = vld [vmem:[%s5908_s0 + $0x4b8] sm:$0xff]  ;;  %v217_v7 = vpack.c.bf16 %v31_v4, %v25_v3  ;;  %v30_v12 = vld [vmem:[%s5908_s0 + $0x30] sm:$0xff] }
   0x4   :  { %405 = vmatprep.subr.bf16.mxu0 %v3290_v2  ;;  %3280 = vmatprep.subr.bf16.mxu1 %v3290_v2  ;;  %v289_v8 = vpack.c.bf16 %v175_v6, %v169_v5  ;;  %v3292_v9 = vld [vmem:[%s5907_s1] ss:$24 sps:$4 sm:$0xff]   ;;  %v3295_v10 = vld [vmem:[%s5907_s1 + $0x44] ss:$24 sps:$4 sm:$0xff]   ;;  %v174_v14 = vld [vmem:[%s5908_s0 + $0x4b0] sm:$0xff]  ;;  %v216_v20 = vpack.c.bf16 %v30_v12, %v24_v11 }
   0x5   :  { %423 = vmatprep.mubr.bf16.mxu0 %v217_v7  ;;  %v168_v13 = vld [vmem:[%s5908_s0 + $0x480] sm:$0xff]  ;;  %v37_v15 = vld [vmem:[%s5908_s0 + $0x68] sm:$0xff]  ;;  %v43_v16 = vld [vmem:[%s5908_s0 + $0x98] sm:$0xff] }
   0x6   :  { %519 = vmatprep.mubr.bf16.mxu1 %v289_v8  ;;  %v181_v17 = vld [vmem:[%s5908_s0 + $0x4e8] sm:$0xff]  ;;  %v187_v18 = vld [vmem:[%s5908_s0 + $0x518] sm:$0xff]  ;;  %v288_v21 = vpack.c.bf16 %v174_v14, %v168_v13  ;;  %v223_v23 = vpack.c.bf16 %v43_v16, %v37_v15  ;;  %v36_v27 = vld [vmem:[%s5908_s0 + $0x60] sm:$0xff] }
   0x7   :  { %v3298_v19 = vld [vmem:[%s5907_s1 + $0x3c] ss:$24 sps:$4 sm:$0xff]   ;;  %v3293_v22 = vld [vmem:[%s5907_s1 + $0x40] ss:$24 sps:$4 sm:$0xff]   ;;  %v295_v24 = vpack.c.bf16 %v187_v18, %v181_v17  ;;  %v3301_v26 = vld [vmem:[%s5907_s1 + $0xc] ss:$24 sps:$4 sm:$0xff]  }
   0x8   :  { %v3296_v25 = vld [vmem:[%s5907_s1 + $0x38] ss:$24 sps:$4 sm:$0xff]   ;;  %v180_v29 = vld [vmem:[%s5908_s0 + $0x4e0] sm:$0xff]  ;;  %v49_v31 = vld [vmem:[%s5908_s0 + $0xc8] sm:$0xff] }
   0x9   :  { %v42_v28 = vld [vmem:[%s5908_s0 + $0x90] sm:$0xff]  ;;  %v55_v32 = vld [vmem:[%s5908_s0 + $0xf8] sm:$0xff]  ;;  %v193_v33 = vld [vmem:[%s5908_s0 + $0x548] sm:$0xff] }
   0xa   :  { %v186_v30 = vld [vmem:[%s5908_s0 + $0x510] sm:$0xff]  ;;  %v199_v34 = vld [vmem:[%s5908_s0 + $0x578] sm:$0xff]  ;;  %v222_v35 = vpack.c.bf16 %v42_v28, %v36_v27  ;;  %v229_v37 = vpack.c.bf16 %v55_v32, %v49_v31  ;;  %v3299_v39 = vld [vmem:[%s5907_s1 + $0x8] ss:$24 sps:$4 sm:$0xff]  }
   0xb   :  { %406 = vmatpush1.bf16.xpose.msra.mxu0 %v3292_v9  ;;  %3282 = vmatpush1.bf16.xpose.msra.mxu1 %v3292_v9  ;;  %v294_v36 = vpack.c.bf16 %v186_v30, %v180_v29  ;;  %v301_v38 = vpack.c.bf16 %v199_v34, %v193_v33  ;;  %v48_v40 = vld [vmem:[%s5908_s0 + $0xc0] sm:$0xff]  ;;  %v54_v41 = vld [vmem:[%s5908_s0 + $0xf0] sm:$0xff]  ;;  %v61_v46 = vld [vmem:[%s5908_s0 + $0x128] sm:$0xff] }
   0xc   :  { %725 = vmatprep.subr.bf16.mxu0 %v3295_v10  ;;  %564 = vmatprep.subr.bf16.mxu1 %v3298_v19  ;;  %v3302_v42 = vld [vmem:[%s5907_s1 + $0x10] ss:$24 sps:$4 sm:$0xff]   ;;  %v3304_v43 = vld [vmem:[%s5907_s1 + $0x14] ss:$24 sps:$4 sm:$0xff]   ;;  %v192_v44 = vld [vmem:[%s5908_s0 + $0x540] sm:$0xff]  ;;  %v228_v50 = vpack.c.bf16 %v54_v41, %v48_v40 }
   0xd   :  { %v198_v45 = vld [vmem:[%s5908_s0 + $0x570] sm:$0xff]  ;;  %v67_v47 = vld [vmem:[%s5908_s0 + $0x158] sm:$0xff]  ;;  %v205_v48 = vld [vmem:[%s5908_s0 + $0x5a8] sm:$0xff] }
   0xe   :  { %v211_v49 = vld [vmem:[%s5908_s0 + $0x5d8] sm:$0xff]  ;;  %v300_v51 = vpack.c.bf16 %v198_v45, %v192_v44  ;;  %v235_v52 = vpack.c.bf16 %v67_v47, %v61_v46  ;;  %v60_v54 = vld [vmem:[%s5908_s0 + $0x120] sm:$0xff]  ;;  %v66_v55 = vld [vmem:[%s5908_s0 + $0x150] sm:$0xff] }
   0xf   :  { %v307_v53 = vpack.c.bf16 %v211_v49, %v205_v48  ;;  %v204_v56 = vld [vmem:[%s5908_s0 + $0x5a0] sm:$0xff]  ;;  %v210_v57 = vld [vmem:[%s5908_s0 + $0x5d0] sm:$0xff]  ;;  %v73_v58 = vld [vmem:[%s5908_s0 + $0x188] sm:$0xff]  ;;  %v234_v62 = vpack.c.bf16 %v66_v55, %v60_v54 }
  0x10   :  { %v79_v59 = vld [vmem:[%s5908_s0 + $0x1b8] sm:$0xff]  ;;  %v33_v61 = vld [vmem:[%s5908_s0 + $0x48] sm:$0xff]  ;;  %v306_v63 = vpack.c.bf16 %v210_v57, %v204_v56  ;;  %v72_v2 = vld [vmem:[%s5908_s0 + $0x180] sm:$0xff] }
  0x11   :  { %v27_v60 = vld [vmem:[%s5908_s0 + $0x18] sm:$0xff]  ;;  %v241_v0 = vpack.c.bf16 %v79_v59, %v73_v58  ;;  %v78_v3 = vld [vmem:[%s5908_s0 + $0x1b0] sm:$0xff]  ;;  %v32_v5 = vld [vmem:[%s5908_s0 + $0x40] sm:$0xff] }
  0x12   :  { %424 = vmatmul.mubr.bf16.vlgmr.msra.gmra.mxu0 %v216_v20  ;;  %520 = vmatmul.mubr.bf16.vlgmr.msra.gmra.mxu1 %v288_v21  ;;  %v219_v1 = vpack.c.bf16 %v33_v61, %v27_v60  ;;  %v26_v4 = vld [vmem:[%s5908_s0 + $0x10] sm:$0xff]  ;;  %v85_v6 = vld [vmem:[%s5908_s0 + $0x1e8] sm:$0xff]  ;;  %v91_v7 = vld [vmem:[%s5908_s0 + $0x218] sm:$0xff]  ;;  %v240_v10 = vpack.c.bf16 %v78_v3, %v72_v2 }
  0x13   :  { %726 = vmatpush1.bf16.xpose.msra.mxu0 %v3293_v22  ;;  %431 = vmatprep.mubr.bf16.mxu0 %v223_v23  ;;  %v39_v8 = vld [vmem:[%s5908_s0 + $0x78] sm:$0xff]  ;;  %v45_v9 = vld [vmem:[%s5908_s0 + $0xa8] sm:$0xff]  ;;  %v218_v11 = vpack.c.bf16 %v32_v5, %v26_v4  ;;  %v247_v12 = vpack.c.bf16 %v91_v7, %v85_v6  ;;  %v84_v14 = vld [vmem:[%s5908_s0 + $0x1e0] sm:$0xff] }
  0x14   :  { %527 = vmatprep.mubr.bf16.mxu1 %v295_v24  ;;  %565 = vmatpush1.bf16.xpose.msra.mxu1 %v3296_v25  ;;  %v225_v13 = vpack.c.bf16 %v45_v9, %v39_v8  ;;  %v90_v15 = vld [vmem:[%s5908_s0 + $0x210] sm:$0xff]  ;;  %v44_v17 = vld [vmem:[%s5908_s0 + $0xa0] sm:$0xff]  ;;  %v97_v18 = vld [vmem:[%s5908_s0 + $0x248] sm:$0xff] }
  0x15   :  { %566 = vmatprep.subr.bf16.mxu1 %v3301_v26  ;;  %727 = vmatprep.subr.bf16.mxu0 %v3304_v43  ;;  %v38_v16 = vld [vmem:[%s5908_s0 + $0x70] sm:$0xff]  ;;  %v103_v19 = vld [vmem:[%s5908_s0 + $0x278] sm:$0xff]  ;;  %v57_v21 = vld [vmem:[%s5908_s0 + $0x108] sm:$0xff]  ;;  %v246_v22 = vpack.c.bf16 %v90_v15, %v84_v14 }
  0x16   :  { %v51_v20 = vld [vmem:[%s5908_s0 + $0xd8] sm:$0xff]  ;;  %v224_v23 = vpack.c.bf16 %v44_v17, %v38_v16  ;;  %v253_v24 = vpack.c.bf16 %v103_v19, %v97_v18  ;;  %v96_v26 = vld [vmem:[%s5908_s0 + $0x240] sm:$0xff]  ;;  %v102_v27 = vld [vmem:[%s5908_s0 + $0x270] sm:$0xff] }
  0x17   :  { %v231_v25 = vpack.c.bf16 %v57_v21, %v51_v20  ;;  %v50_v28 = vld [vmem:[%s5908_s0 + $0xd0] sm:$0xff]  ;;  %v56_v29 = vld [vmem:[%s5908_s0 + $0x100] sm:$0xff]  ;;  %v109_v30 = vld [vmem:[%s5908_s0 + $0x2a8] sm:$0xff]  ;;  %v252_v34 = vpack.c.bf16 %v102_v27, %v96_v26 }
  0x18   :  { %v115_v31 = vld [vmem:[%s5908_s0 + $0x2d8] sm:$0xff]  ;;  %v69_v33 = vld [vmem:[%s5908_s0 + $0x168] sm:$0xff]  ;;  %v114_v40 = vld [vmem:[%s5908_s0 + $0x2d0] sm:$0xff] }
  0x19   :  { %v63_v32 = vld [vmem:[%s5908_s0 + $0x138] sm:$0xff]  ;;  %v62_v41 = vld [vmem:[%s5908_s0 + $0x130] sm:$0xff]  ;;  %v121_v43 = vld [vmem:[%s5908_s0 + $0x308] sm:$0xff] }
  0x1a   :  { %432 = vmatmul.mubr.bf16.gmra.mxu0 %v222_v35  ;;  %528 = vmatmul.mubr.bf16.gmra.mxu1 %v294_v36  ;;  %v230_v35 = vpack.c.bf16 %v56_v29, %v50_v28  ;;  %v259_v36 = vpack.c.bf16 %v115_v31, %v109_v30  ;;  %v127_v44 = vld [vmem:[%s5908_s0 + $0x338] sm:$0xff]  ;;  %v81_v46 = vld [vmem:[%s5908_s0 + $0x1c8] sm:$0xff]  ;;  %v80_v54 = vld [vmem:[%s5908_s0 + $0x1c0] sm:$0xff] }
  0x1b   :  { %439 = vmatprep.mubr.bf16.mxu0 %v229_v37  ;;  %535 = vmatprep.mubr.bf16.mxu1 %v301_v38  ;;  %v237_v37 = vpack.c.bf16 %v69_v33, %v63_v32  ;;  %v909_v38 = vld [vmem:[%s5909_s3 + $0x18] sm:$0xff]  ;;  %v265_v49 = vpack.c.bf16 %v127_v44, %v121_v43  ;;  %v133_v55 = vld [vmem:[%s5908_s0 + $0x368] sm:$0xff]  ;;  %v92_v2 = vld [vmem:[%s5908_s0 + $0x220] sm:$0xff] }
  0x1c   :  { %567 = vmatpush1.bf16.xpose.msra.mxu1 %v3299_v39  ;;  %728 = vmatpush1.bf16.xpose.msra.mxu0 %v3302_v42  ;;  %v108_v39 = vld [vmem:[%s5908_s0 + $0x2a0] sm:$0xff]  ;;  %v75_v45 = vld [vmem:[%s5908_s0 + $0x198] sm:$0xff]  ;;  %v93_v58 = vld [vmem:[%s5908_s0 + $0x228] sm:$0xff] }
  0x1d   :  { %3223 = vmatprep.subr.mxu1 %v909_v38  ;;  %v68_v42 = vld [vmem:[%s5908_s0 + $0x160] sm:$0xff]  ;;  %v258_v47 = vpack.c.bf16 %v114_v40, %v108_v39  ;;  %v139_v56 = vld [vmem:[%s5908_s0 + $0x398] sm:$0xff]  ;;  %v145_v3 = vld [vmem:[%s5908_s0 + $0x3c8] sm:$0xff] }
  0x1e   :  { %v236_v48 = vpack.c.bf16 %v68_v42, %v62_v41  ;;  %v87_v57 = vld [vmem:[%s5908_s0 + $0x1f8] sm:$0xff]  ;;  %v271_v61 = vpack.c.bf16 %v139_v56, %v133_v55  ;;  %v105_v6 = vld [vmem:[%s5908_s0 + $0x288] sm:$0xff]  ;;  %v104_v14 = vld [vmem:[%s5908_s0 + $0x280] sm:$0xff] }
  0x1f   :  { %v151_v4 = vld [vmem:[%s5908_s0 + $0x3f8] sm:$0xff]  ;;  %v157_v15 = vld [vmem:[%s5908_s0 + $0x428] sm:$0xff]  ;;  %v908_v16 = vld [vmem:[%s5909_s3 + $0x10] sm:$0xff] }
  0x20   :  { %v99_v5 = vld [vmem:[%s5908_s0 + $0x258] sm:$0xff]  ;;  %v277_v9 = vpack.c.bf16 %v151_v4, %v145_v3  ;;  %v117_v19 = vld [vmem:[%s5908_s0 + $0x2e8] sm:$0xff]  ;;  %v110_v26 = vld [vmem:[%s5908_s0 + $0x2b0] sm:$0xff] }
  0x21   :  { %v163_v17 = vld [vmem:[%s5908_s0 + $0x458] sm:$0xff]  ;;  %v116_v27 = vld [vmem:[%s5908_s0 + $0x2e0] sm:$0xff]  ;;  %v129_v29 = vld [vmem:[%s5908_s0 + $0x348] sm:$0xff] }
  0x22   :  { %440 = vmatmul.mubr.bf16.gmra.mxu0 %v228_v50  ;;  %536 = vmatmul.mubr.bf16.gmra.mxu1 %v300_v51  ;;  %v243_v50 = vpack.c.bf16 %v81_v46, %v75_v45  ;;  %v120_v51 = vld [vmem:[%s5908_s0 + $0x300] sm:$0xff]  ;;  %v111_v18 = vld [vmem:[%s5908_s0 + $0x2b8] sm:$0xff]  ;;  %v29_v30 = vld [vmem:[%s5908_s0 + $0x28] sm:$0xff]  ;;  %v260_v33 = vpack.c.bf16 %v116_v27, %v110_v26 }
  0x23   :  { %447 = vmatprep.mubr.bf16.mxu0 %v235_v52  ;;  %543 = vmatprep.mubr.bf16.mxu1 %v307_v53  ;;  %v126_v52 = vld [vmem:[%s5908_s0 + $0x330] sm:$0xff]  ;;  %v123_v28 = vld [vmem:[%s5908_s0 + $0x318] sm:$0xff]  ;;  %v141_v41 = vld [vmem:[%s5908_s0 + $0x3a8] sm:$0xff] }
  0x24   :  { %v74_v53 = vld [vmem:[%s5908_s0 + $0x190] sm:$0xff]  ;;  %v264_v59 = vpack.c.bf16 %v126_v52, %v120_v51  ;;  %v35_v31 = vld [vmem:[%s5908_s0 + $0x58] sm:$0xff]  ;;  %v41_v42 = vld [vmem:[%s5908_s0 + $0x88] sm:$0xff] }
  0x25   :  { %v242_v60 = vpack.c.bf16 %v80_v54, %v74_v53  ;;  %v34_v39 = vld [vmem:[%s5908_s0 + $0x50] sm:$0xff]  ;;  %v135_v40 = vld [vmem:[%s5908_s0 + $0x378] sm:$0xff]  ;;  %v153_v53 = vld [vmem:[%s5908_s0 + $0x408] sm:$0xff] }
  0x26   :  { %v47_v43 = vld [vmem:[%s5908_s0 + $0xb8] sm:$0xff]  ;;  %v273_v46 = vpack.c.bf16 %v141_v41, %v135_v40  ;;  %v46_v51 = vld [vmem:[%s5908_s0 + $0xb0] sm:$0xff]  ;;  %v53_v54 = vld [vmem:[%s5908_s0 + $0xe8] sm:$0xff] }
  0x27   :  { %v147_v52 = vld [vmem:[%s5908_s0 + $0x3d8] sm:$0xff]  ;;  %v65_v3 = vld [vmem:[%s5908_s0 + $0x148] sm:$0xff] }
  0x28   :  { %v59_v55 = vld [vmem:[%s5908_s0 + $0x118] sm:$0xff]  ;;  %v189_v26 = vld [vmem:[%s5908_s0 + $0x528] sm:$0xff] }
  0x29   :  { %v71_v4 = vld [vmem:[%s5908_s0 + $0x178] sm:$0xff]  ;;  %v89_v27 = vld [vmem:[%s5908_s0 + $0x208] sm:$0xff] }
  0x2a   :  { %448 = vmatmul.mubr.bf16.gmra.mxu0 %v234_v62  ;;  %544 = vmatmul.mubr.bf16.gmra.mxu1 %v306_v63  ;;  %v249_v62 = vpack.c.bf16 %v93_v58, %v87_v57  ;;  %v132_v63 = vld [vmem:[%s5908_s0 + $0x360] sm:$0xff]  ;;  %v279_v58 = vpack.c.bf16 %v153_v53, %v147_v52  ;;  %v107_v40 = vld [vmem:[%s5908_s0 + $0x298] sm:$0xff]  ;;  %v113_v52 = vld [vmem:[%s5908_s0 + $0x2c8] sm:$0xff] }
  0x2b   :  { %455 = vmatprep.mubr.bf16.mxu0 %v241_v0  ;;  %584 = vmatprep.mubr.bf16.mxu1 %v219_v1  ;;  %v138_v0 = vld [vmem:[%s5908_s0 + $0x390] sm:$0xff]  ;;  %v119_v53 = vld [vmem:[%s5908_s0 + $0x2f8] sm:$0xff] }
  0x2c   :  { %v86_v1 = vld [vmem:[%s5908_s0 + $0x1f0] sm:$0xff]  ;;  %v270_v7 = vpack.c.bf16 %v138_v0, %v132_v63  ;;  %v159_v0 = vld [vmem:[%s5908_s0 + $0x438] sm:$0xff] }
  0x2d   :  { %v248_v8 = vpack.c.bf16 %v92_v2, %v86_v1  ;;  %v58_v63 = vld [vmem:[%s5908_s0 + $0x110] sm:$0xff]  ;;  %v907_v1 = vld [vmem:[%s5909_s3 + $0x8] sm:$0xff] }
  0x2e   :  { %v165_v2 = vld [vmem:[%s5908_s0 + $0x468] sm:$0xff] }
  0x32   :  { %456 = vmatmul.mubr.bf16.gmra.mxu0 %v240_v10  ;;  %585 = vmatmul.mubr.bf16.vlgmr.msra.gmra.mxu1 %v218_v11  ;;  %v255_v10 = vpack.c.bf16 %v105_v6, %v99_v5  ;;  %v144_v11 = vld [vmem:[%s5908_s0 + $0x3c0] sm:$0xff] }
  0x33   :  { %463 = vmatprep.mubr.bf16.mxu0 %v247_v12  ;;  %592 = vmatprep.mubr.bf16.mxu1 %v225_v13  ;;  %v150_v12 = vld [vmem:[%s5908_s0 + $0x3f0] sm:$0xff] }
  0x34   :  { %3224 = vmatpush3.msra.mxu1 %v909_v38  ;;  %v98_v13 = vld [vmem:[%s5908_s0 + $0x250] sm:$0xff]  ;;  %v276_v20 = vpack.c.bf16 %v150_v12, %v144_v11  ;;  %v28_v38 = vld [vmem:[%s5908_s0 + $0x20] sm:$0xff] }
  0x35   :  { %3225 = vmatprep.subr.mxu1 %v908_v16  ;;  %v254_v21 = vpack.c.bf16 %v104_v14, %v98_v13  ;;  %v220_v45 = vpack.c.bf16 %v34_v39, %v28_v38  ;;  %v64_v11 = vld [vmem:[%s5908_s0 + $0x140] sm:$0xff]  ;;  %v70_v12 = vld [vmem:[%s5908_s0 + $0x170] sm:$0xff]  ;;  %v171_v13 = vld [vmem:[%s5908_s0 + $0x498] sm:$0xff] }
  0x36   :  { %3226 = vmatpush3.msra.mxu1 %v908_v16  ;;  %v177_v14 = vld [vmem:[%s5908_s0 + $0x4c8] sm:$0xff]  ;;  %v83_v16 = vld [vmem:[%s5908_s0 + $0x1d8] sm:$0xff] }
  0x37   :  { %3227 = vmatprep.subr.mxu1 %v907_v1  ;;  %v201_v38 = vld [vmem:[%s5908_s0 + $0x588] sm:$0xff] }
  0x38   :  { %3228 = vmatpush3.msra.mxu1 %v907_v1  ;;  %v101_v39 = vld [vmem:[%s5908_s0 + $0x268] sm:$0xff] }
  0x3a   :  { %464 = vmatmul.mubr.bf16.gmra.mxu0 %v246_v22  ;;  %593 = vmatmul.mubr.bf16.gmra.mxu1 %v224_v23  ;;  %v283_v22 = vpack.c.bf16 %v163_v17, %v157_v15  ;;  %v261_v23 = vpack.c.bf16 %v117_v19, %v111_v18  ;;  %v77_v15 = vld [vmem:[%s5908_s0 + $0x1a8] sm:$0xff]  ;;  %v238_v18 = vpack.c.bf16 %v70_v12, %v64_v11  ;;  %v155_v12 = vld [vmem:[%s5908_s0 + $0x418] sm:$0xff] }
  0x3b   :  { %471 = vmatprep.mubr.bf16.mxu0 %v253_v24  ;;  %600 = vmatprep.mubr.bf16.mxu1 %v231_v25  ;;  %v156_v24 = vld [vmem:[%s5908_s0 + $0x420] sm:$0xff]  ;;  %v162_v25 = vld [vmem:[%s5908_s0 + $0x450] sm:$0xff]  ;;  %v291_v19 = vpack.c.bf16 %v177_v14, %v171_v13  ;;  %v149_v11 = vld [vmem:[%s5908_s0 + $0x3e8] sm:$0xff] }
  0x3c   :  { %v282_v32 = vpack.c.bf16 %v162_v25, %v156_v24  ;;  %v82_v24 = vld [vmem:[%s5908_s0 + $0x1d0] sm:$0xff]  ;;  %v183_v25 = vld [vmem:[%s5908_s0 + $0x4f8] sm:$0xff]  ;;  %v281_v14 = vpack.c.bf16 %v155_v12, %v149_v11 }
  0x42   :  { %472 = vmatmul.mubr.bf16.gmra.mxu0 %v252_v34  ;;  %601 = vmatmul.mubr.bf16.gmra.mxu1 %v230_v35  ;;  %v267_v34 = vpack.c.bf16 %v129_v29, %v123_v28  ;;  %v221_v35 = vpack.c.bf16 %v35_v31, %v29_v30  ;;  %v95_v28 = vld [vmem:[%s5908_s0 + $0x238] sm:$0xff]  ;;  %v297_v31 = vpack.c.bf16 %v189_v26, %v183_v25 }
  0x43   :  { %479 = vmatprep.mubr.bf16.mxu0 %v259_v36  ;;  %608 = vmatprep.mubr.bf16.mxu1 %v237_v37  ;;  %v122_v36 = vld [vmem:[%s5908_s0 + $0x310] sm:$0xff]  ;;  %v128_v37 = vld [vmem:[%s5908_s0 + $0x340] sm:$0xff] }
  0x44   :  { %v266_v44 = vpack.c.bf16 %v128_v37, %v122_v36  ;;  %v94_v36 = vld [vmem:[%s5908_s0 + $0x230] sm:$0xff]  ;;  %v195_v37 = vld [vmem:[%s5908_s0 + $0x558] sm:$0xff] }
  0x4a   :  { %480 = vmatmul.mubr.bf16.gmra.mxu0 %v258_v47  ;;  %609 = vmatmul.mubr.bf16.gmra.mxu1 %v236_v48  ;;  %v227_v47 = vpack.c.bf16 %v47_v43, %v41_v42  ;;  %v134_v48 = vld [vmem:[%s5908_s0 + $0x370] sm:$0xff]  ;;  %v303_v43 = vpack.c.bf16 %v201_v38, %v195_v37 }
  0x4b   :  { %487 = vmatprep.mubr.bf16.mxu0 %v265_v49  ;;  %616 = vmatprep.mubr.bf16.mxu1 %v243_v50  ;;  %v140_v49 = vld [vmem:[%s5908_s0 + $0x3a0] sm:$0xff] }
  0x4c   :  { %v40_v50 = vld [vmem:[%s5908_s0 + $0x80] sm:$0xff]  ;;  %v272_v56 = vpack.c.bf16 %v140_v49, %v134_v48  ;;  %v106_v48 = vld [vmem:[%s5908_s0 + $0x290] sm:$0xff]  ;;  %v207_v49 = vld [vmem:[%s5908_s0 + $0x5b8] sm:$0xff] }
  0x4d   :  { %v226_v57 = vpack.c.bf16 %v46_v51, %v40_v50  ;;  %v906_v50 = vld [vmem:[%s5909_s3] sm:$0xff]  ;;  %v213_v51 = vld [vmem:[%s5908_s0 + $0x5e8] sm:$0xff] }
  0x4e   :  { %3229 = vmatprep.subr.mxu1 %v906_v50 }
  0x4f   :  { %3230 = vmatpush3.msra.mxu1 %v906_v50  ;;  %v202_v50 = vld [vmem:[%s5908_s0 + $0x590] sm:$0xff] }
  0x52   :  { %488 = vmatmul.mubr.bf16.gmra.mxu0 %v264_v59  ;;  %617 = vmatmul.mubr.bf16.gmra.mxu1 %v242_v60  ;;  %v233_v59 = vpack.c.bf16 %v59_v55, %v53_v54  ;;  %v146_v60 = vld [vmem:[%s5908_s0 + $0x3d0] sm:$0xff] }
  0x53   :  { %495 = vmatprep.mubr.bf16.mxu0 %v271_v61  ;;  %624 = vmatprep.mubr.bf16.mxu1 %v249_v62  ;;  %v152_v61 = vld [vmem:[%s5908_s0 + $0x400] sm:$0xff] }
  0x54   :  { %v52_v62 = vld [vmem:[%s5908_s0 + $0xe0] sm:$0xff]  ;;  %v278_v5 = vpack.c.bf16 %v152_v61, %v146_v60  ;;  %v118_v61 = vld [vmem:[%s5908_s0 + $0x2f0] sm:$0xff] }
  0x55   :  { %v232_v6 = vpack.c.bf16 %v58_v63, %v52_v62  ;;  %v112_v60 = vld [vmem:[%s5908_s0 + $0x2c0] sm:$0xff]  ;;  %v125_v62 = vld [vmem:[%s5908_s0 + $0x328] sm:$0xff]  ;;  %v131_v63 = vld [vmem:[%s5908_s0 + $0x358] sm:$0xff] }
  0x56   :  { %v262_v1 = vpack.c.bf16 %v118_v61, %v112_v60 }
  0x5a   :  { %496 = vmatmul.mubr.bf16.gmra.mxu0 %v270_v7  ;;  %625 = vmatmul.mubr.bf16.gmra.mxu1 %v248_v8  ;;  %v285_v7 = vpack.c.bf16 %v165_v2, %v159_v0  ;;  %v239_v8 = vpack.c.bf16 %v71_v4, %v65_v3  ;;  %v269_v2 = vpack.c.bf16 %v131_v63, %v125_v62  ;;  %v124_v3 = vld [vmem:[%s5908_s0 + $0x320] sm:$0xff]  ;;  %v130_v4 = vld [vmem:[%s5908_s0 + $0x350] sm:$0xff] }
  0x5b   :  { %503 = vmatprep.mubr.bf16.mxu0 %v277_v9  ;;  %632 = vmatprep.mubr.bf16.mxu1 %v255_v10  ;;  %v158_v9 = vld [vmem:[%s5908_s0 + $0x430] sm:$0xff]  ;;  %v164_v10 = vld [vmem:[%s5908_s0 + $0x460] sm:$0xff] }
  0x5c   :  { %v284_v17 = vpack.c.bf16 %v164_v10, %v158_v9  ;;  %v136_v9 = vld [vmem:[%s5908_s0 + $0x380] sm:$0xff]  ;;  %v142_v10 = vld [vmem:[%s5908_s0 + $0x3b0] sm:$0xff] }
  0x5d   :  { %v274_v13 = vpack.c.bf16 %v142_v10, %v136_v9  ;;  %v208_v63 = vld [vmem:[%s5908_s0 + $0x5c0] sm:$0xff] }
  0x62   :  { %504 = vmatmul.mubr.bf16.gmra.mxu0 %v276_v20  ;;  %633 = vmatmul.mubr.bf16.gmra.mxu1 %v254_v21  ;;  %v245_v20 = vpack.c.bf16 %v83_v16, %v77_v15  ;;  %v170_v21 = vld [vmem:[%s5908_s0 + $0x490] sm:$0xff]  ;;  %v148_v15 = vld [vmem:[%s5908_s0 + $0x3e0] sm:$0xff] }
  0x63   :  { %511 = vmatprep.mubr.bf16.mxu0 %v283_v22  ;;  %640 = vmatprep.mubr.bf16.mxu1 %v261_v23  ;;  %v176_v22 = vld [vmem:[%s5908_s0 + $0x4c0] sm:$0xff]  ;;  %v154_v16 = vld [vmem:[%s5908_s0 + $0x410] sm:$0xff] }
  0x64   :  { %v76_v23 = vld [vmem:[%s5908_s0 + $0x1a0] sm:$0xff]  ;;  %v290_v29 = vpack.c.bf16 %v176_v22, %v170_v21  ;;  %v166_v22 = vld [vmem:[%s5908_s0 + $0x470] sm:$0xff] }
  0x65   :  { %v244_v30 = vpack.c.bf16 %v82_v24, %v76_v23  ;;  %v160_v21 = vld [vmem:[%s5908_s0 + $0x440] sm:$0xff]  ;;  %v173_v23 = vld [vmem:[%s5908_s0 + $0x4a8] sm:$0xff]  ;;  %v179_v24 = vld [vmem:[%s5908_s0 + $0x4d8] sm:$0xff] }
  0x66   :  { %v286_v25 = vpack.c.bf16 %v166_v22, %v160_v21  ;;  %v293_v26 = vpack.c.bf16 %v179_v24, %v173_v23 }
  0x6a   :  { %512 = vmatmul.mubr.bf16.gmra.mxu0 %v282_v32  ;;  %641 = vmatmul.mubr.bf16.gmra.mxu1 %v260_v33  ;;  %v251_v32 = vpack.c.bf16 %v95_v28, %v89_v27  ;;  %v182_v33 = vld [vmem:[%s5908_s0 + $0x4f0] sm:$0xff]  ;;  %v172_v27 = vld [vmem:[%s5908_s0 + $0x4a0] sm:$0xff] }
  0x6b   :  { %648 = vmatprep.mubr.bf16.mxu1 %v267_v34  ;;  %745 = vmatprep.mubr.bf16.mxu0 %v221_v35  ;;  %v188_v34 = vld [vmem:[%s5908_s0 + $0x520] sm:$0xff]  ;;  %v178_v28 = vld [vmem:[%s5908_s0 + $0x4d0] sm:$0xff] }
  0x6c   :  { %v88_v35 = vld [vmem:[%s5908_s0 + $0x200] sm:$0xff]  ;;  %v296_v41 = vpack.c.bf16 %v188_v34, %v182_v33 }
  0x6d   :  { %v250_v42 = vpack.c.bf16 %v94_v36, %v88_v35  ;;  %v184_v35 = vld [vmem:[%s5908_s0 + $0x500] sm:$0xff]  ;;  %v190_v36 = vld [vmem:[%s5908_s0 + $0x530] sm:$0xff] }
  0x72   :  { %649 = vmatmul.mubr.bf16.gmra.mxu1 %v266_v44  ;;  %746 = vmatmul.mubr.bf16.vlgmr.msra.gmra.mxu0 %v220_v45  ;;  %v257_v44 = vpack.c.bf16 %v107_v40, %v101_v39  ;;  %v194_v45 = vld [vmem:[%s5908_s0 + $0x550] sm:$0xff]  ;;  %v197_v39 = vld [vmem:[%s5908_s0 + $0x568] sm:$0xff]  ;;  %v203_v40 = vld [vmem:[%s5908_s0 + $0x598] sm:$0xff] }
  0x73   :  { %656 = vmatprep.mubr.bf16.mxu1 %v273_v46  ;;  %753 = vmatprep.mubr.bf16.mxu0 %v227_v47  ;;  %v200_v46 = vld [vmem:[%s5908_s0 + $0x580] sm:$0xff] }
  0x74   :  { %v100_v47 = vld [vmem:[%s5908_s0 + $0x260] sm:$0xff]  ;;  %v302_v54 = vpack.c.bf16 %v200_v46, %v194_v45 }
  0x75   :  { %v256_v55 = vpack.c.bf16 %v106_v48, %v100_v47 }
  0x7a   :  { %657 = vmatmul.mubr.bf16.gmra.mxu1 %v272_v56  ;;  %754 = vmatmul.mubr.bf16.gmra.mxu0 %v226_v57  ;;  %v309_v56 = vpack.c.bf16 %v213_v51, %v207_v49  ;;  %v263_v57 = vpack.c.bf16 %v119_v53, %v113_v52  ;;  %v196_v49 = vld [vmem:[%s5908_s0 + $0x560] sm:$0xff]  ;;  %v209_v53 = vld [vmem:[%s5908_s0 + $0x5c8] sm:$0xff] }
  0x7b   :  { %664 = vmatprep.mubr.bf16.mxu1 %v279_v58  ;;  %761 = vmatprep.mubr.bf16.mxu0 %v233_v59  ;;  %v206_v58 = vld [vmem:[%s5908_s0 + $0x5b0] sm:$0xff]  ;;  %v212_v59 = vld [vmem:[%s5908_s0 + $0x5e0] sm:$0xff] }
  0x7c   :  { %v308_v0 = vpack.c.bf16 %v212_v59, %v206_v58 }
  0x82   :  { %665 = vmatmul.mubr.bf16.gmra.mxu1 %v278_v5  ;;  %762 = vmatmul.mubr.bf16.gmra.mxu0 %v232_v6  ;;  %v137_v5 = vld [vmem:[%s5908_s0 + $0x388] sm:$0xff]  ;;  %v143_v6 = vld [vmem:[%s5908_s0 + $0x3b8] sm:$0xff] }
  0x83   :  { %672 = vmatprep.mubr.bf16.mxu1 %v285_v7  ;;  %769 = vmatprep.mubr.bf16.mxu0 %v239_v8  ;;  %v268_v7 = vpack.c.bf16 %v130_v4, %v124_v3  ;;  %v275_v8 = vpack.c.bf16 %v143_v6, %v137_v5 }
  0x8a   :  { %673 = vmatmul.mubr.bf16.gmra.mxu1 %v284_v17  ;;  %770 = vmatmul.mubr.bf16.gmra.mxu0 %v238_v18  ;;  %v161_v17 = vld [vmem:[%s5908_s0 + $0x448] sm:$0xff]  ;;  %v167_v18 = vld [vmem:[%s5908_s0 + $0x478] sm:$0xff] }
  0x8b   :  { %680 = vmatprep.mubr.bf16.mxu1 %v291_v19  ;;  %777 = vmatprep.mubr.bf16.mxu0 %v245_v20  ;;  %v280_v19 = vpack.c.bf16 %v154_v16, %v148_v15  ;;  %v287_v20 = vpack.c.bf16 %v167_v18, %v161_v17 }
  0x92   :  { %681 = vmatmul.mubr.bf16.gmra.mxu1 %v290_v29  ;;  %778 = vmatmul.mubr.bf16.gmra.mxu0 %v244_v30  ;;  %v185_v29 = vld [vmem:[%s5908_s0 + $0x508] sm:$0xff]  ;;  %v191_v30 = vld [vmem:[%s5908_s0 + $0x538] sm:$0xff] }
  0x93   :  { %688 = vmatprep.mubr.bf16.mxu1 %v297_v31  ;;  %785 = vmatprep.mubr.bf16.mxu0 %v251_v32  ;;  %v292_v31 = vpack.c.bf16 %v178_v28, %v172_v27  ;;  %v299_v32 = vpack.c.bf16 %v191_v30, %v185_v29 }
  0x9a   :  { %689 = vmatmul.mubr.bf16.gmra.mxu1 %v296_v41  ;;  %786 = vmatmul.mubr.bf16.gmra.mxu0 %v250_v42 }
  0x9b   :  { %696 = vmatprep.mubr.bf16.mxu1 %v303_v43  ;;  %793 = vmatprep.mubr.bf16.mxu0 %v257_v44  ;;  %v298_v43 = vpack.c.bf16 %v190_v36, %v184_v35  ;;  %v305_v44 = vpack.c.bf16 %v203_v40, %v197_v39 }
  0xa2   :  { %697 = vmatmul.mubr.bf16.gmra.mxu1 %v302_v54  ;;  %794 = vmatmul.mubr.bf16.gmra.mxu0 %v256_v55  ;;  %v215_v54 = vld [vmem:[%s5908_s0 + $0x5f8] sm:$0xff] }
  0xa3   :  { %704 = vmatprep.mubr.bf16.mxu1 %v309_v56  ;;  %801 = vmatprep.mubr.bf16.mxu0 %v263_v57  ;;  %v304_v57 = vpack.c.bf16 %v202_v50, %v196_v49  ;;  %v311_v58 = vpack.c.bf16 %v215_v54, %v209_v53 }
  0xaa   :  { %705 = vmatmul.mubr.bf16.gmra.mxu1 %v308_v0  ;;  %802 = vmatmul.mubr.bf16.gmra.mxu0 %v262_v1  ;;  %v214_v0 = vld [vmem:[%s5908_s0 + $0x5f0] sm:$0xff] }
  0xab   :  { %809 = vmatprep.mubr.bf16.mxu0 %v269_v2  ;;  %v310_v5 = vpack.c.bf16 %v214_v0, %v208_v63 }
  0xb2   :  { %810 = vmatmul.mubr.bf16.gmra.mxu0 %v268_v7 }
  0xb3   :  { %817 = vmatprep.mubr.bf16.mxu0 %v275_v8 }
  0xba   :  { %818 = vmatmul.mubr.bf16.gmra.mxu0 %v274_v13 }
  0xbb   :  { %825 = vmatprep.mubr.bf16.mxu0 %v281_v14 }
  0xc2   :  { %826 = vmatmul.mubr.bf16.gmra.mxu0 %v280_v19 }
  0xc3   :  { %833 = vmatprep.mubr.bf16.mxu0 %v287_v20 }
  0xca   :  { %834 = vmatmul.mubr.bf16.gmra.mxu0 %v286_v25 }
  0xcb   :  { %841 = vmatprep.mubr.bf16.mxu0 %v293_v26 }
  0xd2   :  { %v4130_v33 = vpop.f32.mrf.mxu0  ;;  %v4132_v34 = vpop.f32.mrf.mxu1  ;;  %842 = vmatmul.mubr.bf16.gmra.mxu0 %v292_v31 }
  0xd3   :  { %849 = vmatprep.mubr.bf16.mxu0 %v299_v32 }
  0xd4   :  { %v427_v37 = vpop.f32.mrf.mxu0  ;;  %v523_v38 = vpop.f32.mrf.mxu1 }
  0xd6   :  { %v4146_v41 = vpop.f32.mrf.mxu0  ;;  %v4148_v42 = vpop.f32.mrf.mxu1 }
  0xd8   :  { %v430_v45 = vpop.f32.mrf.mxu0  ;;  %v526_v46 = vpop.f32.mrf.mxu1 }
  0xda   :  { %v4150_v47 = vpop.f32.mrf.mxu0  ;;  %v4152_v48 = vpop.f32.mrf.mxu1  ;;  %850 = vmatmul.mubr.bf16.gmra.mxu0 %v298_v43 }
  0xdb   :  { %857 = vmatprep.mubr.bf16.mxu0 %v305_v44 }
  0xdc   :  { %v435_v51 = vpop.f32.mrf.mxu0  ;;  %v531_v52 = vpop.f32.mrf.mxu1 }
  0xde   :  { %v4166_v55 = vpop.f32.mrf.mxu0  ;;  %v4168_v56 = vpop.f32.mrf.mxu1 }
  0xe0   :  { %v438_v59 = vpop.f32.mrf.mxu0  ;;  %v534_v60 = vpop.f32.mrf.mxu1 }
  0xe2   :  { %v4170_v61 = vpop.f32.mrf.mxu0  ;;  %v4172_v62 = vpop.f32.mrf.mxu1  ;;  %858 = vmatmul.mubr.bf16.gmra.mxu0 %v304_v57 }
  0xe3   :  { %865 = vmatprep.mubr.bf16.mxu0 %v311_v58 }
  0xe4   :  { %v443_v1 = vpop.f32.mrf.mxu0  ;;  %v539_v2 = vpop.f32.mrf.mxu1 }
  0xe6   :  { %v4180_v3 = vpop.f32.mrf.mxu0  ;;  %v4182_v4 = vpop.f32.mrf.mxu1 }
  0xe8   :  { %v446_v6 = vpop.f32.mrf.mxu0  ;;  %v542_v7 = vpop.f32.mrf.mxu1 }
  0xea   :  { %v4184_v8 = vpop.f32.mrf.mxu0  ;;  %v4186_v9 = vpop.f32.mrf.mxu1  ;;  %866 = vmatmul.mubr.bf16.gmra.mxu0 %v310_v5 }
  0xec   :  { %v451_v10 = vpop.f32.mrf.mxu0  ;;  %v547_v11 = vpop.f32.mrf.mxu1 }
  0xee   :  { %v4188_v12 = vpop.f32.mrf.mxu0  ;;  %v4190_v13 = vpop.f32.mrf.mxu1 }
  0xf0   :  { %v454_v14 = vpop.f32.mrf.mxu0  ;;  %v550_v15 = vpop.f32.mrf.mxu1 }
  0xf2   :  { %v4192_v16 = vpop.f32.mrf.mxu0  ;;  %v4194_v17 = vpop.f32.mrf.mxu1 }
  0xf4   :  { %v459_v18 = vpop.f32.mrf.mxu0  ;;  %v588_v19 = vpop.f32.mrf.mxu1 }
  0xf6   :  { %v4196_v20 = vpop.f32.mrf.mxu0  ;;  %v4198_v21 = vpop.f32.mrf.mxu1 }
  0xf8   :  { %v462_v22 = vpop.f32.mrf.mxu0  ;;  %v591_v23 = vpop.f32.mrf.mxu1 }
  0xfa   :  { %v4200_v24 = vpop.f32.mrf.mxu0  ;;  %v4202_v25 = vpop.f32.mrf.mxu1 }
  0xfc   :  { %v467_v26 = vpop.f32.mrf.mxu0  ;;  %v596_v27 = vpop.f32.mrf.mxu1 }
  0xfe   :  { %v4204_v28 = vpop.f32.mrf.mxu0  ;;  %v4206_v29 = vpop.f32.mrf.mxu1 }
 0x100   :  { %v470_v30 = vpop.f32.mrf.mxu0  ;;  %v599_v31 = vpop.f32.mrf.mxu1 }
 0x102   :  { %v4208_v32 = vpop.f32.mrf.mxu0  ;;  %v4210_v35 = vpop.f32.mrf.mxu1 }
 0x104   :  { %v475_v36 = vpop.f32.mrf.mxu0  ;;  %v604_v37 = vpop.f32.mrf.mxu1 }
 0x106   :  { %v4212_v38 = vpop.f32.mrf.mxu0  ;;  %v4214_v39 = vpop.f32.mrf.mxu1 }
 0x108   :  { %v478_v40 = vpop.f32.mrf.mxu0  ;;  %v607_v43 = vpop.f32.mrf.mxu1 }
 0x109   :  { %v4255_v40 = vld [vmem:[%s5910_s2] ss:$0 sm:$0xff] }
 0x10a   :  { %v4216_v44 = vpop.f32.mrf.mxu0  ;;  %v4218_v45 = vpop.f32.mrf.mxu1 }
 0x10c   :  { %v483_v46 = vpop.f32.mrf.mxu0  ;;  %v612_v49 = vpop.f32.mrf.mxu1 }
 0x10e   :  { %v4220_v50 = vpop.f32.mrf.mxu0  ;;  %v4222_v51 = vpop.f32.mrf.mxu1 }
 0x110   :  { %v486_v52 = vpop.f32.mrf.mxu0  ;;  %v615_v53 = vpop.f32.mrf.mxu1 }
 0x111   :  { %v426_v53 = vadd.f32 %v4255_v40, %v4130_v33 }
 0x112   :  { %v4224_v54 = vpop.f32.mrf.mxu0  ;;  %v4226_v57 = vpop.f32.mrf.mxu1 }
 0x114   :  { %v491_v58 = vpop.f32.mrf.mxu0  ;;  %v620_v59 = vpop.f32.mrf.mxu1 }
 0x116   :  { %v4228_v60 = vpop.f32.mrf.mxu0  ;;  %v4230_v63 = vpop.f32.mrf.mxu1 }
 0x118   :  { %v494_v0 = vpop.f32.mrf.mxu0  ;;  %v623_v1 = vpop.f32.mrf.mxu1 }
 0x119   :  { %v587_v0 = vadd.f32 %v4194_v17, %v426_v53 }
 0x11a   :  { %v4232_v2 = vpop.f32.mrf.mxu0  ;;  %v4234_v5 = vpop.f32.mrf.mxu1 }
 0x11c   :  { %v499_v6 = vpop.f32.mrf.mxu0  ;;  %v628_v7 = vpop.f32.mrf.mxu1 }
 0x11d   :  { %v429_v7 = vadd.f32 %v4255_v40, %v4146_v41 }
 0x11e   :  { %v4236_v10 = vpop.f32.mrf.mxu0  ;;  %v4238_v11 = vpop.f32.mrf.mxu1 }
 0x120   :  { %v502_v14 = vpop.f32.mrf.mxu0  ;;  %v631_v15 = vpop.f32.mrf.mxu1 }
 0x122   :  { %v4240_v18 = vpop.f32.mrf.mxu0  ;;  %v4242_v19 = vpop.f32.mrf.mxu1 }
 0x124   :  { %v507_v22 = vpop.f32.mrf.mxu0  ;;  %v636_v23 = vpop.f32.mrf.mxu1 }
 0x125   :  { %v590_v23 = vadd.f32 %v4198_v21, %v429_v7  ;;  %v437_v21 = vadd.f32 %v4255_v40, %v4166_v55 }
 0x126   :  { %v4244_v26 = vpop.f32.mrf.mxu0  ;;  %v4246_v27 = vpop.f32.mrf.mxu1 }
 0x128   :  { %v510_v30 = vpop.f32.mrf.mxu0  ;;  %v639_v31 = vpop.f32.mrf.mxu1 }
 0x12a   :  { %v4248_v36 = vpop.f32.mrf.mxu0  ;;  %v4250_v37 = vpop.f32.mrf.mxu1 }
 0x12c   :  { %v515_v43 = vpop.f32.mrf.mxu0  ;;  %v644_v46 = vpop.f32.mrf.mxu1 }
 0x12d   :  { %v434_v43 = vadd.f32 %v4255_v40, %v4150_v47  ;;  %v598_v47 = vadd.f32 %v4206_v29, %v437_v21  ;;  %v445_v29 = vadd.f32 %v4255_v40, %v4180_v3 }
 0x12e   :  { %v4257_v49 = vpop.f32.mrf.mxu0  ;;  %v4259_v52 = vpop.f32.mrf.mxu1 }
 0x12f   :  { %v595_v41 = vadd.f32 %v4202_v25, %v434_v43  ;;  %v442_v25 = vadd.f32 %v4255_v40, %v4170_v61  ;;  %v606_v61 = vadd.f32 %v4214_v39, %v445_v29  ;;  %v453_v39 = vadd.f32 %v4255_v40, %v4188_v12 }
 0x130   :  { %v518_v58 = vpop.f32.mrf.mxu0  ;;  %v647_v59 = vpop.f32.mrf.mxu1 }
 0x131   :  { %v603_v55 = vadd.f32 %v4210_v35, %v442_v25  ;;  %v450_v35 = vadd.f32 %v4255_v40, %v4184_v8  ;;  %v614_v8 = vadd.f32 %v4222_v51, %v453_v39  ;;  %v461_v51 = vadd.f32 %v4255_v40, %v4196_v20 }
 0x132   :  { %v4264_v1 = vpop.f32.mrf.mxu1  ;;  %v747_v6 = vpop.f32.mrf.mxu0 }
 0x133   :  { %v748_v14 = vadd.f32 %v747_v6, %v587_v0  ;;  %v611_v3 = vadd.f32 %v4218_v45, %v450_v35  ;;  %v458_v45 = vadd.f32 %v4255_v40, %v4192_v16  ;;  %v622_v16 = vadd.f32 %v4230_v63, %v461_v51 }
 0x134   :  { %v652_v15 = vpop.f32.mrf.mxu1  ;;  %v749_v22 = vpop.f32.mrf.mxu0  ;;  %v469_v63 = vadd.f32 %v4255_v40, %v4204_v28 }
 0x135   :  { %v874_v30 = vmax.f32 %v748_v14, 0.0  ;;  %v619_v12 = vadd.f32 %v4226_v57, %v458_v45  ;;  %v466_v57 = vadd.f32 %v4255_v40, %v4200_v24 }
 0x136   :  { %v4269_v31 = vpop.f32.mrf.mxu1  ;;  %v750_v33 = vpop.f32.mrf.mxu0  ;;  %v630_v24 = vadd.f32 %v4238_v11, %v469_v63  ;;  %v477_v11 = vadd.f32 %v4255_v40, %v4212_v38 }
 0x137   :  { %v751_v17 = vadd.f32 %v750_v33, %v590_v23  ;;  %3231 = vmatprep.mubr.msk.f32.mxu1 %vm917_vm0, %v874_v30  ;;  %v627_v20 = vadd.f32 %v4234_v5, %v466_v57  ;;  %v474_v5 = vadd.f32 %v4255_v40, %v4208_v32 }
 0x138   :  { %v655_v46 = vpop.f32.mrf.mxu1  ;;  %v752_v53 = vpop.f32.mrf.mxu0  ;;  %v638_v32 = vadd.f32 %v4246_v27, %v477_v11  ;;  %v485_v27 = vadd.f32 %v4255_v40, %v4220_v50 }
 0x139   :  { %v875_v58 = vmax.f32 %v751_v17, 0.0  ;;  %v635_v28 = vadd.f32 %v4242_v19, %v474_v5  ;;  %v482_v19 = vadd.f32 %v4255_v40, %v4216_v44 }
 0x13a   :  { %v4275_v59 = vpop.f32.mrf.mxu1  ;;  %v755_v0 = vpop.f32.mrf.mxu0  ;;  %v646_v44 = vadd.f32 %v4259_v52, %v485_v27 }
 0x13b   :  { %v756_v6 = vadd.f32 %v755_v0, %v595_v41  ;;  %3232 = vmatmul.mubr.msk.f32.vlgmr.msra.gmra.mxu1 %vm917_vm0, %v875_v58  ;;  %v643_v38 = vadd.f32 %v4250_v37, %v482_v19  ;;  %v490_v37 = vadd.f32 %v4255_v40, %v4224_v54 }
 0x13c   :  { %v660_v7 = vpop.f32.mrf.mxu1  ;;  %v757_v14 = vpop.f32.mrf.mxu0 }
 0x13d   :  { %v876_v15 = vmax.f32 %v756_v6, 0.0  ;;  %v651_v50 = vadd.f32 %v4264_v1, %v490_v37 }
 0x13e   :  { %v4281_v22 = vpop.f32.mrf.mxu1  ;;  %v758_v23 = vpop.f32.mrf.mxu0 }
 0x13f   :  { %v759_v30 = vadd.f32 %v758_v23, %v598_v47  ;;  %3234 = vmatprep.mubr.msk.f32.mxu1 %vm917_vm0, %v876_v15 }
 0x140   :  { %v663_v33 = vpop.f32.mrf.mxu1  ;;  %v760_v43 = vpop.f32.mrf.mxu0 }
 0x141   :  { %v877_v17 = vmax.f32 %v759_v30, 0.0 }
 0x142   :  { %v4287_v46 = vpop.f32.mrf.mxu1  ;;  %v763_v53 = vpop.f32.mrf.mxu0 }
 0x143   :  { %v764_v41 = vadd.f32 %v763_v53, %v603_v55  ;;  %3235 = vmatmul.mubr.msk.f32.gmra.mxu1 %vm917_vm0, %v877_v17 }
 0x144   :  { %v668_v58 = vpop.f32.mrf.mxu1  ;;  %v765_v0 = vpop.f32.mrf.mxu0 }
 0x145   :  { %v878_v21 = vmax.f32 %v764_v41, 0.0 }
 0x146   :  { %v4293_v6 = vpop.f32.mrf.mxu1  ;;  %v766_v7 = vpop.f32.mrf.mxu0 }
 0x147   :  { %v767_v14 = vadd.f32 %v766_v7, %v606_v61  ;;  %3237 = vmatprep.mubr.msk.f32.mxu1 %vm917_vm0, %v878_v21 }
 0x148   :  { %v671_v47 = vpop.f32.mrf.mxu1  ;;  %v768_v15 = vpop.f32.mrf.mxu0 }
 0x149   :  { %v879_v23 = vmax.f32 %v767_v14, 0.0 }
 0x14a   :  { %v4299_v25 = vpop.f32.mrf.mxu1  ;;  %v771_v30 = vpop.f32.mrf.mxu0 }
 0x14b   :  { %v772_v33 = vadd.f32 %v771_v30, %v611_v3  ;;  %3238 = vmatmul.mubr.msk.f32.gmra.mxu1 %vm917_vm0, %v879_v23 }
 0x14c   :  { %v676_v43 = vpop.f32.mrf.mxu1  ;;  %v773_v55 = vpop.f32.mrf.mxu0 }
 0x14d   :  { %v880_v17 = vmax.f32 %v772_v33, 0.0 }
 0x14e   :  { %v4305_v53 = vpop.f32.mrf.mxu1  ;;  %v774_v29 = vpop.f32.mrf.mxu0 }
 0x14f   :  { %v775_v41 = vadd.f32 %v774_v29, %v614_v8  ;;  %3240 = vmatprep.mubr.msk.f32.mxu1 %vm917_vm0, %v880_v17 }
 0x150   :  { %v679_v58 = vpop.f32.mrf.mxu1  ;;  %v776_v0 = vpop.f32.mrf.mxu0 }
 0x151   :  { %v881_v61 = vmax.f32 %v775_v41, 0.0 }
 0x152   :  { %v4311_v21 = vpop.f32.mrf.mxu1  ;;  %v779_v7 = vpop.f32.mrf.mxu0 }
 0x153   :  { %v780_v35 = vadd.f32 %v779_v7, %v619_v12  ;;  %3241 = vmatmul.mubr.msk.f32.gmra.mxu1 %vm917_vm0, %v881_v61 }
 0x154   :  { %v684_v14 = vpop.f32.mrf.mxu1  ;;  %v781_v47 = vpop.f32.mrf.mxu0 }
 0x155   :  { %v882_v15 = vmax.f32 %v780_v35, 0.0 }
 0x156   :  { %v4317_v3 = vpop.f32.mrf.mxu1  ;;  %v782_v23 = vpop.f32.mrf.mxu0 }
 0x157   :  { %v783_v30 = vadd.f32 %v782_v23, %v622_v16  ;;  %3243 = vmatprep.mubr.msk.f32.mxu1 %vm917_vm0, %v882_v15 }
 0x158   :  { %v687_v39 = vpop.f32.mrf.mxu1  ;;  %v784_v33 = vpop.f32.mrf.mxu0 }
 0x159   :  { %v883_v43 = vmax.f32 %v783_v30, 0.0 }
 0x15a   :  { %v4323_v55 = vpop.f32.mrf.mxu1  ;;  %v787_v8 = vpop.f32.mrf.mxu0 }
 0x15b   :  { %v788_v17 = vadd.f32 %v787_v8, %v627_v20  ;;  %3244 = vmatmul.mubr.msk.f32.gmra.mxu1 %vm917_vm0, %v883_v43 }
 0x15c   :  { %v692_v29 = vpop.f32.mrf.mxu1  ;;  %v789_v45 = vpop.f32.mrf.mxu0 }
 0x15d   :  { %v884_v41 = vmax.f32 %v788_v17, 0.0 }
 0x15e   :  { %v4329_v58 = vpop.f32.mrf.mxu1  ;;  %v790_v0 = vpop.f32.mrf.mxu0 }
 0x15f   :  { %v791_v12 = vadd.f32 %v790_v0, %v630_v24  ;;  %3246 = vmatprep.mubr.msk.f32.mxu1 %vm917_vm0, %v884_v41 }
 0x160   :  { %v695_v61 = vpop.f32.mrf.mxu1  ;;  %v792_v7 = vpop.f32.mrf.mxu0 }
 0x161   :  { %v885_v51 = vmax.f32 %v791_v12, 0.0 }
 0x162   :  { %v4335_v35 = vpop.f32.mrf.mxu1  ;;  %v795_v14 = vpop.f32.mrf.mxu0 }
 0x163   :  { %v796_v47 = vadd.f32 %v795_v14, %v635_v28  ;;  %3247 = vmatmul.mubr.msk.f32.gmra.mxu1 %vm917_vm0, %v885_v51  ;;  %v493_v51 = vadd.f32 %v4255_v40, %v4228_v60  ;;  %v501_v60 = vadd.f32 %v4255_v40, %v4236_v10  ;;  %v509_v10 = vadd.f32 %v4255_v40, %v4244_v26 }
 0x164   :  { %v700_v16 = vpop.f32.mrf.mxu1  ;;  %v797_v15 = vpop.f32.mrf.mxu0  ;;  %v517_v26 = vadd.f32 %v4255_v40, %v4257_v49  ;;  %v525_v49 = vadd.f32 %v4255_v40, %v4148_v42  ;;  %v533_v42 = vadd.f32 %v4255_v40, %v4168_v56  ;;  %v541_v56 = vadd.f32 %v4255_v40, %v4182_v4 }
 0x165   :  { %v886_v23 = vmax.f32 %v796_v47, 0.0  ;;  %v654_v11 = vadd.f32 %v4269_v31, %v493_v51  ;;  %v498_v16 = vadd.f32 %v4255_v40, %v4232_v2  ;;  %v506_v2 = vadd.f32 %v4255_v40, %v4240_v18 }
 0x166   :  { %v4341_v57 = vpop.f32.mrf.mxu1  ;;  %v798_v30 = vpop.f32.mrf.mxu0  ;;  %v514_v18 = vadd.f32 %v4255_v40, %v4248_v36  ;;  %v522_v36 = vadd.f32 %v4255_v40, %v4132_v34  ;;  %v530_v34 = vadd.f32 %v4255_v40, %v4152_v48  ;;  %v538_v48 = vadd.f32 %v4255_v40, %v4172_v62 }
 0x167   :  { %v799_v39 = vadd.f32 %v798_v30, %v638_v32  ;;  %3249 = vmatprep.mubr.msk.f32.mxu1 %vm917_vm0, %v886_v23  ;;  %v659_v32 = vadd.f32 %v4275_v59, %v498_v16  ;;  %v546_v62 = vadd.f32 %v4255_v40, %v4186_v9  ;;  %v549_v4 = vadd.f32 %v4255_v40, %v4190_v13 }
 0x168   :  { %v703_v33 = vpop.f32.mrf.mxu1  ;;  %v800_v20 = vpop.f32.mrf.mxu0  ;;  %v683_v51 = vadd.f32 %v4311_v21, %v522_v36 }
 0x169   :  { %v887_v43 = vmax.f32 %v799_v39, 0.0  ;;  %v662_v39 = vadd.f32 %v4281_v22, %v501_v60  ;;  %v694_v60 = vadd.f32 %v4329_v58, %v533_v42 }
 0x16a   :  { %v4347_v8 = vpop.f32.mrf.mxu1  ;;  %v803_v63 = vpop.f32.mrf.mxu0 }
 0x16b   :  { %v804_v17 = vadd.f32 %v803_v63, %v643_v38  ;;  %3250 = vmatmul.mubr.msk.f32.gmra.mxu1 %vm917_vm0, %v887_v43  ;;  %v667_v43 = vadd.f32 %v4287_v46, %v506_v2 }
 0x16c   :  { %v708_v29 = vpop.f32.mrf.mxu1  ;;  %v805_v45 = vpop.f32.mrf.mxu0 }
 0x16d   :  { %v888_v24 = vmax.f32 %v804_v17, 0.0  ;;  %v670_v29 = vadd.f32 %v4293_v6, %v509_v10  ;;  %v707_v10 = vadd.f32 %v4347_v8, %v546_v62  ;;  %v4424_v8 = vld [vmem:[%s5911_s4] ss:$0 sm:$0xff] }
 0x16e   :  { %v4353_v41 = vpop.f32.mrf.mxu1  ;;  %v806_v0 = vpop.f32.mrf.mxu0 }
 0x16f   :  { %v807_v5 = vadd.f32 %v806_v0, %v646_v44  ;;  %3252 = vmatprep.mubr.msk.f32.mxu1 %vm917_vm0, %v888_v24  ;;  %v675_v0 = vadd.f32 %v4299_v25, %v514_v18 }
 0x170   :  { %v808_v12 = vpop.f32.mrf.mxu0  ;;  %v711_v61 = vpop.f32.mrf.mxu1 }
 0x171   :  { %v889_v7 = vmax.f32 %v807_v5, 0.0  ;;  %v678_v61 = vadd.f32 %v4305_v53, %v517_v26 }
 0x172   :  { %v811_v28 = vpop.f32.mrf.mxu0 }
 0x173   :  { %v812_v52 = vadd.f32 %v811_v28, %v651_v50  ;;  %3253 = vmatmul.mubr.msk.f32.gmra.mxu1 %vm917_vm0, %v889_v7 }
 0x174   :  { %v813_v14 = vpop.f32.mrf.mxu0 }
 0x175   :  { %v890_v47 = vmax.f32 %v812_v52, 0.0 }
 0x176   :  { %v814_v54 = vpop.f32.mrf.mxu0 }
 0x177   :  { %v815_v15 = vadd.f32 %v814_v54, %v654_v11  ;;  %3255 = vmatprep.mubr.msk.f32.mxu1 %vm917_vm0, %v890_v47  ;;  %v686_v47 = vadd.f32 %v4317_v3, %v525_v49 }
 0x178   :  { %v816_v1 = vpop.f32.mrf.mxu0 }
 0x179   :  { %v891_v23 = vmax.f32 %v815_v15, 0.0  ;;  %v691_v1 = vadd.f32 %v4323_v55, %v530_v34 }
 0x17a   :  { %v819_v30 = vpop.f32.mrf.mxu0 }
 0x17b   :  { %v820_v19 = vadd.f32 %v819_v30, %v659_v32  ;;  %3256 = vmatmul.mubr.msk.f32.gmra.mxu1 %vm917_vm0, %v891_v23 }
 0x17c   :  { %v821_v31 = vpop.f32.mrf.mxu0 }
 0x17d   :  { %v892_v33 = vmax.f32 %v820_v19, 0.0 }
 0x17e   :  { %v822_v20 = vpop.f32.mrf.mxu0 }
 0x17f   :  { %v823_v38 = vadd.f32 %v822_v20, %v662_v39  ;;  %3258 = vmatprep.mubr.msk.f32.mxu1 %vm917_vm0, %v892_v33  ;;  %v699_v33 = vadd.f32 %v4335_v35, %v538_v48 }
 0x180   :  { %v824_v59 = vpop.f32.mrf.mxu0 }
 0x181   :  { %v893_v63 = vmax.f32 %v823_v38, 0.0  ;;  %v702_v59 = vadd.f32 %v4341_v57, %v541_v56 }
 0x182   :  { %v827_v27 = vpop.f32.mrf.mxu0 }
 0x183   :  { %v828_v17 = vadd.f32 %v827_v27, %v667_v43  ;;  %3259 = vmatmul.mubr.msk.f32.gmra.mxu1 %vm917_vm0, %v893_v63 }
 0x184   :  { %v829_v22 = vpop.f32.mrf.mxu0 }
 0x185   :  { %v894_v45 = vmax.f32 %v828_v17, 0.0 }
 0x186   :  { %v830_v44 = vpop.f32.mrf.mxu0 }
 0x187   :  { %v831_v24 = vadd.f32 %v830_v44, %v670_v29  ;;  %3261 = vmatprep.mubr.msk.f32.mxu1 %vm917_vm0, %v894_v45  ;;  %v710_v45 = vadd.f32 %v4353_v41, %v549_v4 }
 0x188   :  { %v832_v46 = vpop.f32.mrf.mxu0 }
 0x189   :  { %v895_v37 = vmax.f32 %v831_v24, 0.0 }
 0x18a   :  { %v835_v5 = vpop.f32.mrf.mxu0 }
 0x18b   :  { %v836_v12 = vadd.f32 %v835_v5, %v675_v0  ;;  %3262 = vmatmul.mubr.msk.f32.gmra.mxu1 %vm917_vm0, %v895_v37 }
 0x18c   :  { %v837_v6 = vpop.f32.mrf.mxu0 }
 0x18d   :  { %v896_v50 = vmax.f32 %v836_v12, 0.0 }
 0x18e   :  { %v838_v7 = vpop.f32.mrf.mxu0 }
 0x18f   :  { %v839_v28 = vadd.f32 %v838_v7, %v678_v61  ;;  %3264 = vmatprep.mubr.msk.f32.mxu1 %vm917_vm0, %v896_v50 }
 0x190   :  { %v840_v25 = vpop.f32.mrf.mxu0 }
 0x191   :  { %v897_v52 = vmax.f32 %v839_v28, 0.0 }
 0x192   :  { %v843_v14 = vpop.f32.mrf.mxu0 }
 0x193   :  { %v844_v11 = vadd.f32 %v843_v14, %v683_v51  ;;  %3265 = vmatmul.mubr.msk.f32.gmra.mxu1 %vm917_vm0, %v897_v52 }
 0x194   :  { %v845_v53 = vpop.f32.mrf.mxu0 }
 0x195   :  { %v898_v54 = vmax.f32 %v844_v11, 0.0 }
 0x196   :  { %v846_v16 = vpop.f32.mrf.mxu0 }
 0x197   :  { %v847_v15 = vadd.f32 %v846_v16, %v686_v47  ;;  %3267 = vmatprep.mubr.msk.f32.mxu1 %vm917_vm0, %v898_v54 }
 0x198   :  { %v848_v21 = vpop.f32.mrf.mxu0 }
 0x199   :  { %v899_v32 = vmax.f32 %v847_v15, 0.0 }
 0x19a   :  { %v851_v23 = vpop.f32.mrf.mxu0 }
 0x19b   :  { %v852_v30 = vadd.f32 %v851_v23, %v691_v1  ;;  %3268 = vmatmul.mubr.msk.f32.gmra.mxu1 %vm917_vm0, %v899_v32 }
 0x19c   :  { %v853_v3 = vpop.f32.mrf.mxu0 }
 0x19d   :  { %v900_v19 = vmax.f32 %v852_v30, 0.0  ;;  %v4437_v3 = vld [vmem:[%s5912_s5] ss:$0 sm:$0xff]  ;;  %s3499_s5 = smov 24  }
 0x19e   :  { %v854_v31 = vpop.f32.mrf.mxu0 }
 0x19f   :  { %v855_v39 = vadd.f32 %v854_v31, %v694_v60  ;;  %3270 = vmatprep.mubr.msk.f32.mxu1 %vm917_vm0, %v900_v19 }
 0x1a0   :  { %v856_v55 = vpop.f32.mrf.mxu0 }
 0x1a1   :  { %v901_v20 = vmax.f32 %v855_v39, 0.0 }
 0x1a2   :  { %v859_v2 = vpop.f32.mrf.mxu0 }
 0x1a3   :  { %v860_v38 = vadd.f32 %v859_v2, %v699_v33  ;;  %3271 = vmatmul.mubr.msk.f32.gmra.mxu1 %vm917_vm0, %v901_v20 }
 0x1a4   :  { %v861_v58 = vpop.f32.mrf.mxu0 }
 0x1a5   :  { %v902_v43 = vmax.f32 %v860_v38, 0.0 }
 0x1a6   :  { %v862_v63 = vpop.f32.mrf.mxu0 }
 0x1a7   :  { %v863_v27 = vadd.f32 %v862_v63, %v702_v59  ;;  %3273 = vmatprep.mubr.msk.f32.mxu1 %vm917_vm0, %v902_v43 }
 0x1a8   :  { %v864_v35 = vpop.f32.mrf.mxu0 }
 0x1a9   :  { %v903_v17 = vmax.f32 %v863_v27, 0.0 }
 0x1aa   :  { %v867_v22 = vpop.f32.mrf.mxu0 }
 0x1ab   :  { %v868_v29 = vadd.f32 %v867_v22, %v707_v10  ;;  %3274 = vmatmul.mubr.msk.f32.gmra.mxu1 %vm917_vm0, %v903_v17 }
 0x1ac   :  { %v869_v57 = vpop.f32.mrf.mxu0 }
 0x1ad   :  { %v904_v44 = vmax.f32 %v868_v29, 0.0 }
 0x1ae   :  { %v870_v18 = vpop.f32.mrf.mxu0 }
 0x1af   :  { %v871_v9 = vadd.f32 %v870_v18, %v710_v45  ;;  %3276 = vmatprep.mubr.msk.f32.mxu1 %vm917_vm0, %v904_v44 }
 0x1b0   :  { %v872_v24 = vpop.f32.mrf.mxu0 }
 0x1b1   :  { %v905_v46 = vmax.f32 %v871_v9, 0.0 }
 0x1b3   :  { %3277 = vmatmul.mubr.msk.f32.gmra.mxu1 %vm917_vm0, %v905_v46 }
 0x1fb   :  { %v3233_v13 = vpop.f32.mrf.mxu1 }
 0x1fc   :  { %v1086_v40 = vadd.f32 %v3233_v13, %v4424_v8 }
 0x1fd   :  { %v1080_v0 = vpop.f32.mrf.mxu1 }
 0x1fe   :  { %v3155_v37 = vmul.f32 -1.442695, %v1086_v40  ;;  %v1081_v41 = vadd.f32 %v4424_v8, %v1080_v0 }
 0x200   :  { %3305 = vpow2.f32 %v3155_v37  ;;  %v3154_v5 = vmul.f32 -1.442695, %v1081_v41 }
 0x202   :  { %3307 = vpow2.f32 %v3154_v5 }
 0x203   :  { %v3236_v26 = vpop.f32.mrf.mxu1 }
 0x204   :  { %v1096_v12 = vadd.f32 %v3236_v26, %v4424_v8 }
 0x205   :  { %v1090_v6 = vpop.f32.mrf.mxu1 }
 0x206   :  { %v3157_v61 = vmul.f32 -1.442695, %v1096_v12  ;;  %v1091_v50 = vadd.f32 %v4424_v8, %v1090_v6 }
 0x208   :  { %3309 = vpow2.f32 %v3157_v61  ;;  %v3156_v7 = vmul.f32 -1.442695, %v1091_v50 }
 0x20a   :  { %3311 = vpow2.f32 %v3156_v7 }
 0x20b   :  { %v3239_v36 = vpop.f32.mrf.mxu1 }
 0x20c   :  { %v1106_v28 = vadd.f32 %v3239_v36, %v4424_v8 }
 0x20d   :  { %v3306_v25 = vpop.eup %3305  ;;  %v1100_v51 = vpop.f32.mrf.mxu1 }
 0x20e   :  { %v1336_v52 = vadd.f32 1.0, %v3306_v25  ;;  %v3159_v14 = vmul.f32 -1.442695, %v1106_v28  ;;  %v1101_v49 = vadd.f32 %v4424_v8, %v1100_v51 }
 0x20f   :  { %v3308_v11 = vpop.eup %3307 }
 0x210   :  { %3313 = vrcp.f32 %v1336_v52  ;;  %v1335_v53 = vadd.f32 1.0, %v3308_v11  ;;  %v3158_v47 = vmul.f32 -1.442695, %v1101_v49 }
 0x211   :  { %3315 = vpow2.f32 %v3159_v14 }
 0x212   :  { %3317 = vrcp.f32 %v1335_v53 }
 0x213   :  { %3319 = vpow2.f32 %v3158_v47  ;;  %v3242_v54 = vpop.f32.mrf.mxu1 }
 0x214   :  { %v1116_v16 = vadd.f32 %v3242_v54, %v4424_v8 }
 0x215   :  { %v3310_v34 = vpop.eup %3309  ;;  %v1110_v15 = vpop.f32.mrf.mxu1 }
 0x216   :  { %v1338_v21 = vadd.f32 1.0, %v3310_v34  ;;  %v1111_v1 = vadd.f32 %v4424_v8, %v1110_v15  ;;  %v3161_v23 = vmul.f32 -1.442695, %v1116_v16 }
 0x217   :  { %v3312_v32 = vpop.eup %3311 }
 0x218   :  { %3321 = vrcp.f32 %v1338_v21  ;;  %v1337_v42 = vadd.f32 1.0, %v3312_v32  ;;  %v3160_v30 = vmul.f32 -1.442695, %v1111_v1 }
 0x219   :  { %3323 = vpow2.f32 %v3161_v23 }
 0x21a   :  { %3325 = vrcp.f32 %v1337_v42 }
 0x21b   :  { %v3245_v60 = vpop.f32.mrf.mxu1  ;;  %3327 = vpow2.f32 %v3160_v30 }
 0x21c   :  { %v1126_v2 = vadd.f32 %v3245_v60, %v4424_v8 }
 0x21d   :  { %v3314_v19 = vpop.eup %3313  ;;  %v1120_v55 = vpop.f32.mrf.mxu1 }
 0x21e   :  { %v3316_v31 = vpop.eup %3315  ;;  %v4440_v48 = vmul.f32 %v3314_v19, %v4437_v3  ;;  %v1121_v58 = vadd.f32 %v4424_v8, %v1120_v55  ;;  %v3163_v63 = vmul.f32 -1.442695, %v1126_v2 }
 0x21f   :  { %v3318_v39 = vpop.eup %3317  ;;  %v1340_v20 = vadd.f32 1.0, %v3316_v31 }
 0x220   :  { %5999 = vst [vmem:[#allocation2_spill] sm:$0xff] %v4440_v48  ;;  %v3320_v33 = vpop.eup %3319  ;;  %1632 = vrot.lane.b32.xlu1 %v4440_v48, %s3497_s15  ;;  %1504 = vrot.lane.b32.xlu0 %v4440_v48, %s3498_s16  ;;  %v4448_v56 = vmul.f32 %v3318_v39, %v4437_v3  ;;  %v1759_v59 = vmul.f32 0.5, %v4440_v48  ;;  %v3162_v27 = vmul.f32 -1.442695, %v1121_v58 }
 0x221   :  { %v1339_v38 = vadd.f32 1.0, %v3320_v33  ;;  %3329 = vrcp.f32 %v1340_v20 }
 0x222   :  { %6000 = vst [vmem:[#allocation3_spill] sm:$0xff] %v4448_v56  ;;  %v1758_v22 = vmul.f32 0.5, %v4448_v56 }
 0x223   :  { %3331 = vrcp.f32 %v1339_v38  ;;  %v3248_v35 = vpop.f32.mrf.mxu1 }
 0x224   :  { %1824 = vrot.lane.b32.xlu1 %v1759_v59, %s3497_s15  ;;  %1502 = vrot.lane.b32.xlu0 %v4448_v56, %s3498_s16  ;;  %3333 = vpow2.f32 %v3163_v63  ;;  %v1136_v45 = vadd.f32 %v3248_v35, %v4424_v8 }
 0x225   :  { %v3322_v43 = vpop.eup %3321  ;;  %3335 = vpow2.f32 %v3162_v27  ;;  %v1130_v29 = vpop.f32.mrf.mxu1 }
 0x226   :  { %v4456_v62 = vmul.f32 %v3322_v43, %v4437_v3  ;;  %v3324_v10 = vpop.eup %3323  ;;  %v1131_v9 = vadd.f32 %v4424_v8, %v1130_v29  ;;  %v3165_v24 = vmul.f32 -1.442695, %v1136_v45 }
 0x227   :  { %v3326_v17 = vpop.eup %3325  ;;  %v1342_v57 = vadd.f32 1.0, %v3324_v10 }
 0x228   :  { %1508 = vrot.lane.b32.xlu1 %v4456_v62, %s3498_s16  ;;  %1630 = vrot.lane.b32.xlu0 %v4448_v56, %s3497_s15  ;;  %v3328_v4 = vpop.eup %3327  ;;  %v4468_v44 = vmul.f32 %v3326_v17, %v4437_v3  ;;  %v3164_v13 = vmul.f32 -1.442695, %v1131_v9  ;;  %v1761_v40 = vmul.f32 0.5, %v4456_v62 }
 0x229   :  { %v1341_v18 = vadd.f32 1.0, %v3328_v4  ;;  %3337 = vrcp.f32 %v1342_v57 }
 0x22a   :  { %6001 = vst [vmem:[#allocation4_spill] sm:$0xff] %v4468_v44  ;;  %v1760_v0 = vmul.f32 0.5, %v4468_v44 }
 0x22b   :  { %3339 = vrcp.f32 %v1341_v18  ;;  %v3251_v41 = vpop.f32.mrf.mxu1 }
 0x22c   :  { %1636 = vrot.lane.b32.xlu1 %v4456_v62, %s3497_s15  ;;  %1822 = vrot.lane.b32.xlu0 %v1758_v22, %s3497_s15  ;;  %3341 = vpow2.f32 %v3165_v24  ;;  %v1146_v7 = vadd.f32 %v3251_v41, %v4424_v8 }
 0x22d   :  { %3343 = vpow2.f32 %v3164_v13  ;;  %v1140_v61 = vpop.f32.mrf.mxu1 }
 0x22e   :  { %v3330_v46 = vpop.eup %3329  ;;  %v1141_v28 = vadd.f32 %v4424_v8, %v1140_v61  ;;  %v3167_v25 = vmul.f32 -1.442695, %v1146_v7 }
 0x22f   :  { %v4480_v26 = vmul.f32 %v3330_v46, %v4437_v3 }
 0x230   :  { %1506 = vrot.lane.b32.xlu1 %v4468_v44, %s3498_s16  ;;  %1634 = vrot.lane.b32.xlu0 %v4468_v44, %s3497_s15  ;;  %v3332_v37 = vpop.eup %3331  ;;  %v3166_v52 = vmul.f32 -1.442695, %v1141_v28 }
 0x231   :  { %v3334_v5 = vpop.eup %3333  ;;  %6002 = vst [vmem:[#allocation5_spill] sm:$0xff] %v4480_v26  ;;  %v4483_v12 = vmul.f32 %v3332_v37, %v4437_v3  ;;  %v1763_v14 = vmul.f32 0.5, %v4480_v26 }
 0x232   :  { %v3336_v6 = vpop.eup %3335  ;;  %v1344_v50 = vadd.f32 1.0, %v3334_v5 }
 0x233   :  { %6003 = vst [vmem:[#allocation6_spill] sm:$0xff] %v4483_v12  ;;  %v1343_v36 = vadd.f32 1.0, %v3336_v6  ;;  %v1762_v49 = vmul.f32 0.5, %v4483_v12  ;;  %v3254_v53 = vpop.f32.mrf.mxu1 }
 0x234   :  { %1828 = vrot.lane.b32.xlu1 %v1761_v40, %s3497_s15  ;;  %1826 = vrot.lane.b32.xlu0 %v1760_v0, %s3497_s15  ;;  %3345 = vrcp.f32 %v1344_v50  ;;  %v1156_v1 = vadd.f32 %v3254_v53, %v4424_v8 }
 0x235   :  { %3347 = vrcp.f32 %v1343_v36  ;;  %v1150_v15 = vpop.f32.mrf.mxu1 }
 0x236   :  { %v3338_v51 = vpop.eup %3337  ;;  %3349 = vpow2.f32 %v3167_v25  ;;  %v1151_v23 = vadd.f32 %v4424_v8, %v1150_v15  ;;  %v3169_v42 = vmul.f32 -1.442695, %v1156_v1 }
 0x237   :  { %v4500_v54 = vmul.f32 %v3338_v51, %v4437_v3  ;;  %3351 = vpow2.f32 %v3166_v52 }
 0x238   :  { %1512 = vrot.lane.b32.xlu1 %v4480_v26, %s3498_s16  ;;  %1510 = vrot.lane.b32.xlu0 %v4483_v12, %s3498_s16  ;;  %v3340_v11 = vpop.eup %3339  ;;  %v3168_v60 = vmul.f32 -1.442695, %v1151_v23 }
 0x239   :  { %v3342_v47 = vpop.eup %3341  ;;  %6004 = vst [vmem:[#allocation7_spill] sm:$0xff] %v4500_v54  ;;  %v4503_v16 = vmul.f32 %v3340_v11, %v4437_v3  ;;  %v1765_v19 = vmul.f32 0.5, %v4500_v54 }
 0x23a   :  { %v3344_v34 = vpop.eup %3343  ;;  %v1346_v21 = vadd.f32 1.0, %v3342_v47 }
 0x23b   :  { %6005 = vst [vmem:[#allocation8_spill] sm:$0xff] %v4503_v16  ;;  %v1345_v32 = vadd.f32 1.0, %v3344_v34  ;;  %v1764_v31 = vmul.f32 0.5, %v4503_v16  ;;  %v3257_v55 = vpop.f32.mrf.mxu1 }
 0x23c   :  { %1640 = vrot.lane.b32.xlu1 %v4480_v26, %s3497_s15  ;;  %1638 = vrot.lane.b32.xlu0 %v4483_v12, %s3497_s15  ;;  %3353 = vrcp.f32 %v1346_v21  ;;  %v1166_v43 = vadd.f32 %v3257_v55, %v4424_v8 }
 0x23d   :  { %3355 = vrcp.f32 %v1345_v32  ;;  %v1160_v58 = vpop.f32.mrf.mxu1 }
 0x23e   :  { %3357 = vpow2.f32 %v3169_v42  ;;  %v1161_v27 = vadd.f32 %v4424_v8, %v1160_v58  ;;  %v3171_v35 = vmul.f32 -1.442695, %v1166_v43 }
 0x23f   :  { %3359 = vpow2.f32 %v3168_v60 }
 0x240   :  { %1832 = vrot.lane.b32.xlu1 %v1763_v14, %s3497_s15  ;;  %1830 = vrot.lane.b32.xlu0 %v1762_v49, %s3497_s15  ;;  %v3170_v17 = vmul.f32 -1.442695, %v1161_v27 }
 0x241   :  { %v3346_v30 = vpop.eup %3345 }
 0x242   :  { %v3348_v39 = vpop.eup %3347  ;;  %v4520_v20 = vmul.f32 %v3346_v30, %v4437_v3 }
 0x243   :  { %v3350_v33 = vpop.eup %3349  ;;  %v4523_v2 = vmul.f32 %v3348_v39, %v4437_v3  ;;  %v3260_v57 = vpop.f32.mrf.mxu1 }
 0x244   :  { %1516 = vrot.lane.b32.xlu1 %v4500_v54, %s3498_s16  ;;  %1514 = vrot.lane.b32.xlu0 %v4503_v16, %s3498_s16  ;;  %6006 = vst [vmem:[#allocation9_spill] sm:$0xff] %v4520_v20  ;;  %v3352_v38 = vpop.eup %3351  ;;  %v1348_v59 = vadd.f32 1.0, %v3350_v33  ;;  %v1767_v22 = vmul.f32 0.5, %v4520_v20  ;;  %v1176_v40 = vadd.f32 %v3260_v57, %v4424_v8 }
 0x245   :  { %6007 = vst [vmem:[#allocation10_spill] sm:$0xff] %v4523_v2  ;;  %v1347_v63 = vadd.f32 1.0, %v3352_v38  ;;  %v1766_v4 = vmul.f32 0.5, %v4523_v2  ;;  %v1170_v46 = vpop.f32.mrf.mxu1 }
 0x246   :  { %3361 = vrcp.f32 %v1348_v59  ;;  %v1171_v37 = vadd.f32 %v4424_v8, %v1170_v46  ;;  %v3173_v41 = vmul.f32 -1.442695, %v1176_v40 }
 0x247   :  { %3363 = vrcp.f32 %v1347_v63 }
 0x248   :  { %1644 = vrot.lane.b32.xlu1 %v4500_v54, %s3497_s15  ;;  %1642 = vrot.lane.b32.xlu0 %v4503_v16, %s3497_s15  ;;  %3365 = vpow2.f32 %v3171_v35  ;;  %v3172_v6 = vmul.f32 -1.442695, %v1171_v37 }
 0x249   :  { %v3354_v10 = vpop.eup %3353  ;;  %3367 = vpow2.f32 %v3170_v17 }
 0x24a   :  { %v3356_v29 = vpop.eup %3355  ;;  %v4540_v18 = vmul.f32 %v3354_v10, %v4437_v3 }
 0x24b   :  { %v3358_v45 = vpop.eup %3357  ;;  %v4543_v9 = vmul.f32 %v3356_v29, %v4437_v3  ;;  %v3263_v36 = vpop.f32.mrf.mxu1 }
 0x24c   :  { %1836 = vrot.lane.b32.xlu1 %v1765_v19, %s3497_s15  ;;  %1834 = vrot.lane.b32.xlu0 %v1764_v31, %s3497_s15  ;;  %6008 = vst [vmem:[#allocation11_spill] sm:$0xff] %v4540_v18  ;;  %v3360_v24 = vpop.eup %3359  ;;  %v1350_v13 = vadd.f32 1.0, %v3358_v45  ;;  %v1769_v61 = vmul.f32 0.5, %v4540_v18  ;;  %v1186_v11 = vadd.f32 %v3263_v36, %v4424_v8 }
 0x24d   :  { %6009 = vst [vmem:[#allocation12_spill] sm:$0xff] %v4543_v9  ;;  %v1349_v0 = vadd.f32 1.0, %v3360_v24  ;;  %v1768_v50 = vmul.f32 0.5, %v4543_v9  ;;  %v1180_v14 = vpop.f32.mrf.mxu1 }
 0x24e   :  { %3369 = vrcp.f32 %v1350_v13  ;;  %v1181_v47 = vadd.f32 %v4424_v8, %v1180_v14  ;;  %v3175_v34 = vmul.f32 -1.442695, %v1186_v11 }
 0x24f   :  { %3371 = vrcp.f32 %v1349_v0 }
 0x250   :  { %1520 = vrot.lane.b32.xlu1 %v4520_v20, %s3498_s16  ;;  %1518 = vrot.lane.b32.xlu0 %v4523_v2, %s3498_s16  ;;  %3373 = vpow2.f32 %v3173_v41  ;;  %v3174_v21 = vmul.f32 -1.442695, %v1181_v47 }
 0x251   :  { %3375 = vpow2.f32 %v3172_v6 }
 0x253   :  { %v3362_v5 = vpop.eup %3361  ;;  %v3266_v42 = vpop.f32.mrf.mxu1 }
 0x254   :  { %1648 = vrot.lane.b32.xlu1 %v4520_v20, %s3497_s15  ;;  %1646 = vrot.lane.b32.xlu0 %v4523_v2, %s3497_s15  ;;  %v3364_v7 = vpop.eup %3363  ;;  %v4560_v25 = vmul.f32 %v3362_v5, %v4437_v3  ;;  %v1196_v33 = vadd.f32 %v3266_v42, %v4424_v8 }
 0x255   :  { %v3366_v28 = vpop.eup %3365  ;;  %v4563_v51 = vmul.f32 %v3364_v7, %v4437_v3  ;;  %v1190_v39 = vpop.f32.mrf.mxu1 }
 0x256   :  { %v3368_v52 = vpop.eup %3367  ;;  %v1352_v49 = vadd.f32 1.0, %v3366_v28  ;;  %v1771_v1 = vmul.f32 0.5, %v4560_v25  ;;  %v1191_v58 = vadd.f32 %v4424_v8, %v1190_v39  ;;  %v3177_v59 = vmul.f32 -1.442695, %v1196_v33 }
 0x257   :  { %v1351_v53 = vadd.f32 1.0, %v3368_v52  ;;  %v1770_v32 = vmul.f32 0.5, %v4563_v51 }
 0x258   :  { %1840 = vrot.lane.b32.xlu1 %v1767_v22, %s3497_s15  ;;  %1838 = vrot.lane.b32.xlu0 %v1766_v4, %s3497_s15  ;;  %3377 = vrcp.f32 %v1352_v49  ;;  %v3176_v63 = vmul.f32 -1.442695, %v1191_v58 }
 0x259   :  { %3379 = vrcp.f32 %v1351_v53 }
 0x25a   :  { %3381 = vpow2.f32 %v3175_v34 }
 0x25b   :  { %v3370_v15 = vpop.eup %3369  ;;  %3383 = vpow2.f32 %v3174_v21  ;;  %v3269_v17 = vpop.f32.mrf.mxu1 }
 0x25c   :  { %1524 = vrot.lane.b32.xlu1 %v4540_v18, %s3498_s16  ;;  %1522 = vrot.lane.b32.xlu0 %v4543_v9, %s3498_s16  ;;  %v3372_v23 = vpop.eup %3371  ;;  %v4580_v60 = vmul.f32 %v3370_v15, %v4437_v3  ;;  %v1206_v46 = vadd.f32 %v3269_v17, %v4424_v8 }
 0x25d   :  { %v3374_v30 = vpop.eup %3373  ;;  %v4583_v19 = vmul.f32 %v3372_v23, %v4437_v3  ;;  %v1200_v45 = vpop.f32.mrf.mxu1 }
 0x25e   :  { %6010 = vst [vmem:[#allocation13_spill] sm:$0xff] %v4580_v60  ;;  %v3376_v31 = vpop.eup %3375  ;;  %v1354_v55 = vadd.f32 1.0, %v3374_v30  ;;  %v1773_v27 = vmul.f32 0.5, %v4580_v60  ;;  %v1201_v40 = vadd.f32 %v4424_v8, %v1200_v45  ;;  %v3179_v0 = vmul.f32 -1.442695, %v1206_v46 }
 0x25f   :  { %v1353_v38 = vadd.f32 1.0, %v3376_v31  ;;  %v1772_v35 = vmul.f32 0.5, %v4583_v19 }
 0x260   :  { %1652 = vrot.lane.b32.xlu1 %v4540_v18, %s3497_s15  ;;  %1650 = vrot.lane.b32.xlu0 %v4543_v9, %s3497_s15  ;;  %3385 = vrcp.f32 %v1354_v55  ;;  %v3178_v41 = vmul.f32 -1.442695, %v1201_v40 }
 0x261   :  { %3387 = vrcp.f32 %v1353_v38 }
 0x262   :  { %3389 = vpow2.f32 %v3177_v59 }
 0x263   :  { %3391 = vpow2.f32 %v3176_v63 }
 0x264   :  { %1844 = vrot.lane.b32.xlu1 %v1769_v61, %s3497_s15  ;;  %1842 = vrot.lane.b32.xlu0 %v1768_v50, %s3497_s15  ;;  %v3272_v50 = vpop.f32.mrf.mxu1 }
 0x265   :  { %v3378_v43 = vpop.eup %3377  ;;  %v1216_v11 = vadd.f32 %v3272_v50, %v4424_v8 }
 0x266   :  { %v3380_v10 = vpop.eup %3379  ;;  %v4600_v4 = vmul.f32 %v3378_v43, %v4437_v3  ;;  %v1210_v14 = vpop.f32.mrf.mxu1 }
 0x267   :  { %v3382_v22 = vpop.eup %3381  ;;  %v4603_v29 = vmul.f32 %v3380_v10, %v4437_v3  ;;  %v1211_v47 = vadd.f32 %v4424_v8, %v1210_v14  ;;  %v3181_v34 = vmul.f32 -1.442695, %v1216_v11 }
 0x268   :  { %1528 = vrot.lane.b32.xlu1 %v4560_v25, %s3498_s16  ;;  %1526 = vrot.lane.b32.xlu0 %v4563_v51, %s3498_s16  ;;  %6011 = vst [vmem:[#allocation14_spill] sm:$0xff] %v4600_v4  ;;  %v3384_v57 = vpop.eup %3383  ;;  %v1356_v24 = vadd.f32 1.0, %v3382_v22  ;;  %v1775_v5 = vmul.f32 0.5, %v4600_v4 }
 0x269   :  { %6012 = vst [vmem:[#allocation15_spill] sm:$0xff] %v4603_v29  ;;  %v1355_v13 = vadd.f32 1.0, %v3384_v57  ;;  %v1774_v6 = vmul.f32 0.5, %v4603_v29  ;;  %v3180_v21 = vmul.f32 -1.442695, %v1211_v47 }
 0x26a   :  { %3393 = vrcp.f32 %v1356_v24 }
 0x26b   :  { %3395 = vrcp.f32 %v1355_v13  ;;  %v3275_v31 = vpop.f32.mrf.mxu1 }
 0x26c   :  { %1656 = vrot.lane.b32.xlu1 %v4560_v25, %s3497_s15  ;;  %1654 = vrot.lane.b32.xlu0 %v4563_v51, %s3497_s15  ;;  %3397 = vpow2.f32 %v3179_v0  ;;  %v1226_v10 = vadd.f32 %v3275_v31, %v4424_v8 }
 0x26d   :  { %v3386_v37 = vpop.eup %3385  ;;  %3399 = vpow2.f32 %v3178_v41  ;;  %v1220_v43 = vpop.f32.mrf.mxu1 }
 0x26e   :  { %v3388_v61 = vpop.eup %3387  ;;  %v4620_v36 = vmul.f32 %v3386_v37, %v4437_v3  ;;  %v1221_v45 = vadd.f32 %v4424_v8, %v1220_v43  ;;  %v3183_v40 = vmul.f32 -1.442695, %v1226_v10 }
 0x26f   :  { %v3390_v7 = vpop.eup %3389  ;;  %v4623_v28 = vmul.f32 %v3388_v61, %v4437_v3 }
 0x270   :  { %1848 = vrot.lane.b32.xlu1 %v1771_v1, %s3497_s15  ;;  %1846 = vrot.lane.b32.xlu0 %v1770_v32, %s3497_s15  ;;  %6013 = vst [vmem:[#allocation16_spill] sm:$0xff] %v4620_v36  ;;  %v3392_v52 = vpop.eup %3391  ;;  %v1358_v49 = vadd.f32 1.0, %v3390_v7  ;;  %v1777_v23 = vmul.f32 0.5, %v4620_v36  ;;  %v3182_v37 = vmul.f32 -1.442695, %v1221_v45 }
 0x271   :  { %6014 = vst [vmem:[#allocation17_spill] sm:$0xff] %v4623_v28  ;;  %v1357_v53 = vadd.f32 1.0, %v3392_v52  ;;  %v1776_v42 = vmul.f32 0.5, %v4623_v28 }
 0x272   :  { %3401 = vrcp.f32 %v1358_v49 }
 0x273   :  { %3403 = vrcp.f32 %v1357_v53  ;;  %v3278_v14 = vpop.f32.mrf.mxu1 }
 0x274   :  { %1532 = vrot.lane.b32.xlu1 %v4580_v60, %s3498_s16  ;;  %1530 = vrot.lane.b32.xlu0 %v4583_v19, %s3498_s16  ;;  %3405 = vpow2.f32 %v3181_v34 }
 0x275   :  { %3407 = vpow2.f32 %v3180_v21  ;;  %v1230_v31 = vpop.f32.mrf.mxu1 }
 0x277   :  { %v3394_v15 = vpop.eup %3393 }
 0x278   :  { %1660 = vrot.lane.b32.xlu1 %v4580_v60, %s3497_s15  ;;  %1658 = vrot.lane.b32.xlu0 %v4583_v19, %s3497_s15  ;;  %v3396_v30 = vpop.eup %3395  ;;  %v4644_v55 = vmul.f32 %v3394_v15, %v4437_v3 }
 0x279   :  { %v3398_v39 = vpop.eup %3397  ;;  %v4647_v33 = vmul.f32 %v3396_v30, %v4437_v3 }
 0x27a   :  { %6016 = vst [vmem:[#allocation19_spill] sm:$0xff] %v4644_v55  ;;  %v3400_v59 = vpop.eup %3399 }
 0x27b   :  { %6017 = vst [vmem:[#allocation20_spill] sm:$0xff] %v4647_v33  ;;  %v1359_v57 = vadd.f32 1.0, %v3400_v59  ;;  %v1778_v61 = vmul.f32 0.5, %v4647_v33 }
 0x27c   :  { %1852 = vrot.lane.b32.xlu1 %v1773_v27, %s3497_s15  ;;  %1850 = vrot.lane.b32.xlu0 %v1772_v35, %s3497_s15  ;;  %v1360_v35 = vadd.f32 1.0, %v3398_v39 }
 0x27e   :  { %3409 = vrcp.f32 %v1360_v35 }
 0x27f   :  { %v3402_v0 = vpop.eup %3401  ;;  %3411 = vrcp.f32 %v1359_v57  ;;  %v1231_v57 = vadd.f32 %v4424_v8, %v1230_v31 }
 0x280   :  { %1536 = vrot.lane.b32.xlu1 %v4600_v4, %s3498_s16  ;;  %1534 = vrot.lane.b32.xlu0 %v4603_v29, %s3498_s16  ;;  %v3404_v50 = vpop.eup %3403  ;;  %3413 = vpow2.f32 %v3183_v40  ;;  %v4690_v47 = vmul.f32 %v3402_v0, %v4437_v3 }
 0x281   :  { %v3406_v53 = vpop.eup %3405  ;;  %v4693_v34 = vmul.f32 %v3404_v50, %v4437_v3  ;;  %3415 = vpow2.f32 %v3182_v37 }
 0x282   :  { %6021 = vst [vmem:[#allocation24_spill] sm:$0xff] %v4690_v47  ;;  %v1362_v30 = vadd.f32 1.0, %v3406_v53  ;;  %v1781_v0 = vmul.f32 0.5, %v4690_v47 }
 0x283   :  { %6022 = vst [vmem:[#allocation25_spill] sm:$0xff] %v4693_v34  ;;  %v1780_v50 = vmul.f32 0.5, %v4693_v34 }
 0x284   :  { %1664 = vrot.lane.b32.xlu1 %v4600_v4, %s3497_s15  ;;  %1662 = vrot.lane.b32.xlu0 %v4603_v29, %s3497_s15  ;;  %3417 = vrcp.f32 %v1362_v30 }
 0x288   :  { %1856 = vrot.lane.b32.xlu1 %v1775_v5, %s3497_s15  ;;  %1854 = vrot.lane.b32.xlu0 %v1774_v6, %s3497_s15  ;;  %v1779_v6 = vmul.f32 0.5, %v4644_v55 }
 0x28c   :  { %1540 = vrot.lane.b32.xlu1 %v4620_v36, %s3498_s16  ;;  %1538 = vrot.lane.b32.xlu0 %v4623_v28, %s3498_s16 }
 0x290   :  { %1668 = vrot.lane.b32.xlu1 %v4620_v36, %s3497_s15  ;;  %1666 = vrot.lane.b32.xlu0 %v4623_v28, %s3497_s15 }
 0x292   :  { %v4635_v1 = vpop.permute.xlu1 %1632  ;;  %v4637_v32 = vpop.permute.xlu0 %1504 }
 0x293   :  { %6015 = vst [vmem:[#allocation18_spill] sm:$0xff] %v4637_v32 }
 0x294   :  { %1860 = vrot.lane.b32.xlu1 %v1777_v23, %s3497_s15  ;;  %1858 = vrot.lane.b32.xlu0 %v1776_v42, %s3497_s15  ;;  %v3408_v23 = vpop.eup %3407 }
 0x295   :  { %v1361_v39 = vadd.f32 1.0, %v3408_v23  ;;  %v3410_v37 = vpop.eup %3409 }
 0x296   :  { %v1825_v38 = vpop.permute.xlu1 %1824  ;;  %v4649_v58 = vpop.permute.xlu0 %1502  ;;  %v4740_v30 = vmul.f32 %v3410_v37, %v4437_v3 }
 0x297   :  { %6018 = vst [vmem:[#allocation21_spill] sm:$0xff] %v4649_v58  ;;  %v4652_v63 = vsub.f32 %v4440_v48, %v1825_v38  ;;  %v4655_v27 = vadd.f32 %v1825_v38, %v4440_v48  ;;  %3419 = vrcp.f32 %v1361_v39  ;;  %v3184_v39 = vmul.f32 -1.442695, %v1231_v57 }
 0x298   :  { %1544 = vrot.lane.b32.xlu1 %v4644_v55, %s3498_s16  ;;  %1542 = vrot.lane.b32.xlu0 %v4647_v33, %s3498_s16  ;;  %6029 = vst [vmem:[#allocation32_spill] sm:$0xff] %v4740_v30 }
 0x299   :  { %v1983_v17 = vmax.f32 %v4652_v63, 10.0  ;;  %v2047_v22 = vmin.f32 %v4655_v27, 40.0 }
 0x29a   :  { %v4665_v24 = vpop.permute.xlu1 %1508  ;;  %v4667_v46 = vpop.permute.xlu0 %1630 }
 0x29b   :  { %6019 = vst [vmem:[#allocation22_spill] sm:$0xff] %v4665_v24  ;;  %v4669_v13 = vsub.f32 %v2047_v22, %v1983_v17  ;;  %v1236_v22 = vadd.f32 %v3278_v14, %v4424_v8  ;;  %v3412_v14 = vpop.eup %3411 }
 0x29c   :  { %1672 = vrot.lane.b32.xlu1 %v4644_v55, %s3497_s15  ;;  %1670 = vrot.lane.b32.xlu0 %v4647_v33, %s3497_s15  ;;  %v3414_v23 = vpop.eup %3413  ;;  %v4743_v31 = vmul.f32 %v3412_v14, %v4437_v3 }
 0x29d   :  { %6020 = vst [vmem:[#allocation23_spill] sm:$0xff] %v4669_v13  ;;  %v3185_v53 = vmul.f32 -1.442695, %v1236_v22  ;;  %v1364_v22 = vadd.f32 1.0, %v3414_v23  ;;  %v1783_v23 = vmul.f32 0.5, %v4740_v30 }
 0x29e   :  { %v4675_v41 = vpop.permute.xlu1 %1636  ;;  %v1823_v5 = vpop.permute.xlu0 %1822  ;;  %6030 = vst [vmem:[#allocation33_spill] sm:$0xff] %v4743_v31 }
 0x29f   :  { %v4680_v7 = vsub.f32 %v4448_v56, %v1823_v5  ;;  %v4683_v52 = vadd.f32 %v1823_v5, %v4448_v56  ;;  %3421 = vpow2.f32 %v3185_v53 }
 0x2a0   :  { %1864 = vrot.lane.b32.xlu1 %v1779_v6, %s3497_s15  ;;  %1862 = vrot.lane.b32.xlu0 %v1778_v61, %s3497_s15  ;;  %3423 = vpow2.f32 %v3184_v39 }
 0x2a1   :  { %v1982_v49 = vmax.f32 %v4680_v7, 10.0  ;;  %v2046_v11 = vmin.f32 %v4683_v52, 40.0  ;;  %3425 = vrcp.f32 %v1364_v22 }
 0x2a2   :  { %v4695_v15 = vpop.permute.xlu1 %1506  ;;  %v4697_v21 = vpop.permute.xlu0 %1634 }
 0x2a3   :  { %6023 = vst [vmem:[#allocation26_spill] sm:$0xff] %v4695_v15  ;;  %v4699_v42 = vsub.f32 %v2046_v11, %v1982_v49 }
 0x2a4   :  { %1548 = vrot.lane.b32.xlu1 %v4690_v47, %s3498_s16  ;;  %1546 = vrot.lane.b32.xlu0 %v4693_v34, %s3498_s16 }
 0x2a5   :  { %6024 = vst [vmem:[#allocation27_spill] sm:$0xff] %v4699_v42 }
 0x2a6   :  { %v1829_v38 = vpop.permute.xlu1 %1828  ;;  %v1827_v59 = vpop.permute.xlu0 %1826 }
 0x2a7   :  { %v4706_v43 = vsub.f32 %v4456_v62, %v1829_v38  ;;  %v4709_v35 = vadd.f32 %v1829_v38, %v4456_v62  ;;  %v4712_v10 = vsub.f32 %v4468_v44, %v1827_v59  ;;  %v4715_v17 = vadd.f32 %v1827_v59, %v4468_v44 }
 0x2a8   :  { %1676 = vrot.lane.b32.xlu1 %v4690_v47, %s3497_s15  ;;  %1674 = vrot.lane.b32.xlu0 %v4693_v34, %s3497_s15 }
 0x2a9   :  { %v1985_v45 = vmax.f32 %v4706_v43, 10.0  ;;  %v2049_v40 = vmin.f32 %v4709_v35, 40.0  ;;  %v1984_v5 = vmax.f32 %v4712_v10, 10.0  ;;  %v2048_v6 = vmin.f32 %v4715_v17, 40.0 }
 0x2aa   :  { %v4728_v8 = vpop.permute.xlu1 %1512  ;;  %v4730_v61 = vpop.permute.xlu0 %1510 }
 0x2ab   :  { %6025 = vst [vmem:[#allocation28_spill] sm:$0xff] %v4728_v8  ;;  %6026 = vst [vmem:[#allocation29_spill] sm:$0xff] %v4730_v61  ;;  %v4733_v49 = vsub.f32 %v2049_v40, %v1985_v45  ;;  %v4737_v11 = vsub.f32 %v2048_v6, %v1984_v5  ;;  %v3416_v45 = vpop.eup %3415 }
 0x2ac   :  { %1868 = vrot.lane.b32.xlu1 %v1781_v0, %s3497_s15  ;;  %1866 = vrot.lane.b32.xlu0 %v1780_v50, %s3497_s15  ;;  %v1363_v40 = vadd.f32 1.0, %v3416_v45  ;;  %v3418_v39 = vpop.eup %3417 }
 0x2ad   :  { %6027 = vst [vmem:[#allocation30_spill] sm:$0xff] %v4733_v49  ;;  %6028 = vst [vmem:[#allocation31_spill] sm:$0xff] %v4737_v11  ;;  %v1782_v49 = vmul.f32 0.5, %v4743_v31  ;;  %v3420_v42 = vpop.eup %3419 }
 0x2ae   :  { %v4745_v38 = vpop.permute.xlu1 %1640  ;;  %v4747_v59 = vpop.permute.xlu0 %1638  ;;  %3427 = vrcp.f32 %v1363_v40  ;;  %v4786_v40 = vmul.f32 %v3418_v39, %v4437_v3 }
 0x2b0   :  { %1552 = vrot.lane.b32.xlu1 %v4740_v30, %s3498_s16  ;;  %1550 = vrot.lane.b32.xlu0 %v4743_v31, %s3498_s16  ;;  %6035 = vst [vmem:[#allocation38_spill] sm:$0xff] %v4786_v40 }
 0x2b2   :  { %v1833_v0 = vpop.permute.xlu1 %1832  ;;  %v1831_v37 = vpop.permute.xlu0 %1830 }
 0x2b3   :  { %v4754_v5 = vsub.f32 %v4480_v26, %v1833_v0  ;;  %v4757_v57 = vadd.f32 %v1833_v0, %v4480_v26  ;;  %v4760_v6 = vsub.f32 %v4483_v12, %v1831_v37  ;;  %v4763_v50 = vadd.f32 %v1831_v37, %v4483_v12 }
 0x2b4   :  { %1680 = vrot.lane.b32.xlu1 %v4740_v30, %s3497_s15  ;;  %1678 = vrot.lane.b32.xlu0 %v4743_v31, %s3497_s15  ;;  %v4789_v30 = vmul.f32 %v3420_v42, %v4437_v3 }
 0x2b5   :  { %v1987_v14 = vmax.f32 %v4754_v5, 10.0  ;;  %v2051_v53 = vmin.f32 %v4757_v57, 40.0  ;;  %v1986_v45 = vmax.f32 %v4760_v6, 10.0  ;;  %v2050_v0 = vmin.f32 %v4763_v50, 40.0 }
 0x2b6   :  { %v4774_v37 = vpop.permute.xlu1 %1516  ;;  %v4776_v11 = vpop.permute.xlu0 %1514  ;;  %6036 = vst [vmem:[#allocation39_spill] sm:$0xff] %v4789_v30  ;;  %v1784_v4 = vmul.f32 0.5, %v4789_v30 }
 0x2b7   :  { %6031 = vst [vmem:[#allocation34_spill] sm:$0xff] %v4774_v37  ;;  %6032 = vst [vmem:[#allocation35_spill] sm:$0xff] %v4776_v11  ;;  %v4779_v22 = vsub.f32 %v2051_v53, %v1987_v14  ;;  %v4783_v13 = vsub.f32 %v2050_v0, %v1986_v45  ;;  %v3422_v14 = vpop.eup %3421 }
 0x2b8   :  { %1872 = vrot.lane.b32.xlu1 %v1783_v23, %s3497_s15  ;;  %1870 = vrot.lane.b32.xlu0 %v1782_v49, %s3497_s15  ;;  %v3424_v23 = vpop.eup %3423 }
 0x2b9   :  { %6033 = vst [vmem:[#allocation36_spill] sm:$0xff] %v4779_v22  ;;  %6034 = vst [vmem:[#allocation37_spill] sm:$0xff] %v4783_v13  ;;  %v1366_v13 = vadd.f32 1.0, %v3422_v14  ;;  %v3426_v33 = vpop.eup %3425  ;;  %v1365_v55 = vadd.f32 1.0, %v3424_v23 }
 0x2ba   :  { %v4791_v34 = vpop.permute.xlu1 %1644  ;;  %v4793_v47 = vpop.permute.xlu0 %1642  ;;  %v4832_v23 = vmul.f32 %v3426_v33, %v4437_v3 }
 0x2bb   :  { %6037 = vst [vmem:[#allocation40_spill] sm:$0xff] %v4791_v34  ;;  %6038 = vst [vmem:[#allocation41_spill] sm:$0xff] %v4793_v47  ;;  %v3428_v47 = vpop.eup %3427  ;;  %3429 = vrcp.f32 %v1366_v13 }
 0x2bc   :  { %1556 = vrot.lane.b32.xlu1 %v4786_v40, %s3498_s16  ;;  %1554 = vrot.lane.b32.xlu0 %v4789_v30, %s3498_s16  ;;  %6043 = vst [vmem:[#allocation46_spill] sm:$0xff] %v4832_v23  ;;  %v4835_v34 = vmul.f32 %v3428_v47, %v4437_v3  ;;  %3431 = vrcp.f32 %v1365_v55 }
 0x2be   :  { %v1837_v49 = vpop.permute.xlu1 %1836  ;;  %v1835_v53 = vpop.permute.xlu0 %1834  ;;  %6044 = vst [vmem:[#allocation47_spill] sm:$0xff] %v4835_v34 }
 0x2bf   :  { %v4800_v39 = vsub.f32 %v4500_v54, %v1837_v49  ;;  %v4803_v42 = vadd.f32 %v1837_v49, %v4500_v54  ;;  %v4806_v45 = vsub.f32 %v4503_v16, %v1835_v53  ;;  %v4809_v0 = vadd.f32 %v1835_v53, %v4503_v16 }
 0x2c0   :  { %1684 = vrot.lane.b32.xlu1 %v4786_v40, %s3497_s15  ;;  %1682 = vrot.lane.b32.xlu0 %v4789_v30, %s3497_s15  ;;  %v1785_v49 = vmul.f32 0.5, %v4786_v40 }
 0x2c1   :  { %v1989_v22 = vmax.f32 %v4800_v39, 10.0  ;;  %v2053_v31 = vmin.f32 %v4803_v42, 40.0  ;;  %v1988_v28 = vmax.f32 %v4806_v45, 10.0  ;;  %v2052_v53 = vmin.f32 %v4809_v0, 40.0 }
 0x2c2   :  { %v4820_v36 = vpop.permute.xlu1 %1520  ;;  %v4822_v29 = vpop.permute.xlu0 %1518 }
 0x2c3   :  { %6039 = vst [vmem:[#allocation42_spill] sm:$0xff] %v4820_v36  ;;  %6040 = vst [vmem:[#allocation43_spill] sm:$0xff] %v4822_v29  ;;  %v4825_v14 = vsub.f32 %v2053_v31, %v1989_v22  ;;  %v4829_v40 = vsub.f32 %v2052_v53, %v1988_v28  ;;  %v1599_v53 = vmax.f32 %v4440_v48, %v4637_v32 }
 0x2c4   :  { %1876 = vrot.lane.b32.xlu1 %v1785_v49, %s3497_s15  ;;  %1874 = vrot.lane.b32.xlu0 %v1784_v4, %s3497_s15  ;;  %v1787_v49 = vmul.f32 0.5, %v4832_v23 }
 0x2c5   :  { %6041 = vst [vmem:[#allocation44_spill] sm:$0xff] %v4825_v14  ;;  %6042 = vst [vmem:[#allocation45_spill] sm:$0xff] %v4829_v40 }
 0x2c6   :  { %v4837_v29 = vpop.permute.xlu1 %1648  ;;  %v4839_v30 = vpop.permute.xlu0 %1646 }
 0x2c7   :  { %6045 = vst [vmem:[#allocation48_spill] sm:$0xff] %v4837_v29  ;;  %6046 = vst [vmem:[#allocation49_spill] sm:$0xff] %v4839_v30  ;;  %v1786_v30 = vmul.f32 0.5, %v4835_v34 }
 0x2c8   :  { %1560 = vrot.lane.b32.xlu1 %v4832_v23, %s3498_s16  ;;  %1558 = vrot.lane.b32.xlu0 %v4835_v34, %s3498_s16  ;;  %v3430_v48 = vpop.eup %3429 }
 0x2ca   :  { %v1841_v4 = vpop.permute.xlu1 %1840  ;;  %v1839_v28 = vpop.permute.xlu0 %1838 }
 0x2cb   :  { %v4846_v13 = vsub.f32 %v4520_v20, %v1841_v4  ;;  %v4849_v33 = vadd.f32 %v1841_v4, %v4520_v20  ;;  %v4852_v55 = vsub.f32 %v4523_v2, %v1839_v28  ;;  %v4855_v47 = vadd.f32 %v1839_v28, %v4523_v2 }
 0x2cc   :  { %1688 = vrot.lane.b32.xlu1 %v4832_v23, %s3497_s15  ;;  %1686 = vrot.lane.b32.xlu0 %v4835_v34, %s3497_s15  ;;  %v1727_v34 = vmax.f32 %v1599_v53, %v4635_v1 }
 0x2cd   :  { %6047 = vst [vmem:[#allocation50_spill] sm:$0xff] %v4849_v33  ;;  %6048 = vst [vmem:[#allocation51_spill] sm:$0xff] %v4855_v47  ;;  %v1991_v31 = vmax.f32 %v4846_v13, 10.0  ;;  %v2055_v22 = vmin.f32 %v4849_v33, 40.0  ;;  %v1990_v4 = vmax.f32 %v4852_v55, 10.0  ;;  %v2054_v28 = vmin.f32 %v4855_v47, 40.0 }
 0x2ce   :  { %v4868_v40 = vpop.permute.xlu1 %1524  ;;  %v4870_v14 = vpop.permute.xlu0 %1522  ;;  %v1598_v33 = vmax.f32 %v4448_v56, %v4649_v58 }
 0x2cf   :  { %6049 = vst [vmem:[#allocation52_spill] sm:$0xff] %v4868_v40  ;;  %6050 = vst [vmem:[#allocation53_spill] sm:$0xff] %v4870_v14  ;;  %v4873_v29 = vsub.f32 %v2055_v22, %v1991_v31  ;;  %v4879_v32 = vsub.f32 %v2054_v28, %v1990_v4  ;;  %v3432_v31 = vpop.eup %3431  ;;  %v4890_v22 = vmul.f32 %v3430_v48, %v4437_v3  ;;  %v2079_v48 = vmin.f32 %v4655_v27, 30.0 }
 0x2d0   :  { %1880 = vrot.lane.b32.xlu1 %v1787_v49, %s3497_s15  ;;  %1878 = vrot.lane.b32.xlu0 %v1786_v30, %s3497_s15  ;;  %v1726_v23 = vmax.f32 %v1598_v33, %v4667_v46  ;;  %v4893_v30 = vmul.f32 %v3432_v31, %v4437_v3  ;;  %v2015_v3 = vmax.f32 %v4652_v63, 8.0  ;;  %v2014_v28 = vmax.f32 %v4680_v7, 8.0 }
 0x2d1   :  { %6051 = vst [vmem:[#allocation54_spill] sm:$0xff] %v4873_v29  ;;  %6052 = vst [vmem:[#allocation55_spill] sm:$0xff] %v4879_v32  ;;  %v2078_v31 = vmin.f32 %v4683_v52, 30.0 }
 0x2d2   :  { %v4882_v47 = vpop.permute.xlu1 %1652  ;;  %v4884_v40 = vpop.permute.xlu0 %1650  ;;  %6053 = vst [vmem:[#allocation56_spill] sm:$0xff] %v4890_v22  ;;  %v2175_v27 = vsub.f32 %v2079_v48, %v2015_v3  ;;  %v2080_v3 = vmin.f32 %v4715_v17, 30.0  ;;  %v1600_v48 = vmax.f32 %v4468_v44, %v4695_v15 }
 0x2d3   :  { %v2174_v7 = vsub.f32 %v2078_v31, %v2014_v28 }
 0x2d4   :  { %2848 = vrot.lane.b32.xlu1 %v1727_v34, %s3499_s5  ;;  %2846 = vrot.lane.b32.xlu0 %v1726_v23, %s3499_s5  ;;  %v1728_v15 = vmax.f32 %v1600_v48, %v4697_v21  ;;  %v2019_v21 = vmax.f32 %v4754_v5, 8.0 }
 0x2d6   :  { %v1845_v49 = vpop.permute.xlu1 %1844  ;;  %v1843_v46 = vpop.permute.xlu0 %1842 }
 0x2d7   :  { %v4896_v33 = vsub.f32 %v4540_v18, %v1845_v49  ;;  %v4899_v4 = vadd.f32 %v1845_v49, %v4540_v18  ;;  %v4902_v1 = vsub.f32 %v4543_v9, %v1843_v46  ;;  %v4905_v34 = vadd.f32 %v1843_v46, %v4543_v9 }
 0x2d8   :  { %1564 = vrot.lane.b32.xlu1 %v4890_v22, %s3498_s16  ;;  %1562 = vrot.lane.b32.xlu0 %v4893_v30, %s3498_s16 }
 0x2d9   :  { %v1993_v23 = vmax.f32 %v4896_v33, 10.0  ;;  %v2057_v53 = vmin.f32 %v4899_v4, 40.0  ;;  %v1992_v49 = vmax.f32 %v4902_v1, 10.0  ;;  %v2056_v46 = vmin.f32 %v4905_v34, 40.0 }
 0x2da   :  { %v4919_v58 = vpop.permute.xlu1 %1528  ;;  %v4921_v56 = vpop.permute.xlu0 %1526 }
 0x2db   :  { %6054 = vst [vmem:[#allocation57_spill] sm:$0xff] %v4919_v58  ;;  %6055 = vst [vmem:[#allocation58_spill] sm:$0xff] %v4921_v56  ;;  %v4923_v32 = vsub.f32 %v2057_v53, %v1993_v23  ;;  %v4929_v63 = vsub.f32 %v2056_v46, %v1992_v49  ;;  %v1789_v58 = vmul.f32 0.5, %v4890_v22  ;;  %v1788_v56 = vmul.f32 0.5, %v4893_v30 }
 0x2dc   :  { %1692 = vrot.lane.b32.xlu1 %v4890_v22, %s3497_s15  ;;  %1690 = vrot.lane.b32.xlu0 %v4893_v30, %s3497_s15  ;;  %v2017_v23 = vmax.f32 %v4706_v43, 8.0  ;;  %v2081_v53 = vmin.f32 %v4709_v35, 30.0  ;;  %v2016_v49 = vmax.f32 %v4712_v10, 8.0  ;;  %v2207_v46 = vmax.f32 %v2175_v27, 0.0 }
 0x2dd   :  { %6056 = vst [vmem:[#allocation59_spill] sm:$0xff] %v4923_v32  ;;  %6057 = vst [vmem:[#allocation60_spill] sm:$0xff] %v4929_v63  ;;  %v2206_v63 = vmax.f32 %v2174_v7, 0.0  ;;  %v1601_v35 = vmax.f32 %v4456_v62, %v4665_v24 }
 0x2de   :  { %v4931_v52 = vpop.permute.xlu1 %1656  ;;  %v4933_v29 = vpop.permute.xlu0 %1654  ;;  %v2177_v10 = vsub.f32 %v2081_v53, %v2017_v23  ;;  %v2176_v17 = vsub.f32 %v2080_v3, %v2016_v49  ;;  %v2083_v53 = vmin.f32 %v4757_v57, 30.0  ;;  %v2018_v49 = vmax.f32 %v4760_v6, 8.0 }
 0x2df   :  { %v2082_v3 = vmin.f32 %v4763_v50, 30.0 }
 0x2e0   :  { %1884 = vrot.lane.b32.xlu1 %v1789_v58, %s3497_s15  ;;  %1882 = vrot.lane.b32.xlu0 %v1788_v56, %s3497_s15  ;;  %v2209_v23 = vmax.f32 %v2177_v10, 0.0  ;;  %v2179_v57 = vsub.f32 %v2083_v53, %v2019_v21 }
 0x2e1   :  { %v2178_v6 = vsub.f32 %v2082_v3, %v2018_v49 }
 0x2e2   :  { %v1849_v28 = vpop.permute.xlu1 %1848  ;;  %v1847_v31 = vpop.permute.xlu0 %1846 }
 0x2e3   :  { %v4946_v32 = vsub.f32 %v4560_v25, %v1849_v28  ;;  %v4949_v56 = vadd.f32 %v1849_v28, %v4560_v25  ;;  %v4952_v58 = vsub.f32 %v4563_v51, %v1847_v31  ;;  %v4955_v43 = vadd.f32 %v1847_v31, %v4563_v51 }
 0x2e4   :  { %2272 = vrot.lane.b32.xlu1 %v2207_v46, %s3498_s16  ;;  %2270 = vrot.lane.b32.xlu0 %v2206_v63, %s3498_s16  ;;  %v1729_v28 = vmax.f32 %v1601_v35, %v4675_v41  ;;  %v2208_v41 = vmax.f32 %v2176_v17, 0.0 }
 0x2e5   :  { %v1995_v27 = vmax.f32 %v4946_v32, 10.0  ;;  %v2059_v7 = vmin.f32 %v4949_v56, 40.0  ;;  %v1994_v31 = vmax.f32 %v4952_v58, 10.0  ;;  %v2058_v44 = vmin.f32 %v4955_v43, 40.0 }
 0x2e6   :  { %v4967_v22 = vpop.permute.xlu1 %1532  ;;  %v4969_v24 = vpop.permute.xlu0 %1530 }
 0x2e7   :  { %6058 = vst [vmem:[#allocation61_spill] sm:$0xff] %v4967_v22  ;;  %6059 = vst [vmem:[#allocation62_spill] sm:$0xff] %v4969_v24  ;;  %v4971_v46 = vsub.f32 %v2059_v7, %v1995_v27  ;;  %v4975_v63 = vsub.f32 %v2058_v44, %v1994_v31  ;;  %v1603_v27 = vmax.f32 %v4480_v26, %v4728_v8 }
 0x2e8   :  { %2852 = vrot.lane.b32.xlu1 %v1729_v28, %s3499_s5  ;;  %2850 = vrot.lane.b32.xlu0 %v1728_v15, %s3499_s5  ;;  %v1602_v44 = vmax.f32 %v4483_v12, %v4730_v61  ;;  %v6062_v61 = vld [vmem:[#allocation40_spill] sm:$0xff] }
 0x2e9   :  { %v1731_v15 = vmax.f32 %v1603_v27, %v4745_v38  ;;  %v2021_v38 = vmax.f32 %v4800_v39, 8.0 }
 0x2ea   :  { %v4981_v48 = vpop.permute.xlu1 %1660  ;;  %v4983_v35 = vpop.permute.xlu0 %1658  ;;  %v1730_v5 = vmax.f32 %v1602_v44, %v4747_v59  ;;  %v2085_v59 = vmin.f32 %v4803_v42, 30.0  ;;  %v2211_v42 = vmax.f32 %v2179_v57, 0.0  ;;  %v2210_v44 = vmax.f32 %v2178_v6, 0.0  ;;  %v6063_v57 = vld [vmem:[#allocation41_spill] sm:$0xff] }
 0x2ec   :  { %2276 = vrot.lane.b32.xlu1 %v2209_v23, %s3498_s16  ;;  %2274 = vrot.lane.b32.xlu0 %v2208_v41, %s3498_s16  ;;  %v2020_v23 = vmax.f32 %v4806_v45, 8.0  ;;  %v2084_v41 = vmin.f32 %v4809_v0, 30.0  ;;  %v1605_v45 = vmax.f32 %v4500_v54, %v4774_v37  ;;  %v1604_v0 = vmax.f32 %v4503_v16, %v4776_v11  ;;  %v6067_v11 = vld [vmem:[#allocation14_spill] sm:$0xff] }
 0x2ee   :  { %v1853_v50 = vpop.permute.xlu1 %1852  ;;  %v1851_v10 = vpop.permute.xlu0 %1850  ;;  %v1733_v12 = vmax.f32 %v1605_v45, %v6062_v61  ;;  %v1732_v6 = vmax.f32 %v1604_v0, %v6063_v57  ;;  %v2023_v61 = vmax.f32 %v4846_v13, 8.0  ;;  %v6066_v45 = vld [vmem:[#allocation51_spill] sm:$0xff]  ;;  %v6069_v13 = vld [vmem:[#allocation48_spill] sm:$0xff] }
 0x2ef   :  { %v4994_v17 = vsub.f32 %v4580_v60, %v1853_v50  ;;  %v4997_v7 = vadd.f32 %v1853_v50, %v4580_v60  ;;  %v5000_v28 = vsub.f32 %v4583_v19, %v1851_v10  ;;  %v5003_v31 = vadd.f32 %v1851_v10, %v4583_v19 }
 0x2f0   :  { %2856 = vrot.lane.b32.xlu1 %v1731_v15, %s3499_s5  ;;  %2854 = vrot.lane.b32.xlu0 %v1730_v5, %s3499_s5  ;;  %v2181_v50 = vsub.f32 %v2085_v59, %v2021_v38  ;;  %v2180_v10 = vsub.f32 %v2084_v41, %v2020_v23  ;;  %v6065_v23 = vld [vmem:[#allocation50_spill] sm:$0xff]  ;;  %v2086_v0 = vmin.f32 %v6066_v45, 30.0 }
 0x2f1   :  { %v1997_v21 = vmax.f32 %v4994_v17, 10.0  ;;  %v2061_v53 = vmin.f32 %v4997_v7, 40.0  ;;  %v1996_v49 = vmax.f32 %v5000_v28, 10.0  ;;  %v2060_v3 = vmin.f32 %v5003_v31, 40.0 }
 0x2f2   :  { %v5015_v27 = vpop.permute.xlu1 %1536  ;;  %v5017_v39 = vpop.permute.xlu0 %1534  ;;  %v2213_v38 = vmax.f32 %v2181_v50, 0.0  ;;  %v2212_v59 = vmax.f32 %v2180_v10, 0.0  ;;  %v2087_v41 = vmin.f32 %v6065_v23, 30.0  ;;  %v6070_v10 = vld [vmem:[#allocation49_spill] sm:$0xff] }
 0x2f3   :  { %6060 = vst [vmem:[#allocation63_spill] sm:$0xff] %v5015_v27  ;;  %6061 = vst [vmem:[#allocation64_spill] sm:$0xff] %v5017_v39  ;;  %v5019_v15 = vsub.f32 %v2061_v53, %v1997_v21  ;;  %v5027_v5 = vsub.f32 %v2060_v3, %v1996_v49  ;;  %v2022_v3 = vmax.f32 %v4852_v55, 8.0 }
 0x2f4   :  { %2280 = vrot.lane.b32.xlu1 %v2211_v42, %s3498_s16  ;;  %2278 = vrot.lane.b32.xlu0 %v2210_v44, %s3498_s16  ;;  %v1607_v42 = vmax.f32 %v4520_v20, %v4820_v36  ;;  %v6064_v44 = vld [vmem:[#allocation43_spill] sm:$0xff] }
 0x2f5   :  { %v1606_v49 = vmax.f32 %v4523_v2, %v6064_v44  ;;  %v6068_v20 = vld [vmem:[#allocation15_spill] sm:$0xff]  ;;  %v2182_v16 = vsub.f32 %v2086_v0, %v2022_v3 }
 0x2f6   :  { %v5031_v21 = vpop.permute.xlu1 %1664  ;;  %v5033_v53 = vpop.permute.xlu0 %1662  ;;  %v1735_v55 = vmax.f32 %v1607_v42, %v6069_v13  ;;  %v2089_v42 = vmin.f32 %v4899_v4, 30.0  ;;  %v2088_v13 = vmin.f32 %v4905_v34, 30.0  ;;  %v1608_v4 = vmax.f32 %v4543_v9, %v4870_v14 }
 0x2f7   :  { %v1734_v23 = vmax.f32 %v1606_v49, %v6070_v10  ;;  %v2024_v49 = vmax.f32 %v4902_v1, 8.0 }
 0x2f8   :  { %2860 = vrot.lane.b32.xlu1 %v1733_v12, %s3499_s5  ;;  %2858 = vrot.lane.b32.xlu0 %v1732_v6, %s3499_s5 }
 0x2f9   :  { %v2184_v34 = vsub.f32 %v2088_v13, %v2024_v49  ;;  %v2091_v49 = vmin.f32 %v4949_v56, 30.0 }
 0x2fa   :  { %v1857_v57 = vpop.permute.xlu1 %1856  ;;  %v1855_v12 = vpop.permute.xlu0 %1854 }
 0x2fb   :  { %v5046_v6 = vsub.f32 %v6067_v11, %v1857_v57  ;;  %v5049_v36 = vadd.f32 %v1857_v57, %v6067_v11  ;;  %v5052_v44 = vsub.f32 %v6068_v20, %v1855_v12  ;;  %v5055_v50 = vadd.f32 %v1855_v12, %v6068_v20 }
 0x2fc   :  { %2284 = vrot.lane.b32.xlu1 %v2213_v38, %s3498_s16  ;;  %2282 = vrot.lane.b32.xlu0 %v2212_v59, %s3498_s16  ;;  %v2183_v57 = vsub.f32 %v2087_v41, %v2023_v61  ;;  %v2025_v38 = vmax.f32 %v4896_v33, 8.0  ;;  %v2214_v33 = vmax.f32 %v2182_v16, 0.0 }
 0x2fd   :  { %v1999_v45 = vmax.f32 %v5046_v6, 10.0  ;;  %v2063_v2 = vmin.f32 %v5049_v36, 40.0  ;;  %v1998_v37 = vmax.f32 %v5052_v44, 10.0  ;;  %v2062_v54 = vmin.f32 %v5055_v50, 40.0 }
 0x2fe   :  { %v5065_v12 = vpop.permute.xlu1 %1540  ;;  %v5067_v8 = vpop.permute.xlu0 %1538  ;;  %v2215_v0 = vmax.f32 %v2183_v57, 0.0  ;;  %v2185_v1 = vsub.f32 %v2089_v42, %v2025_v38  ;;  %v2027_v42 = vmax.f32 %v4946_v32, 8.0  ;;  %v6076_v32 = vld [vmem:[#allocation57_spill] sm:$0xff] }
 0x2ff   :  { %v5070_v59 = vsub.f32 %v2063_v2, %v1999_v45  ;;  %v5077_v61 = vsub.f32 %v2062_v54, %v1998_v37  ;;  %v6071_v2 = vld [vmem:[#allocation52_spill] sm:$0xff]  ;;  %v1736_v37 = vmax.f32 %v1608_v4, %v4884_v40  ;;  %v2216_v40 = vmax.f32 %v2184_v34, 0.0 }
 0x300   :  { %2864 = vrot.lane.b32.xlu1 %v1735_v55, %s3499_s5  ;;  %2862 = vrot.lane.b32.xlu0 %v1734_v23, %s3499_s5  ;;  %v1609_v10 = vmax.f32 %v4540_v18, %v6071_v2  ;;  %v6072_v45 = vld [vmem:[#allocation16_spill] sm:$0xff]  ;;  %v6073_v2 = vld [vmem:[#allocation17_spill] sm:$0xff]  ;;  %v1611_v56 = vmax.f32 %v4560_v25, %v6076_v32  ;;  %v2187_v18 = vsub.f32 %v2091_v49, %v2027_v42 }
 0x302   :  { %v5079_v41 = vpop.permute.xlu1 %1668  ;;  %v5081_v3 = vpop.permute.xlu0 %1666  ;;  %v1737_v54 = vmax.f32 %v1609_v10, %v4882_v47  ;;  %v2217_v47 = vmax.f32 %v2185_v1, 0.0  ;;  %v2090_v10 = vmin.f32 %v4955_v43, 30.0  ;;  %v1739_v43 = vmax.f32 %v1611_v56, %v4931_v52 }
 0x303   :  { %v2092_v52 = vmin.f32 %v5003_v31, 30.0  ;;  %v2219_v42 = vmax.f32 %v2187_v18, 0.0 }
 0x304   :  { %2288 = vrot.lane.b32.xlu1 %v2215_v0, %s3498_s16  ;;  %2286 = vrot.lane.b32.xlu0 %v2214_v33, %s3498_s16  ;;  %v2026_v33 = vmax.f32 %v4952_v58, 8.0 }
 0x306   :  { %v1861_v55 = vpop.permute.xlu1 %1860  ;;  %v1859_v23 = vpop.permute.xlu0 %1858  ;;  %v2186_v26 = vsub.f32 %v2090_v10, %v2026_v33  ;;  %v6078_v33 = vld [vmem:[#allocation19_spill] sm:$0xff] }
 0x307   :  { %v5092_v16 = vsub.f32 %v6072_v45, %v1861_v55  ;;  %v5095_v57 = vadd.f32 %v1861_v55, %v6072_v45  ;;  %v5098_v14 = vsub.f32 %v6073_v2, %v1859_v23  ;;  %v5101_v38 = vadd.f32 %v1859_v23, %v6073_v2 }
 0x308   :  { %2868 = vrot.lane.b32.xlu1 %v1737_v54, %s3499_s5  ;;  %2866 = vrot.lane.b32.xlu0 %v1736_v37, %s3499_s5  ;;  %v6077_v37 = vld [vmem:[#allocation58_spill] sm:$0xff]  ;;  %v2218_v49 = vmax.f32 %v2186_v26, 0.0 }
 0x309   :  { %v2001_v13 = vmax.f32 %v5092_v16, 10.0  ;;  %v2065_v0 = vmin.f32 %v5095_v57, 40.0  ;;  %v2000_v4 = vmax.f32 %v5098_v14, 10.0  ;;  %v2064_v54 = vmin.f32 %v5101_v38, 40.0 }
 0x30a   :  { %v5113_v55 = vpop.permute.xlu1 %1544  ;;  %v5115_v1 = vpop.permute.xlu0 %1542  ;;  %v1610_v23 = vmax.f32 %v4563_v51, %v6077_v37 }
 0x30b   :  { %6074 = vst [vmem:[#allocation40_spill] sm:$0xff] %v5113_v55  ;;  %6075 = vst [vmem:[#allocation41_spill] sm:$0xff] %v5115_v1  ;;  %v5117_v34 = vsub.f32 %v2065_v0, %v2001_v13  ;;  %v5125_v58 = vsub.f32 %v2064_v54, %v2000_v4  ;;  %v2028_v4 = vmax.f32 %v5000_v28, 8.0  ;;  %v1612_v28 = vmax.f32 %v4583_v19, %v4969_v24 }
 0x30c   :  { %2292 = vrot.lane.b32.xlu1 %v2217_v47, %s3498_s16  ;;  %2290 = vrot.lane.b32.xlu0 %v2216_v40, %s3498_s16  ;;  %v1738_v9 = vmax.f32 %v1610_v23, %v4933_v29  ;;  %v2029_v47 = vmax.f32 %v4994_v17, 8.0  ;;  %v2093_v40 = vmin.f32 %v4997_v7, 30.0  ;;  %v6079_v23 = vld [vmem:[#allocation20_spill] sm:$0xff]  ;;  %v1613_v7 = vmax.f32 %v4580_v60, %v4967_v22 }
 0x30d   :  { %v2188_v18 = vsub.f32 %v2092_v52, %v2028_v4  ;;  %v2095_v4 = vmin.f32 %v5049_v36, 30.0  ;;  %v2030_v52 = vmax.f32 %v5052_v44, 8.0 }
 0x30e   :  { %v5129_v13 = vpop.permute.xlu1 %1672  ;;  %v5131_v0 = vpop.permute.xlu0 %1670  ;;  %v2189_v26 = vsub.f32 %v2093_v40, %v2029_v47 }
 0x310   :  { %2872 = vrot.lane.b32.xlu1 %v1739_v43, %s3499_s5  ;;  %2870 = vrot.lane.b32.xlu0 %v1738_v9, %s3499_s5  ;;  %v2221_v40 = vmax.f32 %v2189_v26, 0.0 }
 0x312   :  { %v1865_v54 = vpop.permute.xlu1 %1864  ;;  %v1863_v29 = vpop.permute.xlu0 %1862 }
 0x313   :  { %v5140_v10 = vsub.f32 %v6078_v33, %v1865_v54  ;;  %v5143_v56 = vadd.f32 %v1865_v54, %v6078_v33  ;;  %v5146_v9 = vsub.f32 %v6079_v23, %v1863_v29  ;;  %v5149_v17 = vadd.f32 %v1863_v29, %v6079_v23 }
 0x314   :  { %2296 = vrot.lane.b32.xlu1 %v2219_v42, %s3498_s16  ;;  %2294 = vrot.lane.b32.xlu0 %v2218_v49, %s3498_s16  ;;  %v1741_v54 = vmax.f32 %v1613_v7, %v4981_v48  ;;  %v1740_v29 = vmax.f32 %v1612_v28, %v4983_v35  ;;  %v2220_v48 = vmax.f32 %v2188_v18, 0.0  ;;  %v2031_v35 = vmax.f32 %v5046_v6, 8.0  ;;  %v6082_v18 = vld [vmem:[#allocation24_spill] sm:$0xff] }
 0x315   :  { %v2003_v31 = vmax.f32 %v5140_v10, 10.0  ;;  %v2067_v43 = vmin.f32 %v5143_v56, 40.0  ;;  %v2002_v37 = vmax.f32 %v5146_v9, 10.0  ;;  %v2066_v22 = vmin.f32 %v5149_v17, 40.0 }
 0x316   :  { %v5163_v60 = vpop.permute.xlu1 %1548  ;;  %v5165_v24 = vpop.permute.xlu0 %1546  ;;  %v2094_v49 = vmin.f32 %v5055_v50, 30.0  ;;  %v2191_v6 = vsub.f32 %v2095_v4, %v2031_v35  ;;  %v2096_v35 = vmin.f32 %v5101_v38, 30.0  ;;  %v1616_v38 = vmax.f32 %v6073_v2, %v5067_v8 }
 0x317   :  { %6080 = vst [vmem:[#allocation50_spill] sm:$0xff] %v5163_v60  ;;  %6081 = vst [vmem:[#allocation51_spill] sm:$0xff] %v5165_v24  ;;  %v5167_v42 = vsub.f32 %v2067_v43, %v2003_v31  ;;  %v5171_v47 = vsub.f32 %v2066_v22, %v2002_v37  ;;  %v1615_v31 = vmax.f32 %v6067_v11, %v5015_v27 }
 0x318   :  { %2876 = vrot.lane.b32.xlu1 %v1741_v54, %s3499_s5  ;;  %2874 = vrot.lane.b32.xlu0 %v1740_v29, %s3499_s5  ;;  %v1614_v22 = vmax.f32 %v6068_v20, %v5017_v39  ;;  %v2190_v50 = vsub.f32 %v2094_v49, %v2030_v52  ;;  %v6083_v29 = vld [vmem:[#allocation25_spill] sm:$0xff] }
 0x319   :  { %v1743_v36 = vmax.f32 %v1615_v31, %v5031_v21  ;;  %v2033_v21 = vmax.f32 %v5092_v16, 8.0 }
 0x31a   :  { %v5177_v7 = vpop.permute.xlu1 %1676  ;;  %v5179_v28 = vpop.permute.xlu0 %1674  ;;  %v1742_v44 = vmax.f32 %v1614_v22, %v5033_v53  ;;  %v2097_v53 = vmin.f32 %v5095_v57, 30.0  ;;  %v2223_v57 = vmax.f32 %v2191_v6, 0.0  ;;  %v1744_v6 = vmax.f32 %v1616_v38, %v5081_v3  ;;  %v6087_v38 = vld [vmem:[#allocation33_spill] sm:$0xff] }
 0x31b   :  { %v2099_v3 = vmin.f32 %v5143_v56, 30.0 }
 0x31c   :  { %2300 = vrot.lane.b32.xlu1 %v2221_v40, %s3498_s16  ;;  %2298 = vrot.lane.b32.xlu0 %v2220_v48, %s3498_s16  ;;  %v2032_v48 = vmax.f32 %v5098_v14, 8.0  ;;  %v1617_v14 = vmax.f32 %v6072_v45, %v5065_v12 }
 0x31e   :  { %v1869_v37 = vpop.permute.xlu1 %1868  ;;  %v1867_v26 = vpop.permute.xlu0 %1866  ;;  %v2192_v20 = vsub.f32 %v2096_v35, %v2032_v48  ;;  %v1745_v27 = vmax.f32 %v1617_v14, %v5079_v41  ;;  %v2035_v41 = vmax.f32 %v5140_v10, 8.0  ;;  %v2034_v48 = vmax.f32 %v5146_v9, 8.0 }
 0x31f   :  { %v5190_v43 = vsub.f32 %v6082_v18, %v1869_v37  ;;  %v5193_v54 = vadd.f32 %v1869_v37, %v6082_v18  ;;  %v5196_v39 = vsub.f32 %v6083_v29, %v1867_v26  ;;  %v5199_v40 = vadd.f32 %v1867_v26, %v6083_v29 }
 0x320   :  { %2880 = vrot.lane.b32.xlu1 %v1743_v36, %s3499_s5  ;;  %2878 = vrot.lane.b32.xlu0 %v1742_v44, %s3499_s5  ;;  %v2222_v36 = vmax.f32 %v2190_v50, 0.0  ;;  %v2193_v26 = vsub.f32 %v2097_v53, %v2033_v21  ;;  %v2224_v53 = vmax.f32 %v2192_v20, 0.0  ;;  %v2098_v35 = vmin.f32 %v5149_v17, 30.0 }
 0x321   :  { %v2005_v4 = vmax.f32 %v5190_v43, 10.0  ;;  %v2069_v52 = vmin.f32 %v5193_v54, 40.0  ;;  %v2004_v49 = vmax.f32 %v5196_v39, 10.0  ;;  %v2068_v31 = vmin.f32 %v5199_v40, 40.0 }
 0x322   :  { %v5211_v22 = vpop.permute.xlu1 %1552  ;;  %v5213_v16 = vpop.permute.xlu0 %1550  ;;  %v2225_v21 = vmax.f32 %v2193_v26, 0.0  ;;  %v2195_v26 = vsub.f32 %v2099_v3, %v2035_v41 }
 0x323   :  { %6084 = vst [vmem:[#allocation14_spill] sm:$0xff] %v5211_v22  ;;  %6085 = vst [vmem:[#allocation48_spill] sm:$0xff] %v5213_v16  ;;  %v5215_v37 = vsub.f32 %v2069_v52, %v2005_v4  ;;  %v5223_v44 = vsub.f32 %v2068_v31, %v2004_v49  ;;  %v1619_v52 = vmax.f32 %v6078_v33, %v5113_v55 }
 0x324   :  { %2304 = vrot.lane.b32.xlu1 %v2223_v57, %s3498_s16  ;;  %2302 = vrot.lane.b32.xlu0 %v2222_v36, %s3498_s16  ;;  %v1618_v49 = vmax.f32 %v6079_v23, %v5115_v1  ;;  %v6086_v57 = vld [vmem:[#allocation32_spill] sm:$0xff] }
 0x325   :  { %v1747_v10 = vmax.f32 %v1619_v52, %v5129_v13  ;;  %v2101_v13 = vmin.f32 %v5193_v54, 30.0  ;;  %v2100_v52 = vmin.f32 %v5199_v40, 30.0 }
 0x326   :  { %v5227_v50 = vpop.permute.xlu1 %1680  ;;  %v5229_v4 = vpop.permute.xlu0 %1678  ;;  %v1746_v56 = vmax.f32 %v1618_v49, %v5131_v0  ;;  %v2036_v0 = vmax.f32 %v5196_v39, 8.0  ;;  %v1620_v39 = vmax.f32 %v6083_v29, %v5165_v24  ;;  %v6090_v29 = vld [vmem:[#allocation46_spill] sm:$0xff] }
 0x328   :  { %2884 = vrot.lane.b32.xlu1 %v1745_v27, %s3499_s5  ;;  %2882 = vrot.lane.b32.xlu0 %v1744_v6, %s3499_s5  ;;  %v2196_v40 = vsub.f32 %v2100_v52, %v2036_v0 }
 0x32a   :  { %v1873_v31 = vpop.permute.xlu1 %1872  ;;  %v1871_v27 = vpop.permute.xlu0 %1870 }
 0x32b   :  { %v5242_v36 = vsub.f32 %v6086_v57, %v1873_v31  ;;  %v5245_v14 = vadd.f32 %v1873_v31, %v6086_v57  ;;  %v5248_v6 = vsub.f32 %v6087_v38, %v1871_v27  ;;  %v5251_v20 = vadd.f32 %v1871_v27, %v6087_v38 }
 0x32c   :  { %2308 = vrot.lane.b32.xlu1 %v2225_v21, %s3498_s16  ;;  %2306 = vrot.lane.b32.xlu0 %v2224_v53, %s3498_s16  ;;  %v2194_v31 = vsub.f32 %v2098_v35, %v2034_v48  ;;  %v2037_v21 = vmax.f32 %v5190_v43, 8.0  ;;  %v2227_v48 = vmax.f32 %v2195_v26, 0.0  ;;  %v1621_v35 = vmax.f32 %v6082_v18, %v5163_v60 }
 0x32d   :  { %v2007_v9 = vmax.f32 %v5242_v36, 10.0  ;;  %v2071_v17 = vmin.f32 %v5245_v14, 40.0  ;;  %v2006_v1 = vmax.f32 %v5248_v6, 10.0  ;;  %v2070_v23 = vmin.f32 %v5251_v20, 40.0 }
 0x32e   :  { %v5261_v27 = vpop.permute.xlu1 %1556  ;;  %v5263_v55 = vpop.permute.xlu0 %1554  ;;  %v2226_v43 = vmax.f32 %v2194_v31, 0.0  ;;  %v2197_v54 = vsub.f32 %v2101_v13, %v2037_v21  ;;  %v6089_v31 = vld [vmem:[#allocation39_spill] sm:$0xff]  ;;  %v2228_v13 = vmax.f32 %v2196_v40, 0.0 }
 0x32f   :  { %v5266_v53 = vsub.f32 %v2071_v17, %v2007_v9  ;;  %v5273_v49 = vsub.f32 %v2070_v23, %v2006_v1  ;;  %v1749_v1 = vmax.f32 %v1621_v35, %v5177_v7  ;;  %v1748_v23 = vmax.f32 %v1620_v39, %v5179_v28  ;;  %v6088_v9 = vld [vmem:[#allocation38_spill] sm:$0xff] }
 0x330   :  { %2888 = vrot.lane.b32.xlu1 %v1747_v10, %s3499_s5  ;;  %2886 = vrot.lane.b32.xlu0 %v1746_v56, %s3499_s5  ;;  %v2229_v21 = vmax.f32 %v2197_v54, 0.0  ;;  %v2039_v7 = vmax.f32 %v5242_v36, 8.0  ;;  %v2103_v28 = vmin.f32 %v5245_v14, 30.0  ;;  %v1623_v54 = vmax.f32 %v6086_v57, %v5211_v22 }
 0x331   :  { %v1622_v36 = vmax.f32 %v6087_v38, %v5213_v16 }
 0x332   :  { %v5275_v41 = vpop.permute.xlu1 %1684  ;;  %v5277_v3 = vpop.permute.xlu0 %1682  ;;  %v2199_v40 = vsub.f32 %v2103_v28, %v2039_v7  ;;  %v6091_v7 = vld [vmem:[#allocation47_spill] sm:$0xff] }
 0x334   :  { %2312 = vrot.lane.b32.xlu1 %v2227_v48, %s3498_s16  ;;  %2310 = vrot.lane.b32.xlu0 %v2226_v43, %s3498_s16  ;;  %v2038_v48 = vmax.f32 %v5248_v6, 8.0  ;;  %v2102_v43 = vmin.f32 %v5251_v20, 30.0  ;;  %v1751_v6 = vmax.f32 %v1623_v54, %v5227_v50  ;;  %v1750_v20 = vmax.f32 %v1622_v36, %v5229_v4 }
 0x336   :  { %v1877_v10 = vpop.permute.xlu1 %1876  ;;  %v1875_v56 = vpop.permute.xlu0 %1874 }
 0x337   :  { %v1945_v17 = vsub.f32 %v6088_v9, %v1877_v10  ;;  %v1977_v26 = vadd.f32 %v1877_v10, %v6088_v9  ;;  %v1944_v60 = vsub.f32 %v6089_v31, %v1875_v56  ;;  %v1976_v24 = vadd.f32 %v1875_v56, %v6089_v31 }
 0x338   :  { %2892 = vrot.lane.b32.xlu1 %v1749_v1, %s3499_s5  ;;  %2890 = vrot.lane.b32.xlu0 %v1748_v23, %s3499_s5  ;;  %v2198_v23 = vsub.f32 %v2102_v43, %v2038_v48  ;;  %v1625_v43 = vmax.f32 %v6088_v9, %v5261_v27 }
 0x339   :  { %v2009_v0 = vmax.f32 %v1945_v17, 10.0  ;;  %v2073_v52 = vmin.f32 %v1977_v26, 40.0  ;;  %v2008_v35 = vmax.f32 %v1944_v60, 10.0  ;;  %v2072_v39 = vmin.f32 %v1976_v24, 40.0 }
 0x33a   :  { %v5297_v10 = vpop.permute.xlu1 %1560  ;;  %v5299_v56 = vpop.permute.xlu0 %1558  ;;  %v2041_v22 = vmax.f32 %v1945_v17, 8.0  ;;  %v2105_v16 = vmin.f32 %v1977_v26, 30.0  ;;  %v2040_v38 = vmax.f32 %v1944_v60, 8.0  ;;  %v1624_v17 = vmax.f32 %v6089_v31, %v5263_v55 }
 0x33b   :  { %v5301_v1 = vsub.f32 %v2073_v52, %v2009_v0  ;;  %v5309_v14 = vsub.f32 %v2072_v39, %v2008_v35  ;;  %v2231_v35 = vmax.f32 %v2199_v40, 0.0  ;;  %v2230_v39 = vmax.f32 %v2198_v23, 0.0 }
 0x33c   :  { %2316 = vrot.lane.b32.xlu1 %v2229_v21, %s3498_s16  ;;  %2314 = vrot.lane.b32.xlu0 %v2228_v13, %s3498_s16  ;;  %v2104_v21 = vmin.f32 %v1976_v24, 30.0  ;;  %v2201_v60 = vsub.f32 %v2105_v16, %v2041_v22  ;;  %v1752_v36 = vmax.f32 %v1624_v17, %v5277_v3  ;;  %v1627_v17 = vmax.f32 %v6090_v29, %v5297_v10 }
 0x33e   :  { %v1689_v0 = vpop.permute.xlu1 %1688  ;;  %v1687_v52 = vpop.permute.xlu0 %1686  ;;  %v2200_v24 = vsub.f32 %v2104_v21, %v2040_v38  ;;  %v2233_v16 = vmax.f32 %v2201_v60, 0.0 }
 0x33f   :  { %v1755_v60 = vmax.f32 %v1627_v17, %v1689_v0 }
 0x340   :  { %2896 = vrot.lane.b32.xlu1 %v1751_v6, %s3499_s5  ;;  %2894 = vrot.lane.b32.xlu0 %v1750_v20, %s3499_s5  ;;  %v2232_v38 = vmax.f32 %v2200_v24, 0.0 }
 0x342   :  { %v1881_v57 = vpop.permute.xlu1 %1880  ;;  %v1879_v13 = vpop.permute.xlu0 %1878 }
 0x343   :  { %v1947_v50 = vsub.f32 %v6090_v29, %v1881_v57  ;;  %v1979_v4 = vadd.f32 %v1881_v57, %v6090_v29  ;;  %v1946_v28 = vsub.f32 %v6091_v7, %v1879_v13  ;;  %v1978_v48 = vadd.f32 %v1879_v13, %v6091_v7 }
 0x344   :  { %2320 = vrot.lane.b32.xlu1 %v2231_v35, %s3498_s16  ;;  %2318 = vrot.lane.b32.xlu0 %v2230_v39, %s3498_s16  ;;  %v1753_v57 = vmax.f32 %v1625_v43, %v5275_v41 }
 0x345   :  { %v2011_v26 = vmax.f32 %v1947_v50, 10.0  ;;  %v2075_v54 = vmin.f32 %v1979_v4, 40.0  ;;  %v2010_v6 = vmax.f32 %v1946_v28, 10.0  ;;  %v2074_v20 = vmin.f32 %v1978_v48, 40.0 }
 0x346   :  { %v5327_v40 = vpop.permute.xlu1 %2848  ;;  %v5329_v23 = vpop.permute.xlu0 %2846  ;;  %v2043_v21 = vmax.f32 %v1947_v50, 8.0  ;;  %v2107_v41 = vmin.f32 %v1979_v4, 30.0  ;;  %v2042_v35 = vmax.f32 %v1946_v28, 8.0  ;;  %v2106_v3 = vmin.f32 %v1978_v48, 30.0 }
 0x347   :  { %6092 = vst [vmem:[#allocation49_spill] sm:$0xff] %v5327_v40  ;;  %6093 = vst [vmem:[#allocation16_spill] sm:$0xff] %v5329_v23  ;;  %v5331_v13 = vsub.f32 %v2075_v54, %v2011_v26  ;;  %v5335_v22 = vsub.f32 %v2074_v20, %v2010_v6  ;;  %v1626_v26 = vmax.f32 %v6091_v7, %v5299_v56 }
 0x348   :  { %2900 = vrot.lane.b32.xlu1 %v1753_v57, %s3499_s5  ;;  %2898 = vrot.lane.b32.xlu0 %v1752_v36, %s3499_s5  ;;  %v2203_v50 = vsub.f32 %v2107_v41, %v2043_v21  ;;  %v2202_v4 = vsub.f32 %v2106_v3, %v2042_v35  ;;  %v6098_v35 = vld [vmem:[#allocation23_spill] sm:$0xff] }
 0x349   :  { %v1754_v24 = vmax.f32 %v1626_v26, %v1687_v52  ;;  %v2143_v3 = vmax.f32 %v6098_v35, 0.0 }
 0x34a   :  { %v5337_v39 = vpop.permute.xlu1 %1564  ;;  %v5339_v43 = vpop.permute.xlu0 %1562  ;;  %v2235_v6 = vmax.f32 %v2203_v50, 0.0  ;;  %v2234_v20 = vmax.f32 %v2202_v4, 0.0 }
 0x34b   :  { %6094 = vst [vmem:[#allocation17_spill] sm:$0xff] %v5337_v39  ;;  %6095 = vst [vmem:[#allocation57_spill] sm:$0xff] %v5339_v43  ;;  %v1628_v54 = vmax.f32 %v4893_v30, %v5339_v43 }
 0x34c   :  { %2324 = vrot.lane.b32.xlu1 %v2233_v16, %s3498_s16  ;;  %2322 = vrot.lane.b32.xlu0 %v2232_v38, %s3498_s16  ;;  %v6097_v16 = vld [vmem:[#allocation56_spill] sm:$0xff] }
 0x34e   :  { %v5347_v28 = vpop.permute.xlu1 %1692  ;;  %v1691_v48 = vpop.permute.xlu0 %1690 }
 0x34f   :  { %6096 = vst [vmem:[#allocation19_spill] sm:$0xff] %v5347_v28  ;;  %v1756_v41 = vmax.f32 %v1628_v54, %v1691_v48  ;;  %v6099_v48 = vld [vmem:[#allocation27_spill] sm:$0xff] }
 0x350   :  { %2904 = vrot.lane.b32.xlu1 %v1755_v60, %s3499_s5  ;;  %2902 = vrot.lane.b32.xlu0 %v1754_v24, %s3499_s5  ;;  %v2142_v54 = vmax.f32 %v6099_v48, 0.0 }
 0x352   :  { %v1885_v57 = vpop.permute.xlu1 %1884  ;;  %v1883_v36 = vpop.permute.xlu0 %1882 }
 0x353   :  { %v1949_v38 = vsub.f32 %v6097_v16, %v1885_v57  ;;  %v1981_v0 = vadd.f32 %v1885_v57, %v6097_v16  ;;  %v1948_v52 = vsub.f32 %v4893_v30, %v1883_v36  ;;  %v1980_v21 = vadd.f32 %v1883_v36, %v4893_v30 }
 0x354   :  { %2328 = vrot.lane.b32.xlu1 %v2235_v6, %s3498_s16  ;;  %2326 = vrot.lane.b32.xlu0 %v2234_v20, %s3498_s16 }
 0x355   :  { %v2045_v17 = vmax.f32 %v1949_v38, 8.0  ;;  %v2109_v26 = vmin.f32 %v1981_v0, 30.0  ;;  %v2044_v60 = vmax.f32 %v1948_v52, 8.0  ;;  %v2108_v24 = vmin.f32 %v1980_v21, 30.0 }
 0x356   :  { %v2273_v50 = vpop.permute.xlu1 %2272  ;;  %v2271_v4 = vpop.permute.xlu0 %2270  ;;  %v2013_v40 = vmax.f32 %v1949_v38, 10.0  ;;  %v2077_v23 = vmin.f32 %v1981_v0, 40.0  ;;  %v2012_v57 = vmax.f32 %v1948_v52, 10.0  ;;  %v2076_v28 = vmin.f32 %v1980_v21, 40.0 }
 0x357   :  { %v2205_v43 = vsub.f32 %v2109_v26, %v2045_v17  ;;  %v5360_v39 = vmul.f32 %v2273_v50, %v2143_v3  ;;  %v2204_v20 = vsub.f32 %v2108_v24, %v2044_v60  ;;  %v5370_v38 = vmul.f32 %v2271_v4, %v2142_v54  ;;  %v6101_v17 = vld [vmem:[#allocation31_spill] sm:$0xff]  ;;  %v6104_v50 = vld [vmem:[#allocation36_spill] sm:$0xff] }
 0x358   :  { %2906 = vrot.lane.b32.xlu0 %v1756_v41, %s3499_s5  ;;  %v5364_v36 = vsub.f32 %v2077_v23, %v2013_v40  ;;  %v5366_v6 = vsub.f32 %v2076_v28, %v2012_v57  ;;  %v6100_v40 = vld [vmem:[#allocation30_spill] sm:$0xff]  ;;  %v2144_v26 = vmax.f32 %v6101_v17, 0.0  ;;  %v2147_v4 = vmax.f32 %v6104_v50, 0.0  ;;  %v6105_v57 = vld [vmem:[#allocation37_spill] sm:$0xff] }
 0x359   :  { %2496 = vrot.lane.b32.xlu1 %v5360_v39, %s3500_s17  ;;  %v2237_v21 = vmax.f32 %v2205_v43, 0.0  ;;  %v2145_v23 = vmax.f32 %v6100_v40, 0.0  ;;  %v2236_v35 = vmax.f32 %v2204_v20, 0.0  ;;  %v2146_v48 = vmax.f32 %v6105_v57, 0.0  ;;  %v6109_v17 = vld [vmem:[#allocation45_spill] sm:$0xff] }
 0x35a   :  { %v5372_v0 = vpop.permute.xlu1 %2852  ;;  %v5374_v52 = vpop.permute.xlu0 %2850 }
 0x35c   :  { %2494 = vrot.lane.b32.xlu0 %v5370_v38, %s3500_s17 }
 0x35d   :  { %2332 = vrot.lane.b32.xlu1 %v2237_v21, %s3498_s16 }
 0x35e   :  { %v2277_v28 = vpop.permute.xlu1 %2276  ;;  %v2275_v41 = vpop.permute.xlu0 %2274 }
 0x35f   :  { %v5380_v3 = vmul.f32 %v2277_v28, %v2145_v23  ;;  %v5386_v43 = vmul.f32 %v2275_v41, %v2144_v26  ;;  %v6108_v41 = vld [vmem:[#allocation44_spill] sm:$0xff]  ;;  %v2148_v26 = vmax.f32 %v6109_v17, 0.0 }
 0x360   :  { %2330 = vrot.lane.b32.xlu0 %v2236_v35, %s3498_s16  ;;  %v2149_v35 = vmax.f32 %v6108_v41, 0.0 }
 0x361   :  { %2500 = vrot.lane.b32.xlu1 %v5380_v3, %s3500_s17 }
 0x362   :  { %v5388_v60 = vpop.permute.xlu1 %2856  ;;  %v5390_v24 = vpop.permute.xlu0 %2854 }
 0x363   :  { %6102 = vst [vmem:[#allocation24_spill] sm:$0xff] %v5388_v60  ;;  %6103 = vst [vmem:[#allocation38_spill] sm:$0xff] %v5390_v24 }
 0x364   :  { %2498 = vrot.lane.b32.xlu0 %v5386_v43, %s3500_s17 }
 0x366   :  { %v2281_v54 = vpop.permute.xlu1 %2280  ;;  %v2279_v20 = vpop.permute.xlu0 %2278 }
 0x367   :  { %v5396_v21 = vmul.f32 %v2281_v54, %v2147_v4  ;;  %v5398_v40 = vmul.f32 %v2279_v20, %v2146_v48 }
 0x369   :  { %2504 = vrot.lane.b32.xlu1 %v5396_v21, %s3500_s17  ;;  %2502 = vrot.lane.b32.xlu0 %v5398_v40, %s3500_s17 }
 0x36a   :  { %v5404_v23 = vpop.permute.xlu1 %2860  ;;  %v5406_v28 = vpop.permute.xlu0 %2858 }
 0x36b   :  { %6106 = vst [vmem:[#allocation39_spill] sm:$0xff] %v5404_v23  ;;  %6107 = vst [vmem:[#allocation46_spill] sm:$0xff] %v5406_v28  ;;  %v6114_v23 = vld [vmem:[#allocation54_spill] sm:$0xff]  ;;  %v6115_v28 = vld [vmem:[#allocation55_spill] sm:$0xff] }
 0x36c   :  { %v2151_v41 = vmax.f32 %v6114_v23, 0.0  ;;  %v2150_v17 = vmax.f32 %v6115_v28, 0.0 }
 0x36e   :  { %v2285_v50 = vpop.permute.xlu1 %2284  ;;  %v2283_v57 = vpop.permute.xlu0 %2282 }
 0x36f   :  { %v5410_v4 = vmul.f32 %v2285_v50, %v2149_v35  ;;  %v5412_v48 = vmul.f32 %v2283_v57, %v2148_v26 }
 0x371   :  { %6110 = vst [vmem:[#allocation47_spill] sm:$0xff] %v5410_v4  ;;  %6111 = vst [vmem:[#allocation56_spill] sm:$0xff] %v5412_v48  ;;  %2508 = vrot.lane.b32.xlu1 %v5410_v4, %s3500_s17  ;;  %2506 = vrot.lane.b32.xlu0 %v5412_v48, %s3500_s17 }
 0x372   :  { %v5418_v54 = vpop.permute.xlu1 %2864  ;;  %v5420_v20 = vpop.permute.xlu0 %2862 }
 0x373   :  { %6112 = vst [vmem:[#allocation23_spill] sm:$0xff] %v5418_v54  ;;  %6113 = vst [vmem:[#allocation27_spill] sm:$0xff] %v5420_v20  ;;  %v6118_v54 = vld [vmem:[#allocation59_spill] sm:$0xff]  ;;  %v6119_v20 = vld [vmem:[#allocation60_spill] sm:$0xff] }
 0x374   :  { %v2153_v23 = vmax.f32 %v6118_v54, 0.0  ;;  %v2152_v28 = vmax.f32 %v6119_v20, 0.0  ;;  %v2155_v54 = vmax.f32 %v4971_v46, 0.0  ;;  %v2154_v20 = vmax.f32 %v4975_v63, 0.0 }
 0x375   :  { %v2157_v46 = vmax.f32 %v5019_v15, 0.0  ;;  %v2156_v63 = vmax.f32 %v5027_v5, 0.0  ;;  %v2159_v15 = vmax.f32 %v5070_v59, 0.0  ;;  %v2158_v5 = vmax.f32 %v5077_v61, 0.0 }
 0x376   :  { %v2289_v60 = vpop.permute.xlu1 %2288  ;;  %v2287_v24 = vpop.permute.xlu0 %2286  ;;  %v2161_v59 = vmax.f32 %v5117_v34, 0.0  ;;  %v2160_v61 = vmax.f32 %v5125_v58, 0.0  ;;  %v2163_v34 = vmax.f32 %v5167_v42, 0.0  ;;  %v2162_v58 = vmax.f32 %v5171_v47, 0.0 }
 0x377   :  { %v5424_v35 = vmul.f32 %v2289_v60, %v2151_v41  ;;  %v5426_v26 = vmul.f32 %v2287_v24, %v2150_v17  ;;  %v2165_v42 = vmax.f32 %v5215_v37, 0.0  ;;  %v2164_v47 = vmax.f32 %v5223_v44, 0.0 }
 0x378   :  { %v2167_v37 = vmax.f32 %v5266_v53, 0.0  ;;  %v2166_v44 = vmax.f32 %v5273_v49, 0.0  ;;  %v2169_v53 = vmax.f32 %v5301_v1, 0.0  ;;  %v2168_v49 = vmax.f32 %v5309_v14, 0.0 }
 0x379   :  { %2512 = vrot.lane.b32.xlu1 %v5424_v35, %s3500_s17  ;;  %2510 = vrot.lane.b32.xlu0 %v5426_v26, %s3500_s17  ;;  %v2171_v1 = vmax.f32 %v5331_v13, 0.0  ;;  %v2170_v14 = vmax.f32 %v5335_v22, 0.0 }
 0x37a   :  { %v5432_v50 = vpop.permute.xlu1 %2868  ;;  %v5434_v57 = vpop.permute.xlu0 %2866 }
 0x37b   :  { %6116 = vst [vmem:[#allocation30_spill] sm:$0xff] %v5432_v50  ;;  %6117 = vst [vmem:[#allocation31_spill] sm:$0xff] %v5434_v57 }
 0x37e   :  { %v2293_v4 = vpop.permute.xlu1 %2292  ;;  %v2291_v48 = vpop.permute.xlu0 %2290 }
 0x37f   :  { %v5438_v60 = vmul.f32 %v2293_v4, %v2153_v23  ;;  %v5440_v24 = vmul.f32 %v2291_v48, %v2152_v28 }
 0x381   :  { %2516 = vrot.lane.b32.xlu1 %v5438_v60, %s3500_s17  ;;  %2514 = vrot.lane.b32.xlu0 %v5440_v24, %s3500_s17 }
 0x382   :  { %v5446_v41 = vpop.permute.xlu1 %2872  ;;  %v5448_v17 = vpop.permute.xlu0 %2870 }
 0x383   :  { %6120 = vst [vmem:[#allocation36_spill] sm:$0xff] %v5446_v41  ;;  %6121 = vst [vmem:[#allocation37_spill] sm:$0xff] %v5448_v17 }
 0x386   :  { %v2297_v50 = vpop.permute.xlu1 %2296  ;;  %v2295_v57 = vpop.permute.xlu0 %2294 }
 0x387   :  { %v5452_v4 = vmul.f32 %v2297_v50, %v2155_v54  ;;  %v5454_v48 = vmul.f32 %v2295_v57, %v2154_v20 }
 0x389   :  { %2520 = vrot.lane.b32.xlu1 %v5452_v4, %s3500_s17  ;;  %2518 = vrot.lane.b32.xlu0 %v5454_v48, %s3500_s17 }
 0x38a   :  { %v5460_v23 = vpop.permute.xlu1 %2876  ;;  %v5462_v28 = vpop.permute.xlu0 %2874 }
 0x38b   :  { %6122 = vst [vmem:[#allocation44_spill] sm:$0xff] %v5460_v23  ;;  %6123 = vst [vmem:[#allocation45_spill] sm:$0xff] %v5462_v28 }
 0x38e   :  { %v2301_v17 = vpop.permute.xlu1 %2300  ;;  %v2299_v41 = vpop.permute.xlu0 %2298 }
 0x38f   :  { %v5466_v50 = vmul.f32 %v2301_v17, %v2157_v46  ;;  %v5468_v57 = vmul.f32 %v2299_v41, %v2156_v63 }
 0x391   :  { %2524 = vrot.lane.b32.xlu1 %v5466_v50, %s3500_s17  ;;  %2522 = vrot.lane.b32.xlu0 %v5468_v57, %s3500_s17 }
 0x392   :  { %v5474_v54 = vpop.permute.xlu1 %2880  ;;  %v5476_v20 = vpop.permute.xlu0 %2878 }
 0x393   :  { %6124 = vst [vmem:[#allocation54_spill] sm:$0xff] %v5474_v54  ;;  %6125 = vst [vmem:[#allocation55_spill] sm:$0xff] %v5476_v20 }
 0x396   :  { %v2305_v28 = vpop.permute.xlu1 %2304  ;;  %v2303_v23 = vpop.permute.xlu0 %2302 }
 0x397   :  { %v5480_v17 = vmul.f32 %v2305_v28, %v2159_v15  ;;  %v5482_v41 = vmul.f32 %v2303_v23, %v2158_v5 }
 0x399   :  { %2528 = vrot.lane.b32.xlu1 %v5480_v17, %s3500_s17  ;;  %2526 = vrot.lane.b32.xlu0 %v5482_v41, %s3500_s17 }
 0x39a   :  { %v5488_v46 = vpop.permute.xlu1 %2884  ;;  %v5490_v63 = vpop.permute.xlu0 %2882 }
 0x39b   :  { %6126 = vst [vmem:[#allocation59_spill] sm:$0xff] %v5488_v46  ;;  %6127 = vst [vmem:[#allocation60_spill] sm:$0xff] %v5490_v63 }
 0x39e   :  { %v2309_v20 = vpop.permute.xlu1 %2308  ;;  %v2307_v54 = vpop.permute.xlu0 %2306 }
 0x39f   :  { %v5494_v28 = vmul.f32 %v2309_v20, %v2161_v59  ;;  %v5496_v23 = vmul.f32 %v2307_v54, %v2160_v61 }
 0x3a1   :  { %2532 = vrot.lane.b32.xlu1 %v5494_v28, %s3500_s17  ;;  %2530 = vrot.lane.b32.xlu0 %v5496_v23, %s3500_s17 }
 0x3a2   :  { %v5502_v15 = vpop.permute.xlu1 %2888  ;;  %v5504_v5 = vpop.permute.xlu0 %2886 }
 0x3a3   :  { %6128 = vst [vmem:[#allocation65_spill] sm:$0xff] %v5502_v15  ;;  %6129 = vst [vmem:[#allocation66_spill] sm:$0xff] %v5504_v5 }
 0x3a6   :  { %v2313_v63 = vpop.permute.xlu1 %2312  ;;  %v2311_v46 = vpop.permute.xlu0 %2310 }
 0x3a7   :  { %v5508_v20 = vmul.f32 %v2313_v63, %v2163_v34  ;;  %v5510_v54 = vmul.f32 %v2311_v46, %v2162_v58 }
 0x3a9   :  { %2536 = vrot.lane.b32.xlu1 %v5508_v20, %s3500_s17  ;;  %2534 = vrot.lane.b32.xlu0 %v5510_v54, %s3500_s17 }
 0x3aa   :  { %v5516_v59 = vpop.permute.xlu1 %2892  ;;  %v5518_v61 = vpop.permute.xlu0 %2890 }
 0x3ab   :  { %6130 = vst [vmem:[#allocation67_spill] sm:$0xff] %v5516_v59  ;;  %6131 = vst [vmem:[#allocation68_spill] sm:$0xff] %v5518_v61 }
 0x3ae   :  { %v2317_v5 = vpop.permute.xlu1 %2316  ;;  %v2315_v15 = vpop.permute.xlu0 %2314 }
 0x3af   :  { %v5522_v63 = vmul.f32 %v2317_v5, %v2165_v42  ;;  %v5524_v46 = vmul.f32 %v2315_v15, %v2164_v47 }
 0x3b1   :  { %6132 = vst [vmem:[#allocation69_spill] sm:$0xff] %v5524_v46  ;;  %2540 = vrot.lane.b32.xlu1 %v5522_v63, %s3500_s17  ;;  %2538 = vrot.lane.b32.xlu0 %v5524_v46, %s3500_s17 }
 0x3b2   :  { %v5530_v34 = vpop.permute.xlu1 %2896  ;;  %v5532_v58 = vpop.permute.xlu0 %2894 }
 0x3b3   :  { %6133 = vst [vmem:[#allocation70_spill] sm:$0xff] %v5530_v34  ;;  %6134 = vst [vmem:[#allocation71_spill] sm:$0xff] %v5532_v58 }
 0x3b6   :  { %v2321_v61 = vpop.permute.xlu1 %2320  ;;  %v2319_v59 = vpop.permute.xlu0 %2318 }
 0x3b7   :  { %v5536_v5 = vmul.f32 %v2321_v61, %v2167_v37  ;;  %v5538_v15 = vmul.f32 %v2319_v59, %v2166_v44 }
 0x3b9   :  { %6135 = vst [vmem:[#allocation72_spill] sm:$0xff] %v5536_v5  ;;  %6136 = vst [vmem:[#allocation73_spill] sm:$0xff] %v5538_v15  ;;  %2544 = vrot.lane.b32.xlu1 %v5536_v5, %s3500_s17  ;;  %2542 = vrot.lane.b32.xlu0 %v5538_v15, %s3500_s17  ;;  %v6147_v5 = vld [vmem:[#allocation21_spill] sm:$0xff] }
 0x3ba   :  { %v5544_v42 = vpop.permute.xlu1 %2900  ;;  %v5546_v47 = vpop.permute.xlu0 %2898 }
 0x3bb   :  { %6137 = vst [vmem:[#allocation74_spill] sm:$0xff] %v5544_v42  ;;  %6138 = vst [vmem:[#allocation75_spill] sm:$0xff] %v5546_v47 }
 0x3be   :  { %v2325_v58 = vpop.permute.xlu1 %2324  ;;  %v2323_v34 = vpop.permute.xlu0 %2322 }
 0x3bf   :  { %v5550_v61 = vmul.f32 %v2325_v58, %v2169_v53  ;;  %v5552_v59 = vmul.f32 %v2323_v34, %v2168_v49  ;;  %v6143_v58 = vld [vmem:[#allocation2_spill] sm:$0xff] }
 0x3c0   :  { %v6144_v53 = vld [vmem:[#allocation18_spill] sm:$0xff] }
 0x3c1   :  { %6139 = vst [vmem:[#allocation76_spill] sm:$0xff] %v5550_v61  ;;  %6140 = vst [vmem:[#allocation77_spill] sm:$0xff] %v5552_v59  ;;  %2548 = vrot.lane.b32.xlu1 %v5550_v61, %s3500_s17  ;;  %2546 = vrot.lane.b32.xlu0 %v5552_v59, %s3500_s17  ;;  %v2399_v34 = vmul.f32 %v6144_v53, %v6143_v58  ;;  %v6146_v61 = vld [vmem:[#allocation3_spill] sm:$0xff]  ;;  %v2172_v53 = vmax.f32 %v5366_v6, 0.0  ;;  %v6154_v6 = vld [vmem:[#allocation5_spill] sm:$0xff] }
 0x3c2   :  { %v5558_v37 = vpop.permute.xlu1 %2904  ;;  %v5560_v44 = vpop.permute.xlu0 %2902  ;;  %v2398_v59 = vmul.f32 %v6147_v5, %v6146_v61 }
 0x3c3   :  { %6141 = vst [vmem:[#allocation78_spill] sm:$0xff] %v5558_v37  ;;  %6142 = vst [vmem:[#allocation79_spill] sm:$0xff] %v5560_v44  ;;  %v2431_v22 = vadd.f32 660.0, %v2399_v34  ;;  %v6151_v34 = vld [vmem:[#allocation4_spill] sm:$0xff] }
 0x3c4   :  { %v2430_v46 = vadd.f32 660.0, %v2398_v59 }
 0x3c6   :  { %v2329_v47 = vpop.permute.xlu1 %2328  ;;  %v2327_v42 = vpop.permute.xlu0 %2326 }
 0x3c7   :  { %v5566_v49 = vmul.f32 %v2329_v47, %v2171_v1  ;;  %v5568_v15 = vmul.f32 %v2327_v42, %v2170_v14  ;;  %v2173_v42 = vmax.f32 %v5364_v36, 0.0  ;;  %v6149_v1 = vld [vmem:[#allocation22_spill] sm:$0xff] }
 0x3c8   :  { %v2401_v5 = vmul.f32 %v6149_v1, %v4456_v62 }
 0x3c9   :  { %6145 = vst [vmem:[#allocation2_spill] sm:$0xff] %v5568_v15  ;;  %2552 = vrot.lane.b32.xlu1 %v5566_v49, %s3500_s17  ;;  %2550 = vrot.lane.b32.xlu0 %v5568_v15, %s3500_s17 }
 0x3ca   :  { %v5576_v13 = vpop.permute.xlu0 %2906 }
 0x3cb   :  { %6148 = vst [vmem:[#allocation18_spill] sm:$0xff] %v5576_v13  ;;  %v2497_v44 = vpop.permute.xlu1 %2496  ;;  %v6152_v13 = vld [vmem:[#allocation26_spill] sm:$0xff] }
 0x3cc   :  { %v2591_v37 = vsub.f32 %v2431_v22, %v2497_v44  ;;  %v2400_v44 = vmul.f32 %v6152_v13, %v6151_v34  ;;  %v6156_v13 = vld [vmem:[#allocation6_spill] sm:$0xff] }
 0x3ce   :  { %2656 = vrot.lane.b32.xlu1 %v2591_v37, %s3497_s15  ;;  %v2495_v47 = vpop.permute.xlu0 %2494  ;;  %v2433_v37 = vadd.f32 660.0, %v2401_v5 }
 0x3cf   :  { %v2590_v61 = vsub.f32 %v2430_v46, %v2495_v47  ;;  %v2333_v14 = vpop.permute.xlu1 %2332  ;;  %v2432_v46 = vadd.f32 660.0, %v2400_v44  ;;  %v6158_v44 = vld [vmem:[#allocation7_spill] sm:$0xff] }
 0x3d0   :  { %v5582_v58 = vmul.f32 %v2333_v14, %v2173_v42  ;;  %v6155_v42 = vld [vmem:[#allocation28_spill] sm:$0xff] }
 0x3d1   :  { %2654 = vrot.lane.b32.xlu0 %v2590_v61, %s3497_s15  ;;  %v2403_v1 = vmul.f32 %v6155_v42, %v6154_v6  ;;  %v6157_v61 = vld [vmem:[#allocation29_spill] sm:$0xff]  ;;  %v6160_v6 = vld [vmem:[#allocation8_spill] sm:$0xff]  ;;  %v6161_v42 = vld [vmem:[#allocation35_spill] sm:$0xff] }
 0x3d2   :  { %6150 = vst [vmem:[#allocation3_spill] sm:$0xff] %v5582_v58  ;;  %2556 = vrot.lane.b32.xlu1 %v5582_v58, %s3500_s17  ;;  %v2331_v59 = vpop.permute.xlu0 %2330  ;;  %v2402_v14 = vmul.f32 %v6157_v61, %v6156_v13  ;;  %v2404_v15 = vmul.f32 %v6161_v42, %v6160_v6  ;;  %v6166_v42 = vld [vmem:[#allocation11_spill] sm:$0xff] }
 0x3d3   :  { %v5590_v36 = vmul.f32 %v2331_v59, %v2172_v53  ;;  %v2501_v22 = vpop.permute.xlu1 %2500  ;;  %v2435_v5 = vadd.f32 660.0, %v2403_v1 }
 0x3d4   :  { %v2593_v62 = vsub.f32 %v2433_v37, %v2501_v22  ;;  %v2434_v53 = vadd.f32 660.0, %v2402_v14 }
 0x3d5   :  { %6153 = vst [vmem:[#allocation21_spill] sm:$0xff] %v5590_v36  ;;  %2554 = vrot.lane.b32.xlu0 %v5590_v36, %s3500_s17 }
 0x3d6   :  { %2660 = vrot.lane.b32.xlu1 %v2593_v62, %s3497_s15  ;;  %v2499_v47 = vpop.permute.xlu0 %2498  ;;  %v6159_v62 = vld [vmem:[#allocation34_spill] sm:$0xff] }
 0x3d7   :  { %v2592_v34 = vsub.f32 %v2432_v46, %v2499_v47  ;;  %v2405_v36 = vmul.f32 %v6159_v62, %v6158_v44  ;;  %v2436_v46 = vadd.f32 660.0, %v2404_v15 }
 0x3d9   :  { %2658 = vrot.lane.b32.xlu0 %v2592_v34, %s3497_s15  ;;  %v2437_v13 = vadd.f32 660.0, %v2405_v36  ;;  %v6162_v34 = vld [vmem:[#allocation9_spill] sm:$0xff] }
 0x3db   :  { %v2505_v59 = vpop.permute.xlu1 %2504  ;;  %v2503_v37 = vpop.permute.xlu0 %2502 }
 0x3dc   :  { %v2595_v22 = vsub.f32 %v2435_v5, %v2505_v59  ;;  %v2594_v58 = vsub.f32 %v2434_v53, %v2503_v37  ;;  %v6163_v5 = vld [vmem:[#allocation42_spill] sm:$0xff]  ;;  %v6165_v59 = vld [vmem:[#allocation43_spill] sm:$0xff] }
 0x3dd   :  { %v2407_v53 = vmul.f32 %v6163_v5, %v6162_v34 }
 0x3de   :  { %2664 = vrot.lane.b32.xlu1 %v2595_v22, %s3497_s15  ;;  %2662 = vrot.lane.b32.xlu0 %v2594_v58, %s3497_s15  ;;  %v6164_v58 = vld [vmem:[#allocation10_spill] sm:$0xff] }
 0x3df   :  { %v2406_v37 = vmul.f32 %v6165_v59, %v6164_v58  ;;  %v2439_v22 = vadd.f32 660.0, %v2407_v53 }
 0x3e1   :  { %v2438_v44 = vadd.f32 660.0, %v2406_v37  ;;  %v2411_v37 = vmul.f32 %v6076_v32, %v4560_v25 }
 0x3e3   :  { %v2509_v47 = vpop.permute.xlu1 %2508  ;;  %v2507_v61 = vpop.permute.xlu0 %2506 }
 0x3e4   :  { %v2597_v1 = vsub.f32 %v2437_v13, %v2509_v47  ;;  %v2596_v14 = vsub.f32 %v2436_v46, %v2507_v61  ;;  %v6167_v13 = vld [vmem:[#allocation52_spill] sm:$0xff]  ;;  %v6169_v61 = vld [vmem:[#allocation53_spill] sm:$0xff] }
 0x3e5   :  { %v2409_v46 = vmul.f32 %v6167_v13, %v6166_v42  ;;  %v6168_v47 = vld [vmem:[#allocation12_spill] sm:$0xff] }
 0x3e6   :  { %2668 = vrot.lane.b32.xlu1 %v2597_v1, %s3497_s15  ;;  %2666 = vrot.lane.b32.xlu0 %v2596_v14, %s3497_s15  ;;  %v2408_v1 = vmul.f32 %v6169_v61, %v6168_v47  ;;  %v6172_v47 = vld [vmem:[#allocation61_spill] sm:$0xff] }
 0x3e7   :  { %v2441_v14 = vadd.f32 660.0, %v2409_v46  ;;  %v6171_v46 = vld [vmem:[#allocation13_spill] sm:$0xff] }
 0x3e8   :  { %v2440_v34 = vadd.f32 660.0, %v2408_v1  ;;  %v2413_v61 = vmul.f32 %v6172_v47, %v6171_v46  ;;  %v6173_v1 = vld [vmem:[#allocation62_spill] sm:$0xff]  ;;  %v2416_v46 = vmul.f32 %v5067_v8, %v6073_v2 }
 0x3ea   :  { %v2445_v25 = vadd.f32 660.0, %v2413_v61  ;;  %v2448_v47 = vadd.f32 660.0, %v2416_v46  ;;  %v6183_v46 = vld [vmem:[#allocation32_spill] sm:$0xff] }
 0x3eb   :  { %v2513_v62 = vpop.permute.xlu1 %2512  ;;  %v2511_v6 = vpop.permute.xlu0 %2510 }
 0x3ec   :  { %v2599_v36 = vsub.f32 %v2439_v22, %v2513_v62  ;;  %v2598_v15 = vsub.f32 %v2438_v44, %v2511_v6  ;;  %v6170_v22 = vld [vmem:[#allocation58_spill] sm:$0xff]  ;;  %v2443_v62 = vadd.f32 660.0, %v2411_v37  ;;  %v6175_v37 = vld [vmem:[#allocation15_spill] sm:$0xff] }
 0x3ed   :  { %v2410_v44 = vmul.f32 %v6170_v22, %v4563_v51  ;;  %v6176_v22 = vld [vmem:[#allocation64_spill] sm:$0xff] }
 0x3ee   :  { %2672 = vrot.lane.b32.xlu1 %v2599_v36, %s3497_s15  ;;  %2670 = vrot.lane.b32.xlu0 %v2598_v15, %s3497_s15 }
 0x3ef   :  { %v2442_v6 = vadd.f32 660.0, %v2410_v44  ;;  %v2414_v44 = vmul.f32 %v6176_v22, %v6175_v37  ;;  %v6180_v37 = vld [vmem:[#allocation50_spill] sm:$0xff] }
 0x3f0   :  { %v2421_v22 = vmul.f32 %v6180_v37, %v6082_v18 }
 0x3f3   :  { %v2517_v5 = vpop.permute.xlu1 %2516  ;;  %v2515_v58 = vpop.permute.xlu0 %2514 }
 0x3f4   :  { %v2601_v53 = vsub.f32 %v2441_v14, %v2517_v5  ;;  %v2600_v59 = vsub.f32 %v2440_v34, %v2515_v58  ;;  %v2412_v14 = vmul.f32 %v6173_v1, %v4583_v19 }
 0x3f6   :  { %2676 = vrot.lane.b32.xlu1 %v2601_v53, %s3497_s15  ;;  %2674 = vrot.lane.b32.xlu0 %v2600_v59, %s3497_s15  ;;  %v2444_v32 = vadd.f32 660.0, %v2412_v14  ;;  %v6174_v53 = vld [vmem:[#allocation63_spill] sm:$0xff] }
 0x3f7   :  { %v2415_v59 = vmul.f32 %v6174_v53, %v6067_v11 }
 0x3fb   :  { %v2521_v36 = vpop.permute.xlu1 %2520  ;;  %v2519_v15 = vpop.permute.xlu0 %2518 }
 0x3fc   :  { %v2603_v42 = vsub.f32 %v2443_v62, %v2521_v36  ;;  %v2602_v13 = vsub.f32 %v2442_v6, %v2519_v15  ;;  %v2447_v62 = vadd.f32 660.0, %v2415_v59  ;;  %v2446_v6 = vadd.f32 660.0, %v2414_v44  ;;  %v6181_v44 = vld [vmem:[#allocation25_spill] sm:$0xff] }
 0x3fe   :  { %2680 = vrot.lane.b32.xlu1 %v2603_v42, %s3497_s15  ;;  %2678 = vrot.lane.b32.xlu0 %v2602_v13, %s3497_s15  ;;  %v2417_v13 = vmul.f32 %v5065_v12, %v6072_v45 }
 0x400   :  { %v2449_v11 = vadd.f32 660.0, %v2417_v13 }
 0x403   :  { %v2525_v34 = vpop.permute.xlu1 %2524  ;;  %v2523_v51 = vpop.permute.xlu0 %2522 }
 0x404   :  { %v2605_v5 = vsub.f32 %v2445_v25, %v2525_v34  ;;  %v2604_v58 = vsub.f32 %v2444_v32, %v2523_v51  ;;  %v6177_v32 = vld [vmem:[#allocation40_spill] sm:$0xff] }
 0x405   :  { %v2419_v34 = vmul.f32 %v6177_v32, %v6078_v33  ;;  %v6178_v51 = vld [vmem:[#allocation20_spill] sm:$0xff]  ;;  %v2453_v33 = vadd.f32 660.0, %v2421_v22  ;;  %v2427_v22 = vmul.f32 %v5297_v10, %v6090_v29 }
 0x406   :  { %2684 = vrot.lane.b32.xlu1 %v2605_v5, %s3497_s15  ;;  %2682 = vrot.lane.b32.xlu0 %v2604_v58, %s3497_s15  ;;  %v6179_v5 = vld [vmem:[#allocation41_spill] sm:$0xff] }
 0x407   :  { %v2418_v58 = vmul.f32 %v6179_v5, %v6178_v51  ;;  %v2451_v12 = vadd.f32 660.0, %v2419_v34 }
 0x409   :  { %v2450_v45 = vadd.f32 660.0, %v2418_v58  ;;  %v2425_v58 = vmul.f32 %v5261_v27, %v6088_v9  ;;  %v2459_v27 = vadd.f32 660.0, %v2427_v22 }
 0x40b   :  { %v2529_v36 = vpop.permute.xlu1 %2528  ;;  %v2527_v19 = vpop.permute.xlu0 %2526 }
 0x40c   :  { %v2607_v15 = vsub.f32 %v2447_v62, %v2529_v36  ;;  %v2606_v42 = vsub.f32 %v2446_v6, %v2527_v19  ;;  %v6182_v62 = vld [vmem:[#allocation51_spill] sm:$0xff] }
 0x40d   :  { %v2420_v6 = vmul.f32 %v6182_v62, %v6181_v44  ;;  %v2426_v44 = vmul.f32 %v5299_v56, %v6091_v7 }
 0x40e   :  { %2688 = vrot.lane.b32.xlu1 %v2607_v15, %s3497_s15  ;;  %2686 = vrot.lane.b32.xlu0 %v2606_v42, %s3497_s15 }
 0x40f   :  { %v2452_v36 = vadd.f32 660.0, %v2420_v6  ;;  %v2458_v9 = vadd.f32 660.0, %v2426_v44 }
 0x413   :  { %v2533_v61 = vpop.permute.xlu1 %2532  ;;  %v2531_v1 = vpop.permute.xlu0 %2530 }
 0x414   :  { %v2609_v14 = vsub.f32 %v2449_v11, %v2533_v61  ;;  %v2608_v25 = vsub.f32 %v2448_v47, %v2531_v1  ;;  %v6184_v11 = vld [vmem:[#allocation14_spill] sm:$0xff]  ;;  %v6185_v61 = vld [vmem:[#allocation33_spill] sm:$0xff]  ;;  %v6186_v1 = vld [vmem:[#allocation48_spill] sm:$0xff] }
 0x415   :  { %v2423_v47 = vmul.f32 %v6184_v11, %v6183_v46 }
 0x416   :  { %2692 = vrot.lane.b32.xlu1 %v2609_v14, %s3497_s15  ;;  %2690 = vrot.lane.b32.xlu0 %v2608_v25, %s3497_s15  ;;  %v2422_v14 = vmul.f32 %v6186_v1, %v6185_v61  ;;  %v6189_v61 = vld [vmem:[#allocation19_spill] sm:$0xff] }
 0x417   :  { %v2455_v18 = vadd.f32 660.0, %v2423_v47 }
 0x418   :  { %v2454_v25 = vadd.f32 660.0, %v2422_v14 }
 0x41b   :  { %v2537_v53 = vpop.permute.xlu1 %2536  ;;  %v2535_v8 = vpop.permute.xlu0 %2534 }
 0x41c   :  { %v2611_v2 = vsub.f32 %v2451_v12, %v2537_v53  ;;  %v2610_v59 = vsub.f32 %v2450_v45, %v2535_v8  ;;  %v2424_v12 = vmul.f32 %v5263_v55, %v6089_v31  ;;  %v2457_v45 = vadd.f32 660.0, %v2425_v58 }
 0x41e   :  { %2696 = vrot.lane.b32.xlu1 %v2611_v2, %s3497_s15  ;;  %2694 = vrot.lane.b32.xlu0 %v2610_v59, %s3497_s15  ;;  %v2456_v53 = vadd.f32 660.0, %v2424_v12 }
 0x423   :  { %v2541_v19 = vpop.permute.xlu1 %2540  ;;  %v2539_v15 = vpop.permute.xlu0 %2538 }
 0x424   :  { %v2613_v42 = vsub.f32 %v2453_v33, %v2541_v19  ;;  %v2612_v13 = vsub.f32 %v2452_v36, %v2539_v15  ;;  %v6187_v33 = vld [vmem:[#allocation17_spill] sm:$0xff] }
 0x425   :  { %v2429_v36 = vmul.f32 %v6187_v33, %v6097_v16  ;;  %v6188_v15 = vld [vmem:[#allocation57_spill] sm:$0xff]  ;;  %v1629_v46 = vmax.f32 %v6097_v16, %v6187_v33 }
 0x426   :  { %2700 = vrot.lane.b32.xlu1 %v2613_v42, %s3497_s15  ;;  %2698 = vrot.lane.b32.xlu0 %v2612_v13, %s3497_s15  ;;  %v2428_v29 = vmul.f32 %v6188_v15, %v4893_v30 }
 0x427   :  { %v2461_v42 = vadd.f32 660.0, %v2429_v36  ;;  %v1757_v1 = vmax.f32 %v1629_v46, %v6189_v61  ;;  %v6194_v46 = vld [vmem:[#allocation24_spill] sm:$0xff] }
 0x428   :  { %v2460_v13 = vadd.f32 660.0, %v2428_v29 }
 0x42b   :  { %v2545_v32 = vpop.permute.xlu1 %2544  ;;  %v2543_v34 = vpop.permute.xlu0 %2542 }
 0x42c   :  { %v2615_v51 = vsub.f32 %v2455_v18, %v2545_v32  ;;  %v2614_v5 = vsub.f32 %v2454_v25, %v2543_v34 }
 0x42e   :  { %2704 = vrot.lane.b32.xlu1 %v2615_v51, %s3497_s15  ;;  %2702 = vrot.lane.b32.xlu0 %v2614_v5, %s3497_s15 }
 0x433   :  { %v2549_v8 = vpop.permute.xlu1 %2548  ;;  %v2547_v2 = vpop.permute.xlu0 %2546 }
 0x434   :  { %v2617_v59 = vsub.f32 %v2457_v45, %v2549_v8  ;;  %v2616_v37 = vsub.f32 %v2456_v53, %v2547_v2  ;;  %v6190_v53 = vld [vmem:[#allocation16_spill] sm:$0xff] }
 0x436   :  { %2708 = vrot.lane.b32.xlu1 %v2617_v59, %s3497_s15  ;;  %2706 = vrot.lane.b32.xlu0 %v2616_v37, %s3497_s15 }
 0x43b   :  { %v2553_v62 = vpop.permute.xlu1 %2552  ;;  %v2551_v55 = vpop.permute.xlu0 %2550 }
 0x43c   :  { %v2619_v31 = vsub.f32 %v2459_v27, %v2553_v62  ;;  %v2618_v6 = vsub.f32 %v2458_v9, %v2551_v55 }
 0x43e   :  { %2712 = vrot.lane.b32.xlu1 %v2619_v31, %s3497_s15  ;;  %2710 = vrot.lane.b32.xlu0 %v2618_v6, %s3497_s15  ;;  %v6191_v31 = vld [vmem:[#allocation49_spill] sm:$0xff] }
 0x440   :  { %v2657_v19 = vpop.permute.xlu1 %2656 }
 0x443   :  { %v2655_v10 = vpop.permute.xlu0 %2654 }
 0x444   :  { %v2557_v56 = vpop.permute.xlu1 %2556  ;;  %3433 = vrcp.f32 %v2655_v10  ;;  %v6193_v10 = vld [vmem:[#allocation56_spill] sm:$0xff] }
 0x445   :  { %v2621_v7 = vsub.f32 %v2461_v42, %v2557_v56 }
 0x447   :  { %2716 = vrot.lane.b32.xlu1 %v2621_v7, %s3497_s15  ;;  %v2555_v11 = vpop.permute.xlu0 %2554 }
 0x448   :  { %v2620_v47 = vsub.f32 %v2460_v13, %v2555_v11  ;;  %v2661_v30 = vpop.permute.xlu1 %2660 }
 0x449   :  { %3435 = vrcp.f32 %v2661_v30 }
 0x44a   :  { %2714 = vrot.lane.b32.xlu0 %v2620_v47, %s3497_s15  ;;  %3437 = vrcp.f32 %v2657_v19  ;;  %v6195_v47 = vld [vmem:[#allocation47_spill] sm:$0xff] }
 0x44b   :  { %2908 = vrot.lane.b32.xlu1 %v1757_v1, %s3499_s5  ;;  %v2659_v14 = vpop.permute.xlu0 %2658  ;;  %v6196_v1 = vld [vmem:[#allocation46_spill] sm:$0xff] }
 0x44c   :  { %3439 = vrcp.f32 %v2659_v14 }
 0x450   :  { %v2663_v18 = vpop.permute.xlu0 %2662  ;;  %v2665_v25 = vpop.permute.xlu1 %2664 }
 0x451   :  { %3441 = vrcp.f32 %v2663_v18  ;;  %v3434_v32 = vpop.eup %3433 }
 0x452   :  { %3443 = vrcp.f32 %v2665_v25  ;;  %v2751_v5 = vmul.f32 %v3434_v32, %v5370_v38  ;;  %v6197_v25 = vld [vmem:[#allocation39_spill] sm:$0xff] }
 0x454   :  { %v2942_v8 = vmul.f32 %v6190_v53, %v2751_v5  ;;  %v6198_v5 = vld [vmem:[#allocation27_spill] sm:$0xff] }
 0x456   :  { %v3436_v58 = vpop.eup %3435  ;;  %v2975_v9 = vsel %vm2974_vm1, %v2942_v8, -inf }
 0x457   :  { %v3438_v45 = vpop.eup %3437  ;;  %v2757_v2 = vmul.f32 %v3436_v58, %v5380_v3 }
 0x458   :  { %v2667_v16 = vpop.permute.xlu0 %2666  ;;  %v2669_v34 = vpop.permute.xlu1 %2668  ;;  %v2753_v37 = vmul.f32 %v3438_v45, %v5360_v39 }
 0x459   :  { %3445 = vrcp.f32 %v2667_v16  ;;  %v3440_v59 = vpop.eup %3439  ;;  %v2945_v38 = vmul.f32 %v5372_v0, %v2757_v2 }
 0x45a   :  { %3447 = vrcp.f32 %v2669_v34  ;;  %v2755_v62 = vmul.f32 %v3440_v59, %v5386_v43  ;;  %v2943_v6 = vmul.f32 %v6191_v31, %v2753_v37  ;;  %v6192_v43 = vld [vmem:[#allocation38_spill] sm:$0xff] }
 0x45b   :  { %v2984_v39 = vsel %vm2974_vm1, %v2945_v38, -inf }
 0x45c   :  { %v2944_v36 = vmul.f32 %v5374_v52, %v2755_v62  ;;  %v2978_v0 = vsel %vm2974_vm1, %v2943_v6, -inf }
 0x45e   :  { %v3442_v22 = vpop.eup %3441 }
 0x45f   :  { %v3444_v55 = vpop.eup %3443  ;;  %v2759_v3 = vmul.f32 %v3442_v22, %v5398_v40  ;;  %v2981_v40 = vsel %vm2974_vm1, %v2944_v36, -inf  ;;  %v6200_v22 = vld [vmem:[#allocation31_spill] sm:$0xff] }
 0x460   :  { %v2671_v51 = vpop.permute.xlu0 %2670  ;;  %v2673_v12 = vpop.permute.xlu1 %2672  ;;  %v2761_v19 = vmul.f32 %v3444_v55, %v5396_v21 }
 0x461   :  { %3449 = vrcp.f32 %v2671_v51  ;;  %v2946_v29 = vmul.f32 %v6192_v43, %v2759_v3 }
 0x462   :  { %3451 = vrcp.f32 %v2673_v12  ;;  %v2947_v11 = vmul.f32 %v6194_v46, %v2761_v19  ;;  %v6203_v19 = vld [vmem:[#allocation37_spill] sm:$0xff] }
 0x463   :  { %v2987_v21 = vsel %vm2974_vm1, %v2946_v29, -inf }
 0x464   :  { %v2990_v18 = vsel %vm2974_vm1, %v2947_v11, -inf }
 0x466   :  { %v3446_v33 = vpop.eup %3445 }
 0x467   :  { %v3448_v15 = vpop.eup %3447  ;;  %v2763_v42 = vmul.f32 %v3446_v33, %v6193_v10 }
 0x468   :  { %v2677_v44 = vpop.permute.xlu1 %2676  ;;  %v2675_v27 = vpop.permute.xlu0 %2674  ;;  %v2765_v52 = vmul.f32 %v3448_v15, %v6195_v47 }
 0x469   :  { %3453 = vrcp.f32 %v2677_v44  ;;  %2976 = vmax.xlane.f32.xlu0 %v2975_v9  ;;  %v2948_v30 = vmul.f32 %v6196_v1, %v2763_v42  ;;  %v6201_v9 = vld [vmem:[#allocation30_spill] sm:$0xff] }
 0x46a   :  { %3455 = vrcp.f32 %v2675_v27  ;;  %v2949_v16 = vmul.f32 %v6197_v25, %v2765_v52 }
 0x46b   :  { %v2993_v51 = vsel %vm2974_vm1, %v2948_v30, -inf  ;;  %v6206_v30 = vld [vmem:[#allocation54_spill] sm:$0xff] }
 0x46c   :  { %v2996_v8 = vsel %vm2974_vm1, %v2949_v16, -inf }
 0x46d   :  { %2985 = vmax.xlane.f32.xlu0 %v2984_v39  ;;  %v6202_v39 = vld [vmem:[#allocation36_spill] sm:$0xff] }
 0x46e   :  { %v3450_v56 = vpop.eup %3449 }
 0x46f   :  { %2979 = vmax.xlane.f32.xlu1 %v2978_v0  ;;  %v3452_v61 = vpop.eup %3451  ;;  %v2767_v14 = vmul.f32 %v3450_v56, %v5426_v26  ;;  %v6199_v26 = vld [vmem:[#allocation23_spill] sm:$0xff] }
 0x470   :  { %v2681_v7 = vpop.permute.xlu1 %2680  ;;  %v2679_v13 = vpop.permute.xlu0 %2678  ;;  %v2769_v32 = vmul.f32 %v3452_v61, %v5424_v35 }
 0x471   :  { %3457 = vrcp.f32 %v2681_v7  ;;  %2982 = vmax.xlane.f32.xlu0 %v2981_v40  ;;  %v2950_v58 = vmul.f32 %v6198_v5, %v2767_v14  ;;  %v6204_v7 = vld [vmem:[#allocation44_spill] sm:$0xff]  ;;  %v6205_v40 = vld [vmem:[#allocation45_spill] sm:$0xff] }
 0x472   :  { %3459 = vrcp.f32 %v2679_v13  ;;  %v2951_v2 = vmul.f32 %v6199_v26, %v2769_v32 }
 0x473   :  { %2988 = vmax.xlane.f32.xlu1 %v2987_v21  ;;  %v2999_v35 = vsel %vm2974_vm1, %v2950_v58, -inf }
 0x474   :  { %v3002_v27 = vsel %vm2974_vm1, %v2951_v2, -inf }
 0x475   :  { %2991 = vmax.xlane.f32.xlu0 %v2990_v18  ;;  %v6207_v18 = vld [vmem:[#allocation55_spill] sm:$0xff] }
 0x476   :  { %v3454_v34 = vpop.eup %3453 }
 0x477   :  { %v3456_v12 = vpop.eup %3455  ;;  %2994 = vmax.xlane.f32.xlu1 %v2993_v51  ;;  %v2773_v37 = vmul.f32 %v3454_v34, %v5438_v60 }
 0x478   :  { %v2685_v45 = vpop.permute.xlu1 %2684  ;;  %v2683_v53 = vpop.permute.xlu0 %2682  ;;  %v2771_v59 = vmul.f32 %v3456_v12, %v5440_v24  ;;  %v6208_v12 = vld [vmem:[#allocation59_spill] sm:$0xff] }
 0x479   :  { %3461 = vrcp.f32 %v2685_v45  ;;  %2997 = vmax.xlane.f32.xlu0 %v2996_v8  ;;  %v2953_v38 = vmul.f32 %v6201_v9, %v2773_v37  ;;  %v6211_v9 = vld [vmem:[#allocation66_spill] sm:$0xff] }
 0x47a   :  { %3463 = vrcp.f32 %v2683_v53  ;;  %v2952_v44 = vmul.f32 %v6200_v22, %v2771_v59  ;;  %v6209_v53 = vld [vmem:[#allocation60_spill] sm:$0xff] }
 0x47b   :  { %3000 = vmax.xlane.f32.xlu1 %v2999_v35  ;;  %v3008_v3 = vsel %vm2974_vm1, %v2953_v38, -inf }
 0x47c   :  { %v3005_v55 = vsel %vm2974_vm1, %v2952_v44, -inf  ;;  %v6210_v44 = vld [vmem:[#allocation65_spill] sm:$0xff] }
 0x47d   :  { %3003 = vmax.xlane.f32.xlu0 %v3002_v27 }
 0x47e   :  { %v3458_v62 = vpop.eup %3457 }
 0x47f   :  { %v3460_v31 = vpop.eup %3459  ;;  %3006 = vmax.xlane.f32.xlu1 %v3005_v55  ;;  %v2777_v60 = vmul.f32 %v3458_v62, %v5452_v4 }
 0x480   :  { %v2689_v24 = vpop.permute.xlu1 %2688  ;;  %v2687_v6 = vpop.permute.xlu0 %2686  ;;  %v2775_v33 = vmul.f32 %v3460_v31, %v5454_v48 }
 0x481   :  { %3465 = vrcp.f32 %v2689_v24  ;;  %3009 = vmax.xlane.f32.xlu0 %v3008_v3  ;;  %v2955_v36 = vmul.f32 %v6202_v39, %v2777_v60  ;;  %v6212_v3 = vld [vmem:[#allocation69_spill] sm:$0xff] }
 0x482   :  { %3467 = vrcp.f32 %v2687_v6  ;;  %v2954_v15 = vmul.f32 %v6203_v19, %v2775_v33  ;;  %v6213_v33 = vld [vmem:[#allocation67_spill] sm:$0xff] }
 0x483   :  { %v3014_v0 = vsel %vm2974_vm1, %v2955_v36, -inf  ;;  %v6214_v36 = vld [vmem:[#allocation68_spill] sm:$0xff] }
 0x484   :  { %v3011_v43 = vsel %vm2974_vm1, %v2954_v15, -inf }
 0x485   :  { %3012 = vmax.xlane.f32.xlu1 %v3011_v43  ;;  %3015 = vmax.xlane.f32.xlu0 %v3014_v0 }
 0x486   :  { %v3462_v4 = vpop.eup %3461 }
 0x487   :  { %v3464_v29 = vpop.eup %3463  ;;  %v2781_v10 = vmul.f32 %v3462_v4, %v5466_v50 }
 0x488   :  { %v2693_v42 = vpop.permute.xlu1 %2692  ;;  %v2691_v56 = vpop.permute.xlu0 %2690  ;;  %v2779_v48 = vmul.f32 %v3464_v29, %v5468_v57  ;;  %v6215_v29 = vld [vmem:[#allocation72_spill] sm:$0xff] }
 0x489   :  { %3469 = vrcp.f32 %v2693_v42  ;;  %v2957_v13 = vmul.f32 %v6204_v7, %v2781_v10  ;;  %v6217_v7 = vld [vmem:[#allocation70_spill] sm:$0xff] }
 0x48a   :  { %3471 = vrcp.f32 %v2691_v56  ;;  %v2956_v46 = vmul.f32 %v6205_v40, %v2779_v48  ;;  %v6216_v56 = vld [vmem:[#allocation73_spill] sm:$0xff]  ;;  %v6218_v40 = vld [vmem:[#allocation71_spill] sm:$0xff] }
 0x48b   :  { %v3020_v11 = vsel %vm2974_vm1, %v2957_v13, -inf }
 0x48c   :  { %3021 = vmax.xlane.f32.xlu0 %v3020_v11  ;;  %v3017_v47 = vsel %vm2974_vm1, %v2956_v46, -inf }
 0x48d   :  { %3018 = vmax.xlane.f32.xlu1 %v3017_v47 }
 0x48e   :  { %v3466_v52 = vpop.eup %3465 }
 0x48f   :  { %v3468_v61 = vpop.eup %3467  ;;  %v2785_v50 = vmul.f32 %v3466_v52, %v5480_v17 }
 0x490   :  { %v2697_v21 = vpop.permute.xlu1 %2696  ;;  %v2695_v1 = vpop.permute.xlu0 %2694  ;;  %v2783_v57 = vmul.f32 %v3468_v61, %v5482_v41 }
 0x491   :  { %3473 = vrcp.f32 %v2697_v21  ;;  %v2959_v14 = vmul.f32 %v6206_v30, %v2785_v50  ;;  %v6219_v50 = vld [vmem:[#allocation76_spill] sm:$0xff] }
 0x492   :  { %3475 = vrcp.f32 %v2695_v1  ;;  %v2958_v25 = vmul.f32 %v6207_v18, %v2783_v57  ;;  %v6220_v1 = vld [vmem:[#allocation77_spill] sm:$0xff] }
 0x493   :  { %v3026_v16 = vsel %vm2974_vm1, %v2959_v14, -inf  ;;  %v6221_v14 = vld [vmem:[#allocation74_spill] sm:$0xff] }
 0x494   :  { %3027 = vmax.xlane.f32.xlu0 %v3026_v16  ;;  %v3023_v32 = vsel %vm2974_vm1, %v2958_v25, -inf  ;;  %v6222_v25 = vld [vmem:[#allocation75_spill] sm:$0xff] }
 0x495   :  { %3024 = vmax.xlane.f32.xlu1 %v3023_v32 }
 0x496   :  { %v3470_v34 = vpop.eup %3469 }
 0x497   :  { %v3472_v51 = vpop.eup %3471  ;;  %v2789_v17 = vmul.f32 %v3470_v34, %v5494_v28 }
 0x498   :  { %v2701_v5 = vpop.permute.xlu1 %2700  ;;  %v2699_v58 = vpop.permute.xlu0 %2698  ;;  %v2787_v41 = vmul.f32 %v3472_v51, %v5496_v23 }
 0x499   :  { %3477 = vrcp.f32 %v2701_v5  ;;  %v2961_v45 = vmul.f32 %v6208_v12, %v2789_v17 }
 0x49a   :  { %3479 = vrcp.f32 %v2699_v58  ;;  %v2960_v8 = vmul.f32 %v6209_v53, %v2787_v41  ;;  %v6223_v41 = vld [vmem:[#allocation2_spill] sm:$0xff] }
 0x49b   :  { %v3032_v26 = vsel %vm2974_vm1, %v2961_v45, -inf  ;;  %v6224_v45 = vld [vmem:[#allocation78_spill] sm:$0xff] }
 0x49c   :  { %3033 = vmax.xlane.f32.xlu0 %v3032_v26  ;;  %v3029_v2 = vsel %vm2974_vm1, %v2960_v8, -inf  ;;  %v6225_v8 = vld [vmem:[#allocation79_spill] sm:$0xff] }
 0x49d   :  { %3030 = vmax.xlane.f32.xlu1 %v3029_v2 }
 0x49e   :  { %v3474_v59 = vpop.eup %3473 }
 0x49f   :  { %v3476_v37 = vpop.eup %3475  ;;  %v2793_v28 = vmul.f32 %v3474_v59, %v5508_v20 }
 0x4a0   :  { %v2705_v35 = vpop.permute.xlu1 %2704  ;;  %v2703_v22 = vpop.permute.xlu0 %2702  ;;  %v2791_v23 = vmul.f32 %v3476_v37, %v5510_v54 }
 0x4a1   :  { %3481 = vrcp.f32 %v2705_v35  ;;  %v2963_v27 = vmul.f32 %v6210_v44, %v2793_v28  ;;  %v6226_v28 = vld [vmem:[#allocation3_spill] sm:$0xff] }
 0x4a2   :  { %3483 = vrcp.f32 %v2703_v22  ;;  %v2962_v38 = vmul.f32 %v6211_v9, %v2791_v23 }
 0x4a3   :  { %v3038_v62 = vsel %vm2974_vm1, %v2963_v27, -inf  ;;  %v6227_v27 = vld [vmem:[#allocation21_spill] sm:$0xff] }
 0x4a4   :  { %3039 = vmax.xlane.f32.xlu0 %v3038_v62  ;;  %v3035_v55 = vsel %vm2974_vm1, %v2962_v38, -inf  ;;  %v6228_v38 = vld [vmem:[#allocation18_spill] sm:$0xff] }
 0x4a5   :  { %3036 = vmax.xlane.f32.xlu1 %v3035_v55 }
 0x4a6   :  { %v3478_v31 = vpop.eup %3477 }
 0x4a7   :  { %v3480_v60 = vpop.eup %3479  ;;  %v2797_v20 = vmul.f32 %v3478_v31, %v5522_v63 }
 0x4a8   :  { %v2709_v24 = vpop.permute.xlu1 %2708  ;;  %v2707_v6 = vpop.permute.xlu0 %2706  ;;  %v2795_v54 = vmul.f32 %v3480_v60, %v6212_v3 }
 0x4a9   :  { %3485 = vrcp.f32 %v2709_v24  ;;  %v2965_v39 = vmul.f32 %v6213_v33, %v2797_v20 }
 0x4aa   :  { %3487 = vrcp.f32 %v2707_v6  ;;  %v2964_v19 = vmul.f32 %v6214_v36, %v2795_v54 }
 0x4ab   :  { %v3044_v15 = vsel %vm2974_vm1, %v2965_v39, -inf }
 0x4ac   :  { %3045 = vmax.xlane.f32.xlu0 %v3044_v15  ;;  %v3041_v0 = vsel %vm2974_vm1, %v2964_v19, -inf }
 0x4ad   :  { %3042 = vmax.xlane.f32.xlu1 %v3041_v0 }
 0x4ae   :  { %v3482_v43 = vpop.eup %3481 }
 0x4af   :  { %v3484_v4 = vpop.eup %3483  ;;  %v2801_v63 = vmul.f32 %v3482_v43, %v6215_v29 }
 0x4b0   :  { %v2713_v10 = vpop.permute.xlu1 %2712  ;;  %v2711_v42 = vpop.permute.xlu0 %2710  ;;  %v2799_v48 = vmul.f32 %v3484_v4, %v6216_v56 }
 0x4b1   :  { %3489 = vrcp.f32 %v2713_v10  ;;  %v2967_v13 = vmul.f32 %v6217_v7, %v2801_v63 }
 0x4b2   :  { %3491 = vrcp.f32 %v2711_v42  ;;  %v2966_v46 = vmul.f32 %v6218_v40, %v2799_v48 }
 0x4b3   :  { %v3050_v11 = vsel %vm2974_vm1, %v2967_v13, -inf }
 0x4b4   :  { %3051 = vmax.xlane.f32.xlu0 %v3050_v11  ;;  %v3047_v47 = vsel %vm2974_vm1, %v2966_v46, -inf }
 0x4b5   :  { %3048 = vmax.xlane.f32.xlu1 %v3047_v47 }
 0x4b6   :  { %v3486_v52 = vpop.eup %3485 }
 0x4b7   :  { %v3488_v61 = vpop.eup %3487  ;;  %v2805_v21 = vmul.f32 %v3486_v52, %v6219_v50 }
 0x4b8   :  { %v2803_v57 = vmul.f32 %v3488_v61, %v6220_v1 }
 0x4b9   :  { %v2717_v30 = vpop.permute.xlu1 %2716  ;;  %v2969_v18 = vmul.f32 %v6221_v14, %v2805_v21 }
 0x4ba   :  { %3493 = vrcp.f32 %v2717_v30  ;;  %v2968_v16 = vmul.f32 %v6222_v25, %v2803_v57 }
 0x4bb   :  { %v3056_v32 = vsel %vm2974_vm1, %v2969_v18, -inf }
 0x4bc   :  { %3057 = vmax.xlane.f32.xlu0 %v3056_v32  ;;  %v3053_v34 = vsel %vm2974_vm1, %v2968_v16, -inf  ;;  %v2715_v51 = vpop.permute.xlu0 %2714 }
 0x4bd   :  { %3054 = vmax.xlane.f32.xlu1 %v3053_v34  ;;  %3495 = vrcp.f32 %v2715_v51  ;;  %v2909_v22 = vpop.permute.xlu1 %2908 }
 0x4be   :  { %v3490_v17 = vpop.eup %3489 }
 0x4bf   :  { %v3492_v5 = vpop.eup %3491  ;;  %v2809_v58 = vmul.f32 %v3490_v17, %v5566_v49 }
 0x4c0   :  { %v2807_v12 = vmul.f32 %v3492_v5, %v6223_v41 }
 0x4c1   :  { %v2971_v53 = vmul.f32 %v6224_v45, %v2809_v58 }
 0x4c2   :  { %v2970_v26 = vmul.f32 %v6225_v8, %v2807_v12 }
 0x4c3   :  { %v3062_v2 = vsel %vm2974_vm1, %v2971_v53, -inf }
 0x4c4   :  { %3063 = vmax.xlane.f32.xlu0 %v3062_v2  ;;  %v3059_v59 = vsel %vm2974_vm1, %v2970_v26, -inf }
 0x4c5   :  { %3060 = vmax.xlane.f32.xlu1 %v3059_v59 }
 0x4c7   :  { %v3494_v37 = vpop.eup %3493 }
 0x4c8   :  { %v2813_v35 = vmul.f32 %v3494_v37, %v6226_v28 }
 0x4ca   :  { %v3496_v23 = vpop.eup %3495  ;;  %v2973_v44 = vmul.f32 %v2909_v22, %v2813_v35 }
 0x4cb   :  { %v2811_v49 = vmul.f32 %v3496_v23, %v6227_v27 }
 0x4cc   :  { %v3068_v9 = vsel %vm2974_vm1, %v2973_v44, -inf }
 0x4cd   :  { %3069 = vmax.xlane.f32.xlu0 %v3068_v9  ;;  %v2972_v62 = vmul.f32 %v6228_v38, %v2811_v49 }
 0x4cf   :  { %v3065_v55 = vsel %vm2974_vm1, %v2972_v62, -inf }
 0x4d0   :  { %3066 = vmax.xlane.f32.xlu1 %v3065_v55 }
 0x4f2   :  { %v2977_v31 = vpop.xlane.xlu0 %2976 }
 0x4f3   :  { %3072 = vst.msk [vmem:[%s5913_s6] sm:$0xff] %vm3071_vm2, %v2977_v31 }
 0x4f6   :  { %v2986_v60 = vpop.xlane.xlu0 %2985 }
 0x4f7   :  { %3075 = vst.msk [vmem:[%s5913_s6 + $0x18] sm:$0xff] %vm3071_vm2, %v2986_v60 }
 0x4f8   :  { %v2980_v20 = vpop.xlane.xlu1 %2979 }
 0x4f9   :  { %3073 = vst.msk [vmem:[%s5913_s6 + $0x8] sm:$0xff] %vm3071_vm2, %v2980_v20 }
 0x4fa   :  { %v2983_v24 = vpop.xlane.xlu0 %2982 }
 0x4fb   :  { %3074 = vst.msk [vmem:[%s5913_s6 + $0x10] sm:$0xff] %vm3071_vm2, %v2983_v24 }
 0x4fc   :  { %v2989_v6 = vpop.xlane.xlu1 %2988 }
 0x4fd   :  { %3076 = vst.msk [vmem:[%s5913_s6 + $0x20] sm:$0xff] %vm3071_vm2, %v2989_v6 }
 0x4fe   :  { %v2992_v3 = vpop.xlane.xlu0 %2991 }
 0x4ff   :  { %3077 = vst.msk [vmem:[%s5913_s6 + $0x28] sm:$0xff] %vm3071_vm2, %v2992_v3 }
 0x500   :  { %v2995_v54 = vpop.xlane.xlu1 %2994 }
 0x501   :  { %3078 = vst.msk [vmem:[%s5913_s6 + $0x30] sm:$0xff] %vm3071_vm2, %v2995_v54 }
 0x502   :  { %v2998_v33 = vpop.xlane.xlu0 %2997 }
 0x503   :  { %3079 = vst.msk [vmem:[%s5913_s6 + $0x38] sm:$0xff] %vm3071_vm2, %v2998_v33 }
 0x504   :  { %v3001_v39 = vpop.xlane.xlu1 %3000 }
 0x505   :  { %3080 = vst.msk [vmem:[%s5913_s6 + $0x40] sm:$0xff] %vm3071_vm2, %v3001_v39 }
 0x506   :  { %v3004_v36 = vpop.xlane.xlu0 %3003 }
 0x507   :  { %3081 = vst.msk [vmem:[%s5913_s6 + $0x48] sm:$0xff] %vm3071_vm2, %v3004_v36 }
 0x508   :  { %v3007_v19 = vpop.xlane.xlu1 %3006 }
 0x509   :  { %3082 = vst.msk [vmem:[%s5913_s6 + $0x50] sm:$0xff] %vm3071_vm2, %v3007_v19 }
 0x50a   :  { %v3010_v15 = vpop.xlane.xlu0 %3009 }
 0x50b   :  { %3083 = vst.msk [vmem:[%s5913_s6 + $0x58] sm:$0xff] %vm3071_vm2, %v3010_v15 }
 0x50e   :  { %v3013_v0 = vpop.xlane.xlu1 %3012  ;;  %v3016_v43 = vpop.xlane.xlu0 %3015 }
 0x50f   :  { %3084 = vst.msk [vmem:[%s5913_s6 + $0x60] sm:$0xff] %vm3071_vm2, %v3013_v0  ;;  %3085 = vst.msk [vmem:[%s5913_s6 + $0x68] sm:$0xff] %vm3071_vm2, %v3016_v43 }
 0x515   :  { %v3022_v4 = vpop.xlane.xlu0 %3021 }
 0x516   :  { %v3019_v29 = vpop.xlane.xlu1 %3018  ;;  %3087 = vst.msk [vmem:[%s5913_s6 + $0x78] sm:$0xff] %vm3071_vm2, %v3022_v4 }
 0x517   :  { %3086 = vst.msk [vmem:[%s5913_s6 + $0x70] sm:$0xff] %vm3071_vm2, %v3019_v29 }
 0x51d   :  { %v3028_v63 = vpop.xlane.xlu0 %3027 }
 0x51e   :  { %v3025_v10 = vpop.xlane.xlu1 %3024  ;;  %3089 = vst.msk [vmem:[%s5913_s6 + $0x88] sm:$0xff] %vm3071_vm2, %v3028_v63 }
 0x51f   :  { %3088 = vst.msk [vmem:[%s5913_s6 + $0x80] sm:$0xff] %vm3071_vm2, %v3025_v10 }
 0x525   :  { %v3034_v42 = vpop.xlane.xlu0 %3033 }
 0x526   :  { %v3031_v56 = vpop.xlane.xlu1 %3030  ;;  %3091 = vst.msk [vmem:[%s5913_s6 + $0x98] sm:$0xff] %vm3071_vm2, %v3034_v42 }
 0x527   :  { %3090 = vst.msk [vmem:[%s5913_s6 + $0x90] sm:$0xff] %vm3071_vm2, %v3031_v56 }
 0x52d   :  { %v3040_v48 = vpop.xlane.xlu0 %3039 }
 0x52e   :  { %v3037_v7 = vpop.xlane.xlu1 %3036  ;;  %3093 = vst.msk [vmem:[%s5913_s6 + $0xa8] sm:$0xff] %vm3071_vm2, %v3040_v48 }
 0x52f   :  { %3092 = vst.msk [vmem:[%s5913_s6 + $0xa0] sm:$0xff] %vm3071_vm2, %v3037_v7 }
 0x535   :  { %v3046_v13 = vpop.xlane.xlu0 %3045 }
 0x536   :  { %v3043_v40 = vpop.xlane.xlu1 %3042  ;;  %3095 = vst.msk [vmem:[%s5913_s6 + $0xb8] sm:$0xff] %vm3071_vm2, %v3046_v13 }
 0x537   :  { %3094 = vst.msk [vmem:[%s5913_s6 + $0xb0] sm:$0xff] %vm3071_vm2, %v3043_v40 }
 0x53d   :  { %v3052_v46 = vpop.xlane.xlu0 %3051 }
 0x53e   :  { %v3049_v11 = vpop.xlane.xlu1 %3048  ;;  %3097 = vst.msk [vmem:[%s5913_s6 + $0xc8] sm:$0xff] %vm3071_vm2, %v3052_v46 }
 0x53f   :  { %3096 = vst.msk [vmem:[%s5913_s6 + $0xc0] sm:$0xff] %vm3071_vm2, %v3049_v11 }
 0x545   :  { %v3058_v47 = vpop.xlane.xlu0 %3057 }
 0x546   :  { %v3055_v52 = vpop.xlane.xlu1 %3054  ;;  %3099 = vst.msk [vmem:[%s5913_s6 + $0xd8] sm:$0xff] %vm3071_vm2, %v3058_v47 }
 0x547   :  { %3098 = vst.msk [vmem:[%s5913_s6 + $0xd0] sm:$0xff] %vm3071_vm2, %v3055_v52 }
 0x54d   :  { %v3064_v61 = vpop.xlane.xlu0 %3063 }
 0x54e   :  { %v3061_v50 = vpop.xlane.xlu1 %3060  ;;  %3101 = vst.msk [vmem:[%s5913_s6 + $0xe8] sm:$0xff] %vm3071_vm2, %v3064_v61 }
 0x54f   :  { %3100 = vst.msk [vmem:[%s5913_s6 + $0xe0] sm:$0xff] %vm3071_vm2, %v3061_v50 }
 0x556   :  { %v3070_v21 = vpop.xlane.xlu0 %3069 }
 0x557   :  { %3103 = vst.msk [vmem:[%s5913_s6 + $0xf8] sm:$0xff] %vm3071_vm2, %v3070_v21 }
 0x559   :  { %v3067_v1 = vpop.xlane.xlu1 %3066 }
 0x55a   :  { %3102 = vst.msk [vmem:[%s5913_s6 + $0xf0] sm:$0xff] %vm3071_vm2, %v3067_v1 }

</bundles_post_ra>
